<compile_context>
chip_gen: v6e
topology: v6e:2x2x1
jax: 0.10.0
libtpu: 0.0.40
codegen_flags: <defaults>
</compile_context>

<pallas_src>
import math
import functools

import jax
import jax.numpy as jnp
from jax.experimental import pallas as pl
from jax.experimental.pallas import tpu as pltpu

# ---------------- configuration (small but shape-consistent with CLIP ViT) -------------
B = 2            # batch
C = 3            # image channels
IMG = 16         # image height/width
PATCH = 4        # patch size (CLIP-L/14 uses 14)
GP = IMG // PATCH
NP = GP * GP     # number of patches
T = NP + 1       # tokens = patches + class token
H = 128          # hidden size (CLIP-L: 1024) -- lane-dense
NH = 4           # attention heads (CLIP-L: 16)
HD = H // NH     # head dim
I = 4 * H        # MLP intermediate size
NUM_LAYERS = 6   # (CLIP-L: 24) scaled down
OUT_DIM = 512    # nn.Linear(hidden, 512)
EPS = 1e-5

# ---------------- in-kernel math helpers ------------------------------------------------


def _layernorm(x, g, b):
    mean = jnp.mean(x, axis=-1, keepdims=True)
    xc = x - mean
    var = jnp.mean(xc * xc, axis=-1, keepdims=True)
    return xc * jax.lax.rsqrt(var + EPS) * g + b


def _quick_gelu(x):
    # CLIP uses QuickGELU: x * sigmoid(1.702 * x)
    return x * jax.nn.sigmoid(1.702 * x)


# ---------------- fused encoder kernel ---------------------------------------------------


def _encoder_kernel(
    x_emb_ref, pre_g_ref, pre_b_ref,
    wq_ref, bq_ref, wk_ref, bk_ref, wv_ref, bv_ref,
    wo_ref, bo_ref, ln1g_ref, ln1b_ref,
    w1_ref, b1_ref, w2_ref, b2_ref, ln2g_ref, ln2b_ref,
    head_w_ref, head_b_ref,
    out_ref,
    x_scr, ctx_scr,
):
    layer = pl.program_id(0)

    # step 0: apply CLIP pre_layrnorm to the embeddings, keep slab resident in VMEM.
    @pl.when(layer == 0)
    def _():
        x_scr[...] = _layernorm(x_emb_ref[...], pre_g_ref[...], pre_b_ref[...])

    x = x_scr[...]                                     # (B*T, H) f32

    def dense(t, w_ref_, b_ref_):
        # bf16 MXU operands, f32 accumulate + f32 bias.
        return jnp.dot(t.astype(jnp.bfloat16), w_ref_[0],
                       preferred_element_type=jnp.float32) + b_ref_[0]

    # ---- self-attention (pre-LN) ----
    xn = _layernorm(x, ln1g_ref[0], ln1b_ref[0])
    q = dense(xn, wq_ref, bq_ref) * (1.0 / math.sqrt(HD))   # scale folded into q once
    k = dense(xn, wk_ref, bk_ref)
    v = dense(xn, wv_ref, bv_ref)

    for b in range(B):                                  # static loops (B=2, NH=4)
        r0, r1 = b * T, (b + 1) * T
        for h in range(NH):
            c0, c1 = h * HD, (h + 1) * HD
            qh = q[r0:r1, c0:c1]
            kh = k[r0:r1, c0:c1]
            vh = v[r0:r1, c0:c1]
            sc = jax.lax.dot_general(
                qh.astype(jnp.bfloat16), kh.astype(jnp.bfloat16),
                (((1,), (1,)), ((), ())), preferred_element_type=jnp.float32)
            m = jnp.max(sc, axis=-1, keepdims=True)
            e = jnp.exp(sc - m)
            p = e * pl.reciprocal(jnp.sum(e, axis=-1, keepdims=True), approx=True)
            # write head context straight into its column slice (no concatenates)
            ctx_scr[r0:r1, c0:c1] = jnp.dot(
                p.astype(jnp.bfloat16), vh.astype(jnp.bfloat16),
                preferred_element_type=jnp.float32)

    attn_out = dense(ctx_scr[...], wo_ref, bo_ref)
    x = x + attn_out

    # ---- MLP (pre-LN, QuickGELU) ----
    xn2 = _layernorm(x, ln2g_ref[0], ln2b_ref[0])
    h1 = _quick_gelu(dense(xn2, w1_ref, b1_ref))
    x = x + dense(h1, w2_ref, b2_ref)
    x_scr[...] = x

    # last step: project all token features H -> OUT_DIM (nn.Linear(1024, 512) analogue)
    @pl.when(layer == pl.num_programs(0) - 1)
    def _():
        out_ref[...] = jnp.dot(x.astype(jnp.bfloat16), head_w_ref[...],
                               preferred_element_type=jnp.float32) + head_b_ref[...]


# ---------------- pallas_call wrapper -----------------------------------------------------


def encoder_call(params, x_emb):
    def full2(shape):
        return pl.BlockSpec(shape, lambda l: (0, 0))

    def stacked(shape):
        # (L, ...) stacked weights: one layer's block per grid step -> auto double-buffered
        return pl.BlockSpec((1,) + shape, lambda l: (l, 0, 0))

    in_specs = [
        full2((B * T, H)),                     # x_emb
        full2((1, H)), full2((1, H)),          # pre-LN gamma/beta
        stacked((H, H)), stacked((1, H)),      # wq, bq
        stacked((H, H)), stacked((1, H)),      # wk, bk
        stacked((H, H)), stacked((1, H)),      # wv, bv
        stacked((H, H)), stacked((1, H)),      # wo, bo
        stacked((1, H)), stacked((1, H)),      # ln1 gamma/beta
        stacked((H, I)), stacked((1, I)),      # w1, b1
        stacked((I, H)), stacked((1, H)),      # w2, b2
        stacked((1, H)), stacked((1, H)),      # ln2 gamma/beta
        full2((H, OUT_DIM)), full2((1, OUT_DIM)),   # head_w, head_b
    ]
    out_specs = pl.BlockSpec((B * T, OUT_DIM), lambda l: (0, 0))

    return pl.pallas_call(
        _encoder_kernel,
        grid_spec=pltpu.PrefetchScalarGridSpec(
            num_scalar_prefetch=0,
            grid=(NUM_LAYERS,),
            in_specs=in_specs,
            out_specs=out_specs,
            scratch_shapes=[
                pltpu.VMEM((B * T, H), jnp.float32),   # resident activation slab
                pltpu.VMEM((B * T, H), jnp.float32),   # attention context buffer
            ],
        ),
        out_shape=jax.ShapeDtypeStruct((B * T, OUT_DIM), jnp.float32),
        compiler_params=pltpu.CompilerParams(
            dimension_semantics=("arbitrary",),        # layer axis is sequential
            vmem_limit_bytes=64 * 1024 * 1024,
        ),
    )(
        x_emb, params["pre_g"], params["pre_b"],
        params["wq"], params["bq"], params["wk"], params["bk"],
        params["wv"], params["bv"], params["wo"], params["bo"],
        params["ln1_g"], params["ln1_b"],
        params["w1"], params["b1"], params["w2"], params["b2"],
        params["ln2_g"], params["ln2_b"],
        params["head_w"], params["head_b"],
    )


# ---------------- parameters (deterministic synthetic init) -------------------------------


def init_params(key):
    keys = iter(jax.random.split(key, 16))

    def nrm(shape, dtype=jnp.float32, std=0.02):
        return (std * jax.random.normal(next(keys), shape)).astype(dtype)

    zeros_f32 = lambda shape: jnp.zeros(shape, jnp.float32)
    ones_f32 = lambda shape: jnp.ones(shape, jnp.float32)

    params = {
        # embedding (conv weight stored pre-flattened as (C*P*P, H) for im2col matmul)
        "patch_w": nrm((C * PATCH * PATCH, H)),
        "class_emb": nrm((1, H)),
        "pos_emb": nrm((T, H)),
        "pre_g": ones_f32((1, H)), "pre_b": zeros_f32((1, H)),
        # stacked transformer layers (matrices in bf16 -> half the weight DMA bytes)
        "wq": nrm((NUM_LAYERS, H, H), jnp.bfloat16), "bq": zeros_f32((NUM_LAYERS, 1, H)),
        "wk": nrm((NUM_LAYERS, H, H), jnp.bfloat16), "bk": zeros_f32((NUM_LAYERS, 1, H)),
        "wv": nrm((NUM_LAYERS, H, H), jnp.bfloat16), "bv": zeros_f32((NUM_LAYERS, 1, H)),
        "wo": nrm((NUM_LAYERS, H, H), jnp.bfloat16), "bo": zeros_f32((NUM_LAYERS, 1, H)),
        "ln1_g": ones_f32((NUM_LAYERS, 1, H)), "ln1_b": zeros_f32((NUM_LAYERS, 1, H)),
        "w1": nrm((NUM_LAYERS, H, I), jnp.bfloat16), "b1": zeros_f32((NUM_LAYERS, 1, I)),
        "w2": nrm((NUM_LAYERS, I, H), jnp.bfloat16), "b2": zeros_f32((NUM_LAYERS, 1, H)),
        "ln2_g": ones_f32((NUM_LAYERS, 1, H)), "ln2_b": zeros_f32((NUM_LAYERS, 1, H)),
        # final Linear(H, 512)
        "head_w": nrm((H, OUT_DIM), jnp.bfloat16),
        "head_b": zeros_f32((1, OUT_DIM)),
    }
    return params


# ---------------- forward (embedding glue in JAX, encoder fused in Pallas) -----------------


def _embed(params, pixel_values):
    # Conv2d(C, H, kernel=PATCH, stride=PATCH, bias=False) as im2col matmul.
    x = pixel_values.reshape(B, C, GP, PATCH, GP, PATCH)
    x = x.transpose(0, 2, 4, 1, 3, 5).reshape(B, NP, C * PATCH * PATCH)
    patch = jnp.dot(x, params["patch_w"])                       # (B, NP, H)
    cls = jnp.broadcast_to(params["class_emb"], (B, 1, H))
    tok = jnp.concatenate([cls, patch], axis=1)                 # (B, T, H)
    tok = tok + params["pos_emb"][None, :, :]
    return tok.reshape(B * T, H).astype(jnp.float32)


@functools.partial(jax.jit, static_argnums=())
def clip_image_encoder_forward(params, pixel_values):
    x_emb = _embed(params, pixel_values)
    out = encoder_call(params, x_emb)                           # (B*T, 512)
    return out.reshape(B, T, OUT_DIM)


# ---------------- main ----------------------------------------------------------------------

if __name__ == "__main__":
    key = jax.random.PRNGKey(0)
    pkey, xkey = jax.random.split(key)

    params = init_params(pkey)
    pixel_values = jax.random.normal(xkey, (B, C, IMG, IMG), dtype=jnp.float32)

    out = clip_image_encoder_forward(params, pixel_values)
    out = jax.block_until_ready(out)

    assert out.shape == (B, T, OUT_DIM)
    assert bool(jnp.all(jnp.isfinite(out)))
    print("KERNEL_OK")
</pallas_src>

<mosaic_0001>
module attributes {stable_mosaic.version = 11 : i64} {
  func.func @_encoder_kernel(%arg0: i32, %arg1: memref<34x128xf32, #tpu.memory_space<vmem>>, %arg2: memref<1x128xf32, #tpu.memory_space<vmem>>, %arg3: memref<1x128xf32, #tpu.memory_space<vmem>>, %arg4: memref<1x128x128xbf16, #tpu.memory_space<vmem>>, %arg5: memref<1x1x128xf32, #tpu.memory_space<vmem>>, %arg6: memref<1x128x128xbf16, #tpu.memory_space<vmem>>, %arg7: memref<1x1x128xf32, #tpu.memory_space<vmem>>, %arg8: memref<1x128x128xbf16, #tpu.memory_space<vmem>>, %arg9: memref<1x1x128xf32, #tpu.memory_space<vmem>>, %arg10: memref<1x128x128xbf16, #tpu.memory_space<vmem>>, %arg11: memref<1x1x128xf32, #tpu.memory_space<vmem>>, %arg12: memref<1x1x128xf32, #tpu.memory_space<vmem>>, %arg13: memref<1x1x128xf32, #tpu.memory_space<vmem>>, %arg14: memref<1x128x512xbf16, #tpu.memory_space<vmem>>, %arg15: memref<1x1x512xf32, #tpu.memory_space<vmem>>, %arg16: memref<1x512x128xbf16, #tpu.memory_space<vmem>>, %arg17: memref<1x1x128xf32, #tpu.memory_space<vmem>>, %arg18: memref<1x1x128xf32, #tpu.memory_space<vmem>>, %arg19: memref<1x1x128xf32, #tpu.memory_space<vmem>>, %arg20: memref<128x512xbf16, #tpu.memory_space<vmem>>, %arg21: memref<1x512xf32, #tpu.memory_space<vmem>>, %arg22: memref<34x512xf32, #tpu.memory_space<vmem>>, %arg23: memref<34x128xf32, #tpu.memory_space<vmem>>, %arg24: memref<34x128xf32, #tpu.memory_space<vmem>>) attributes {dimension_semantics = [#tpu.dimension_semantics<arbitrary>], iteration_bounds = array<i64: 6>, scalar_prefetch = 0 : i64, scratch_operands = 2 : i64, tpu.core_type = #tpu.core_type<tc>, window_params = [{pipeline_mode = #tpu.pipeline_mode<synchronous>, transform_indices = @transform_0, window_bounds = array<i64: 34, 128>}, {pipeline_mode = #tpu.pipeline_mode<synchronous>, transform_indices = @transform_1, window_bounds = array<i64: 1, 128>}, {pipeline_mode = #tpu.pipeline_mode<synchronous>, transform_indices = @transform_2, window_bounds = array<i64: 1, 128>}, {transform_indices = @transform_3, window_bounds = array<i64: 1, 128, 128>}, {transform_indices = @transform_4, window_bounds = array<i64: 1, 1, 128>}, {transform_indices = @transform_5, window_bounds = array<i64: 1, 128, 128>}, {transform_indices = @transform_6, window_bounds = array<i64: 1, 1, 128>}, {transform_indices = @transform_7, window_bounds = array<i64: 1, 128, 128>}, {transform_indices = @transform_8, window_bounds = array<i64: 1, 1, 128>}, {transform_indices = @transform_9, window_bounds = array<i64: 1, 128, 128>}, {transform_indices = @transform_10, window_bounds = array<i64: 1, 1, 128>}, {transform_indices = @transform_11, window_bounds = array<i64: 1, 1, 128>}, {transform_indices = @transform_12, window_bounds = array<i64: 1, 1, 128>}, {transform_indices = @transform_13, window_bounds = array<i64: 1, 128, 512>}, {transform_indices = @transform_14, window_bounds = array<i64: 1, 1, 512>}, {transform_indices = @transform_15, window_bounds = array<i64: 1, 512, 128>}, {transform_indices = @transform_16, window_bounds = array<i64: 1, 1, 128>}, {transform_indices = @transform_17, window_bounds = array<i64: 1, 1, 128>}, {transform_indices = @transform_18, window_bounds = array<i64: 1, 1, 128>}, {pipeline_mode = #tpu.pipeline_mode<synchronous>, transform_indices = @transform_19, window_bounds = array<i64: 128, 512>}, {pipeline_mode = #tpu.pipeline_mode<synchronous>, transform_indices = @transform_20, window_bounds = array<i64: 1, 512>}, {pipeline_mode = #tpu.pipeline_mode<synchronous>, transform_indices = @transform_21, window_bounds = array<i64: 34, 512>}]} {
    %c0_i32 = arith.constant 0 : i32
    %0 = arith.cmpi eq, %arg0, %c0_i32 : i32
    %1 = arith.extui %0 : i1 to i32
    %c0_i32_0 = arith.constant 0 : i32
    %2 = arith.cmpi ne, %1, %c0_i32_0 : i32
    scf.if %2 {
      %c0_117 = arith.constant 0 : index
      %c0_118 = arith.constant 0 : index
      %277 = vector.load %arg1[%c0_117, %c0_118] : memref<34x128xf32, #tpu.memory_space<vmem>>, vector<34x128xf32>
      %c0_119 = arith.constant 0 : index
      %c0_120 = arith.constant 0 : index
      %278 = vector.load %arg2[%c0_119, %c0_120] : memref<1x128xf32, #tpu.memory_space<vmem>>, vector<1x128xf32>
      %c0_121 = arith.constant 0 : index
      %c0_122 = arith.constant 0 : index
      %279 = vector.load %arg3[%c0_121, %c0_122] : memref<1x128xf32, #tpu.memory_space<vmem>>, vector<1x128xf32>
      %cst_123 = arith.constant dense<0.000000e+00> : vector<34xf32>
      %280 = vector.multi_reduction <add>, %277, %cst_123 [1] : vector<34x128xf32> to vector<34xf32>
      %281 = vector.shape_cast %280 : vector<34xf32> to vector<34x1xf32>
      %cst_124 = arith.constant 1.280000e+02 : f32
      %282 = vector.broadcast %cst_124 : f32 to vector<34x1xf32>
      %283 = arith.divf %281, %282 : vector<34x1xf32>
      %284 = vector.broadcast %283 : vector<34x1xf32> to vector<34x128xf32>
      %285 = arith.subf %277, %284 : vector<34x128xf32>
      %286 = arith.mulf %285, %285 : vector<34x128xf32>
      %cst_125 = arith.constant dense<0.000000e+00> : vector<34xf32>
      %287 = vector.multi_reduction <add>, %286, %cst_125 [1] : vector<34x128xf32> to vector<34xf32>
      %288 = vector.shape_cast %287 : vector<34xf32> to vector<34x1xf32>
      %cst_126 = arith.constant 1.280000e+02 : f32
      %289 = vector.broadcast %cst_126 : f32 to vector<34x1xf32>
      %290 = arith.divf %288, %289 : vector<34x1xf32>
      %cst_127 = arith.constant 9.99999974E-6 : f32
      %291 = vector.broadcast %cst_127 : f32 to vector<34x1xf32>
      %292 = arith.addf %290, %291 : vector<34x1xf32>
      %293 = math.rsqrt %292 : vector<34x1xf32>
      %294 = vector.broadcast %293 : vector<34x1xf32> to vector<34x128xf32>
      %295 = arith.mulf %285, %294 : vector<34x128xf32>
      %296 = vector.broadcast %278 : vector<1x128xf32> to vector<34x128xf32>
      %297 = arith.mulf %295, %296 : vector<34x128xf32>
      %298 = vector.broadcast %279 : vector<1x128xf32> to vector<34x128xf32>
      %299 = arith.addf %297, %298 : vector<34x128xf32>
      %c0_128 = arith.constant 0 : index
      %c0_129 = arith.constant 0 : index
      %300 = vector.load %arg23[%c0_128, %c0_129] : memref<34x128xf32, #tpu.memory_space<vmem>>, vector<34x128xf32>
      tpu.vector_store %arg23[%c0_128, %c0_129], %299 {strides = array<i32>} : memref<34x128xf32, #tpu.memory_space<vmem>>, vector<34x128xf32>,
    } else {
    }
    %c0 = arith.constant 0 : index
    %c0_1 = arith.constant 0 : index
    %3 = vector.load %arg23[%c0, %c0_1] : memref<34x128xf32, #tpu.memory_space<vmem>>, vector<34x128xf32>
    %c0_2 = arith.constant 0 : index
    %c0_3 = arith.constant 0 : index
    %c0_4 = arith.constant 0 : index
    %4 = vector.load %arg12[%c0_2, %c0_3, %c0_4] : memref<1x1x128xf32, #tpu.memory_space<vmem>>, vector<1x1x128xf32>
    %5 = vector.shape_cast %4 : vector<1x1x128xf32> to vector<1x128xf32>
    %c0_5 = arith.constant 0 : index
    %c0_6 = arith.constant 0 : index
    %c0_7 = arith.constant 0 : index
    %6 = vector.load %arg13[%c0_5, %c0_6, %c0_7] : memref<1x1x128xf32, #tpu.memory_space<vmem>>, vector<1x1x128xf32>
    %7 = vector.shape_cast %6 : vector<1x1x128xf32> to vector<1x128xf32>
    %cst = arith.constant dense<0.000000e+00> : vector<34xf32>
    %8 = vector.multi_reduction <add>, %3, %cst [1] : vector<34x128xf32> to vector<34xf32>
    %9 = vector.shape_cast %8 : vector<34xf32> to vector<34x1xf32>
    %cst_8 = arith.constant 1.280000e+02 : f32
    %10 = vector.broadcast %cst_8 : f32 to vector<34x1xf32>
    %11 = arith.divf %9, %10 : vector<34x1xf32>
    %12 = vector.broadcast %11 : vector<34x1xf32> to vector<34x128xf32>
    %13 = arith.subf %3, %12 : vector<34x128xf32>
    %14 = arith.mulf %13, %13 : vector<34x128xf32>
    %cst_9 = arith.constant dense<0.000000e+00> : vector<34xf32>
    %15 = vector.multi_reduction <add>, %14, %cst_9 [1] : vector<34x128xf32> to vector<34xf32>
    %16 = vector.shape_cast %15 : vector<34xf32> to vector<34x1xf32>
    %cst_10 = arith.constant 1.280000e+02 : f32
    %17 = vector.broadcast %cst_10 : f32 to vector<34x1xf32>
    %18 = arith.divf %16, %17 : vector<34x1xf32>
    %cst_11 = arith.constant 9.99999974E-6 : f32
    %19 = vector.broadcast %cst_11 : f32 to vector<34x1xf32>
    %20 = arith.addf %18, %19 : vector<34x1xf32>
    %21 = math.rsqrt %20 : vector<34x1xf32>
    %22 = vector.broadcast %21 : vector<34x1xf32> to vector<34x128xf32>
    %23 = arith.mulf %13, %22 : vector<34x128xf32>
    %24 = vector.broadcast %5 : vector<1x128xf32> to vector<34x128xf32>
    %25 = arith.mulf %23, %24 : vector<34x128xf32>
    %26 = vector.broadcast %7 : vector<1x128xf32> to vector<34x128xf32>
    %27 = arith.addf %25, %26 : vector<34x128xf32>
    %28 = arith.truncf %27 : vector<34x128xf32> to vector<34x128xbf16>
    %c0_12 = arith.constant 0 : index
    %c0_13 = arith.constant 0 : index
    %c0_14 = arith.constant 0 : index
    %29 = vector.load %arg4[%c0_12, %c0_13, %c0_14] : memref<1x128x128xbf16, #tpu.memory_space<vmem>>, vector<1x128x128xbf16>
    %30 = vector.shape_cast %29 : vector<1x128x128xbf16> to vector<128x128xbf16>
    %cst_15 = arith.constant dense<0.000000e+00> : vector<34x128xf32>
    %31 = tpu.matmul %28, %30, %cst_15 {dimension_numbers = #tpu.dot_dimension_numbers<[1], [0], [0], [1], [0, 0, 1, 1], [], []>} : vector<34x128xbf16>, vector<128x128xbf16>, vector<34x128xf32> -> vector<34x128xf32>
    %c0_16 = arith.constant 0 : index
    %c0_17 = arith.constant 0 : index
    %c0_18 = arith.constant 0 : index
    %32 = vector.load %arg5[%c0_16, %c0_17, %c0_18] : memref<1x1x128xf32, #tpu.memory_space<vmem>>, vector<1x1x128xf32>
    %33 = vector.shape_cast %32 : vector<1x1x128xf32> to vector<1x128xf32>
    %34 = vector.broadcast %33 : vector<1x128xf32> to vector<34x128xf32>
    %35 = arith.addf %31, %34 : vector<34x128xf32>
    %cst_19 = arith.constant 0.176776692 : f32
    %36 = vector.broadcast %cst_19 : f32 to vector<34x128xf32>
    %37 = arith.mulf %35, %36 : vector<34x128xf32>
    %38 = arith.truncf %27 : vector<34x128xf32> to vector<34x128xbf16>
    %c0_20 = arith.constant 0 : index
    %c0_21 = arith.constant 0 : index
    %c0_22 = arith.constant 0 : index
    %39 = vector.load %arg6[%c0_20, %c0_21, %c0_22] : memref<1x128x128xbf16, #tpu.memory_space<vmem>>, vector<1x128x128xbf16>
    %40 = vector.shape_cast %39 : vector<1x128x128xbf16> to vector<128x128xbf16>
    %cst_23 = arith.constant dense<0.000000e+00> : vector<34x128xf32>
    %41 = tpu.matmul %38, %40, %cst_23 {dimension_numbers = #tpu.dot_dimension_numbers<[1], [0], [0], [1], [0, 0, 1, 1], [], []>} : vector<34x128xbf16>, vector<128x128xbf16>, vector<34x128xf32> -> vector<34x128xf32>
    %c0_24 = arith.constant 0 : index
    %c0_25 = arith.constant 0 : index
    %c0_26 = arith.constant 0 : index
    %42 = vector.load %arg7[%c0_24, %c0_25, %c0_26] : memref<1x1x128xf32, #tpu.memory_space<vmem>>, vector<1x1x128xf32>
    %43 = vector.shape_cast %42 : vector<1x1x128xf32> to vector<1x128xf32>
    %44 = vector.broadcast %43 : vector<1x128xf32> to vector<34x128xf32>
    %45 = arith.addf %41, %44 : vector<34x128xf32>
    %46 = arith.truncf %27 : vector<34x128xf32> to vector<34x128xbf16>
    %c0_27 = arith.constant 0 : index
    %c0_28 = arith.constant 0 : index
    %c0_29 = arith.constant 0 : index
    %47 = vector.load %arg8[%c0_27, %c0_28, %c0_29] : memref<1x128x128xbf16, #tpu.memory_space<vmem>>, vector<1x128x128xbf16>
    %48 = vector.shape_cast %47 : vector<1x128x128xbf16> to vector<128x128xbf16>
    %cst_30 = arith.constant dense<0.000000e+00> : vector<34x128xf32>
    %49 = tpu.matmul %46, %48, %cst_30 {dimension_numbers = #tpu.dot_dimension_numbers<[1], [0], [0], [1], [0, 0, 1, 1], [], []>} : vector<34x128xbf16>, vector<128x128xbf16>, vector<34x128xf32> -> vector<34x128xf32>
    %c0_31 = arith.constant 0 : index
    %c0_32 = arith.constant 0 : index
    %c0_33 = arith.constant 0 : index
    %50 = vector.load %arg9[%c0_31, %c0_32, %c0_33] : memref<1x1x128xf32, #tpu.memory_space<vmem>>, vector<1x1x128xf32>
    %51 = vector.shape_cast %50 : vector<1x1x128xf32> to vector<1x128xf32>
    %52 = vector.broadcast %51 : vector<1x128xf32> to vector<34x128xf32>
    %53 = arith.addf %49, %52 : vector<34x128xf32>
    %54 = vector.extract_strided_slice %37 {offsets = [0, 0], sizes = [17, 32], strides = [1, 1]} : vector<34x128xf32> to vector<17x32xf32>
    %55 = vector.extract_strided_slice %45 {offsets = [0, 0], sizes = [17, 32], strides = [1, 1]} : vector<34x128xf32> to vector<17x32xf32>
    %56 = vector.extract_strided_slice %53 {offsets = [0, 0], sizes = [17, 32], strides = [1, 1]} : vector<34x128xf32> to vector<17x32xf32>
    %57 = arith.truncf %54 : vector<17x32xf32> to vector<17x32xbf16>
    %58 = arith.truncf %55 : vector<17x32xf32> to vector<17x32xbf16>
    %cst_34 = arith.constant dense<0.000000e+00> : vector<17x17xf32>
    %59 = tpu.matmul %57, %58, %cst_34 {dimension_numbers = #tpu.dot_dimension_numbers<[1], [1], [0], [0], [0, 0, 1, 0], [], []>} : vector<17x32xbf16>, vector<17x32xbf16>, vector<17x17xf32> -> vector<17x17xf32>
    %cst_35 = arith.constant dense<0xFF800000> : vector<17xf32>
    %60 = vector.multi_reduction <maximumf>, %59, %cst_35 [1] : vector<17x17xf32> to vector<17xf32>
    %61 = vector.shape_cast %60 : vector<17xf32> to vector<17x1xf32>
    %62 = vector.broadcast %61 : vector<17x1xf32> to vector<17x17xf32>
    %63 = arith.subf %59, %62 : vector<17x17xf32>
    %64 = math.exp %63 : vector<17x17xf32>
    %cst_36 = arith.constant dense<0.000000e+00> : vector<17xf32>
    %65 = vector.multi_reduction <add>, %64, %cst_36 [1] : vector<17x17xf32> to vector<17xf32>
    %66 = vector.shape_cast %65 : vector<17xf32> to vector<17x1xf32>
    %67 = tpu.reciprocal %66 {approx = true} : vector<17x1xf32> -> vector<17x1xf32>
    %68 = vector.broadcast %67 : vector<17x1xf32> to vector<17x17xf32>
    %69 = arith.mulf %64, %68 : vector<17x17xf32>
    %70 = arith.truncf %69 : vector<17x17xf32> to vector<17x17xbf16>
    %71 = arith.truncf %56 : vector<17x32xf32> to vector<17x32xbf16>
    %cst_37 = arith.constant dense<0.000000e+00> : vector<17x32xf32>
    %72 = tpu.matmul %70, %71, %cst_37 {dimension_numbers = #tpu.dot_dimension_numbers<[1], [0], [0], [1], [0, 0, 1, 1], [], []>} : vector<17x17xbf16>, vector<17x32xbf16>, vector<17x32xf32> -> vector<17x32xf32>
    %c0_38 = arith.constant 0 : index
    %c0_39 = arith.constant 0 : index
    %73 = vector.load %arg24[%c0_38, %c0_39] : memref<34x128xf32, #tpu.memory_space<vmem>>, vector<17x32xf32>
    tpu.vector_store %arg24[%c0_38, %c0_39], %72 {strides = array<i32>} : memref<34x128xf32, #tpu.memory_space<vmem>>, vector<17x32xf32>,
    %74 = vector.extract_strided_slice %37 {offsets = [0, 32], sizes = [17, 32], strides = [1, 1]} : vector<34x128xf32> to vector<17x32xf32>
    %75 = vector.extract_strided_slice %45 {offsets = [0, 32], sizes = [17, 32], strides = [1, 1]} : vector<34x128xf32> to vector<17x32xf32>
    %76 = vector.extract_strided_slice %53 {offsets = [0, 32], sizes = [17, 32], strides = [1, 1]} : vector<34x128xf32> to vector<17x32xf32>
    %77 = arith.truncf %74 : vector<17x32xf32> to vector<17x32xbf16>
    %78 = arith.truncf %75 : vector<17x32xf32> to vector<17x32xbf16>
    %cst_40 = arith.constant dense<0.000000e+00> : vector<17x17xf32>
    %79 = tpu.matmul %77, %78, %cst_40 {dimension_numbers = #tpu.dot_dimension_numbers<[1], [1], [0], [0], [0, 0, 1, 0], [], []>} : vector<17x32xbf16>, vector<17x32xbf16>, vector<17x17xf32> -> vector<17x17xf32>
    %cst_41 = arith.constant dense<0xFF800000> : vector<17xf32>
    %80 = vector.multi_reduction <maximumf>, %79, %cst_41 [1] : vector<17x17xf32> to vector<17xf32>
    %81 = vector.shape_cast %80 : vector<17xf32> to vector<17x1xf32>
    %82 = vector.broadcast %81 : vector<17x1xf32> to vector<17x17xf32>
    %83 = arith.subf %79, %82 : vector<17x17xf32>
    %84 = math.exp %83 : vector<17x17xf32>
    %cst_42 = arith.constant dense<0.000000e+00> : vector<17xf32>
    %85 = vector.multi_reduction <add>, %84, %cst_42 [1] : vector<17x17xf32> to vector<17xf32>
    %86 = vector.shape_cast %85 : vector<17xf32> to vector<17x1xf32>
    %87 = tpu.reciprocal %86 {approx = true} : vector<17x1xf32> -> vector<17x1xf32>
    %88 = vector.broadcast %87 : vector<17x1xf32> to vector<17x17xf32>
    %89 = arith.mulf %84, %88 : vector<17x17xf32>
    %90 = arith.truncf %89 : vector<17x17xf32> to vector<17x17xbf16>
    %91 = arith.truncf %76 : vector<17x32xf32> to vector<17x32xbf16>
    %cst_43 = arith.constant dense<0.000000e+00> : vector<17x32xf32>
    %92 = tpu.matmul %90, %91, %cst_43 {dimension_numbers = #tpu.dot_dimension_numbers<[1], [0], [0], [1], [0, 0, 1, 1], [], []>} : vector<17x17xbf16>, vector<17x32xbf16>, vector<17x32xf32> -> vector<17x32xf32>
    %c0_44 = arith.constant 0 : index
    %c32 = arith.constant 32 : index
    %93 = vector.load %arg24[%c0_44, %c32] : memref<34x128xf32, #tpu.memory_space<vmem>>, vector<17x32xf32>
    tpu.vector_store %arg24[%c0_44, %c32], %92 {strides = array<i32>} : memref<34x128xf32, #tpu.memory_space<vmem>>, vector<17x32xf32>,
    %94 = vector.extract_strided_slice %37 {offsets = [0, 64], sizes = [17, 32], strides = [1, 1]} : vector<34x128xf32> to vector<17x32xf32>
    %95 = vector.extract_strided_slice %45 {offsets = [0, 64], sizes = [17, 32], strides = [1, 1]} : vector<34x128xf32> to vector<17x32xf32>
    %96 = vector.extract_strided_slice %53 {offsets = [0, 64], sizes = [17, 32], strides = [1, 1]} : vector<34x128xf32> to vector<17x32xf32>
    %97 = arith.truncf %94 : vector<17x32xf32> to vector<17x32xbf16>
    %98 = arith.truncf %95 : vector<17x32xf32> to vector<17x32xbf16>
    %cst_45 = arith.constant dense<0.000000e+00> : vector<17x17xf32>
    %99 = tpu.matmul %97, %98, %cst_45 {dimension_numbers = #tpu.dot_dimension_numbers<[1], [1], [0], [0], [0, 0, 1, 0], [], []>} : vector<17x32xbf16>, vector<17x32xbf16>, vector<17x17xf32> -> vector<17x17xf32>
    %cst_46 = arith.constant dense<0xFF800000> : vector<17xf32>
    %100 = vector.multi_reduction <maximumf>, %99, %cst_46 [1] : vector<17x17xf32> to vector<17xf32>
    %101 = vector.shape_cast %100 : vector<17xf32> to vector<17x1xf32>
    %102 = vector.broadcast %101 : vector<17x1xf32> to vector<17x17xf32>
    %103 = arith.subf %99, %102 : vector<17x17xf32>
    %104 = math.exp %103 : vector<17x17xf32>
    %cst_47 = arith.constant dense<0.000000e+00> : vector<17xf32>
    %105 = vector.multi_reduction <add>, %104, %cst_47 [1] : vector<17x17xf32> to vector<17xf32>
    %106 = vector.shape_cast %105 : vector<17xf32> to vector<17x1xf32>
    %107 = tpu.reciprocal %106 {approx = true} : vector<17x1xf32> -> vector<17x1xf32>
    %108 = vector.broadcast %107 : vector<17x1xf32> to vector<17x17xf32>
    %109 = arith.mulf %104, %108 : vector<17x17xf32>
    %110 = arith.truncf %109 : vector<17x17xf32> to vector<17x17xbf16>
    %111 = arith.truncf %96 : vector<17x32xf32> to vector<17x32xbf16>
    %cst_48 = arith.constant dense<0.000000e+00> : vector<17x32xf32>
    %112 = tpu.matmul %110, %111, %cst_48 {dimension_numbers = #tpu.dot_dimension_numbers<[1], [0], [0], [1], [0, 0, 1, 1], [], []>} : vector<17x17xbf16>, vector<17x32xbf16>, vector<17x32xf32> -> vector<17x32xf32>
    %c0_49 = arith.constant 0 : index
    %c64 = arith.constant 64 : index
    %113 = vector.load %arg24[%c0_49, %c64] : memref<34x128xf32, #tpu.memory_space<vmem>>, vector<17x32xf32>
    tpu.vector_store %arg24[%c0_49, %c64], %112 {strides = array<i32>} : memref<34x128xf32, #tpu.memory_space<vmem>>, vector<17x32xf32>,
    %114 = vector.extract_strided_slice %37 {offsets = [0, 96], sizes = [17, 32], strides = [1, 1]} : vector<34x128xf32> to vector<17x32xf32>
    %115 = vector.extract_strided_slice %45 {offsets = [0, 96], sizes = [17, 32], strides = [1, 1]} : vector<34x128xf32> to vector<17x32xf32>
    %116 = vector.extract_strided_slice %53 {offsets = [0, 96], sizes = [17, 32], strides = [1, 1]} : vector<34x128xf32> to vector<17x32xf32>
    %117 = arith.truncf %114 : vector<17x32xf32> to vector<17x32xbf16>
    %118 = arith.truncf %115 : vector<17x32xf32> to vector<17x32xbf16>
    %cst_50 = arith.constant dense<0.000000e+00> : vector<17x17xf32>
    %119 = tpu.matmul %117, %118, %cst_50 {dimension_numbers = #tpu.dot_dimension_numbers<[1], [1], [0], [0], [0, 0, 1, 0], [], []>} : vector<17x32xbf16>, vector<17x32xbf16>, vector<17x17xf32> -> vector<17x17xf32>
    %cst_51 = arith.constant dense<0xFF800000> : vector<17xf32>
    %120 = vector.multi_reduction <maximumf>, %119, %cst_51 [1] : vector<17x17xf32> to vector<17xf32>
    %121 = vector.shape_cast %120 : vector<17xf32> to vector<17x1xf32>
    %122 = vector.broadcast %121 : vector<17x1xf32> to vector<17x17xf32>
    %123 = arith.subf %119, %122 : vector<17x17xf32>
    %124 = math.exp %123 : vector<17x17xf32>
    %cst_52 = arith.constant dense<0.000000e+00> : vector<17xf32>
    %125 = vector.multi_reduction <add>, %124, %cst_52 [1] : vector<17x17xf32> to vector<17xf32>
    %126 = vector.shape_cast %125 : vector<17xf32> to vector<17x1xf32>
    %127 = tpu.reciprocal %126 {approx = true} : vector<17x1xf32> -> vector<17x1xf32>
    %128 = vector.broadcast %127 : vector<17x1xf32> to vector<17x17xf32>
    %129 = arith.mulf %124, %128 : vector<17x17xf32>
    %130 = arith.truncf %129 : vector<17x17xf32> to vector<17x17xbf16>
    %131 = arith.truncf %116 : vector<17x32xf32> to vector<17x32xbf16>
    %cst_53 = arith.constant dense<0.000000e+00> : vector<17x32xf32>
    %132 = tpu.matmul %130, %131, %cst_53 {dimension_numbers = #tpu.dot_dimension_numbers<[1], [0], [0], [1], [0, 0, 1, 1], [], []>} : vector<17x17xbf16>, vector<17x32xbf16>, vector<17x32xf32> -> vector<17x32xf32>
    %c0_54 = arith.constant 0 : index
    %c96 = arith.constant 96 : index
    %133 = vector.load %arg24[%c0_54, %c96] : memref<34x128xf32, #tpu.memory_space<vmem>>, vector<17x32xf32>
    tpu.vector_store %arg24[%c0_54, %c96], %132 {strides = array<i32>} : memref<34x128xf32, #tpu.memory_space<vmem>>, vector<17x32xf32>,
    %134 = vector.extract_strided_slice %37 {offsets = [17, 0], sizes = [17, 32], strides = [1, 1]} : vector<34x128xf32> to vector<17x32xf32>
    %135 = vector.extract_strided_slice %45 {offsets = [17, 0], sizes = [17, 32], strides = [1, 1]} : vector<34x128xf32> to vector<17x32xf32>
    %136 = vector.extract_strided_slice %53 {offsets = [17, 0], sizes = [17, 32], strides = [1, 1]} : vector<34x128xf32> to vector<17x32xf32>
    %137 = arith.truncf %134 : vector<17x32xf32> to vector<17x32xbf16>
    %138 = arith.truncf %135 : vector<17x32xf32> to vector<17x32xbf16>
    %cst_55 = arith.constant dense<0.000000e+00> : vector<17x17xf32>
    %139 = tpu.matmul %137, %138, %cst_55 {dimension_numbers = #tpu.dot_dimension_numbers<[1], [1], [0], [0], [0, 0, 1, 0], [], []>} : vector<17x32xbf16>, vector<17x32xbf16>, vector<17x17xf32> -> vector<17x17xf32>
    %cst_56 = arith.constant dense<0xFF800000> : vector<17xf32>
    %140 = vector.multi_reduction <maximumf>, %139, %cst_56 [1] : vector<17x17xf32> to vector<17xf32>
    %141 = vector.shape_cast %140 : vector<17xf32> to vector<17x1xf32>
    %142 = vector.broadcast %141 : vector<17x1xf32> to vector<17x17xf32>
    %143 = arith.subf %139, %142 : vector<17x17xf32>
    %144 = math.exp %143 : vector<17x17xf32>
    %cst_57 = arith.constant dense<0.000000e+00> : vector<17xf32>
    %145 = vector.multi_reduction <add>, %144, %cst_57 [1] : vector<17x17xf32> to vector<17xf32>
    %146 = vector.shape_cast %145 : vector<17xf32> to vector<17x1xf32>
    %147 = tpu.reciprocal %146 {approx = true} : vector<17x1xf32> -> vector<17x1xf32>
    %148 = vector.broadcast %147 : vector<17x1xf32> to vector<17x17xf32>
    %149 = arith.mulf %144, %148 : vector<17x17xf32>
    %150 = arith.truncf %149 : vector<17x17xf32> to vector<17x17xbf16>
    %151 = arith.truncf %136 : vector<17x32xf32> to vector<17x32xbf16>
    %cst_58 = arith.constant dense<0.000000e+00> : vector<17x32xf32>
    %152 = tpu.matmul %150, %151, %cst_58 {dimension_numbers = #tpu.dot_dimension_numbers<[1], [0], [0], [1], [0, 0, 1, 1], [], []>} : vector<17x17xbf16>, vector<17x32xbf16>, vector<17x32xf32> -> vector<17x32xf32>
    %c17 = arith.constant 17 : index
    %c0_59 = arith.constant 0 : index
    %153 = vector.load %arg24[%c17, %c0_59] : memref<34x128xf32, #tpu.memory_space<vmem>>, vector<17x32xf32>
    tpu.vector_store %arg24[%c17, %c0_59], %152 {strides = array<i32>} : memref<34x128xf32, #tpu.memory_space<vmem>>, vector<17x32xf32>,
    %154 = vector.extract_strided_slice %37 {offsets = [17, 32], sizes = [17, 32], strides = [1, 1]} : vector<34x128xf32> to vector<17x32xf32>
    %155 = vector.extract_strided_slice %45 {offsets = [17, 32], sizes = [17, 32], strides = [1, 1]} : vector<34x128xf32> to vector<17x32xf32>
    %156 = vector.extract_strided_slice %53 {offsets = [17, 32], sizes = [17, 32], strides = [1, 1]} : vector<34x128xf32> to vector<17x32xf32>
    %157 = arith.truncf %154 : vector<17x32xf32> to vector<17x32xbf16>
    %158 = arith.truncf %155 : vector<17x32xf32> to vector<17x32xbf16>
    %cst_60 = arith.constant dense<0.000000e+00> : vector<17x17xf32>
    %159 = tpu.matmul %157, %158, %cst_60 {dimension_numbers = #tpu.dot_dimension_numbers<[1], [1], [0], [0], [0, 0, 1, 0], [], []>} : vector<17x32xbf16>, vector<17x32xbf16>, vector<17x17xf32> -> vector<17x17xf32>
    %cst_61 = arith.constant dense<0xFF800000> : vector<17xf32>
    %160 = vector.multi_reduction <maximumf>, %159, %cst_61 [1] : vector<17x17xf32> to vector<17xf32>
    %161 = vector.shape_cast %160 : vector<17xf32> to vector<17x1xf32>
    %162 = vector.broadcast %161 : vector<17x1xf32> to vector<17x17xf32>
    %163 = arith.subf %159, %162 : vector<17x17xf32>
    %164 = math.exp %163 : vector<17x17xf32>
    %cst_62 = arith.constant dense<0.000000e+00> : vector<17xf32>
    %165 = vector.multi_reduction <add>, %164, %cst_62 [1] : vector<17x17xf32> to vector<17xf32>
    %166 = vector.shape_cast %165 : vector<17xf32> to vector<17x1xf32>
    %167 = tpu.reciprocal %166 {approx = true} : vector<17x1xf32> -> vector<17x1xf32>
    %168 = vector.broadcast %167 : vector<17x1xf32> to vector<17x17xf32>
    %169 = arith.mulf %164, %168 : vector<17x17xf32>
    %170 = arith.truncf %169 : vector<17x17xf32> to vector<17x17xbf16>
    %171 = arith.truncf %156 : vector<17x32xf32> to vector<17x32xbf16>
    %cst_63 = arith.constant dense<0.000000e+00> : vector<17x32xf32>
    %172 = tpu.matmul %170, %171, %cst_63 {dimension_numbers = #tpu.dot_dimension_numbers<[1], [0], [0], [1], [0, 0, 1, 1], [], []>} : vector<17x17xbf16>, vector<17x32xbf16>, vector<17x32xf32> -> vector<17x32xf32>
    %c17_64 = arith.constant 17 : index
    %c32_65 = arith.constant 32 : index
    %173 = vector.load %arg24[%c17_64, %c32_65] : memref<34x128xf32, #tpu.memory_space<vmem>>, vector<17x32xf32>
    tpu.vector_store %arg24[%c17_64, %c32_65], %172 {strides = array<i32>} : memref<34x128xf32, #tpu.memory_space<vmem>>, vector<17x32xf32>,
    %174 = vector.extract_strided_slice %37 {offsets = [17, 64], sizes = [17, 32], strides = [1, 1]} : vector<34x128xf32> to vector<17x32xf32>
    %175 = vector.extract_strided_slice %45 {offsets = [17, 64], sizes = [17, 32], strides = [1, 1]} : vector<34x128xf32> to vector<17x32xf32>
    %176 = vector.extract_strided_slice %53 {offsets = [17, 64], sizes = [17, 32], strides = [1, 1]} : vector<34x128xf32> to vector<17x32xf32>
    %177 = arith.truncf %174 : vector<17x32xf32> to vector<17x32xbf16>
    %178 = arith.truncf %175 : vector<17x32xf32> to vector<17x32xbf16>
    %cst_66 = arith.constant dense<0.000000e+00> : vector<17x17xf32>
    %179 = tpu.matmul %177, %178, %cst_66 {dimension_numbers = #tpu.dot_dimension_numbers<[1], [1], [0], [0], [0, 0, 1, 0], [], []>} : vector<17x32xbf16>, vector<17x32xbf16>, vector<17x17xf32> -> vector<17x17xf32>
    %cst_67 = arith.constant dense<0xFF800000> : vector<17xf32>
    %180 = vector.multi_reduction <maximumf>, %179, %cst_67 [1] : vector<17x17xf32> to vector<17xf32>
    %181 = vector.shape_cast %180 : vector<17xf32> to vector<17x1xf32>
    %182 = vector.broadcast %181 : vector<17x1xf32> to vector<17x17xf32>
    %183 = arith.subf %179, %182 : vector<17x17xf32>
    %184 = math.exp %183 : vector<17x17xf32>
    %cst_68 = arith.constant dense<0.000000e+00> : vector<17xf32>
    %185 = vector.multi_reduction <add>, %184, %cst_68 [1] : vector<17x17xf32> to vector<17xf32>
    %186 = vector.shape_cast %185 : vector<17xf32> to vector<17x1xf32>
    %187 = tpu.reciprocal %186 {approx = true} : vector<17x1xf32> -> vector<17x1xf32>
    %188 = vector.broadcast %187 : vector<17x1xf32> to vector<17x17xf32>
    %189 = arith.mulf %184, %188 : vector<17x17xf32>
    %190 = arith.truncf %189 : vector<17x17xf32> to vector<17x17xbf16>
    %191 = arith.truncf %176 : vector<17x32xf32> to vector<17x32xbf16>
    %cst_69 = arith.constant dense<0.000000e+00> : vector<17x32xf32>
    %192 = tpu.matmul %190, %191, %cst_69 {dimension_numbers = #tpu.dot_dimension_numbers<[1], [0], [0], [1], [0, 0, 1, 1], [], []>} : vector<17x17xbf16>, vector<17x32xbf16>, vector<17x32xf32> -> vector<17x32xf32>
    %c17_70 = arith.constant 17 : index
    %c64_71 = arith.constant 64 : index
    %193 = vector.load %arg24[%c17_70, %c64_71] : memref<34x128xf32, #tpu.memory_space<vmem>>, vector<17x32xf32>
    tpu.vector_store %arg24[%c17_70, %c64_71], %192 {strides = array<i32>} : memref<34x128xf32, #tpu.memory_space<vmem>>, vector<17x32xf32>,
    %194 = vector.extract_strided_slice %37 {offsets = [17, 96], sizes = [17, 32], strides = [1, 1]} : vector<34x128xf32> to vector<17x32xf32>
    %195 = vector.extract_strided_slice %45 {offsets = [17, 96], sizes = [17, 32], strides = [1, 1]} : vector<34x128xf32> to vector<17x32xf32>
    %196 = vector.extract_strided_slice %53 {offsets = [17, 96], sizes = [17, 32], strides = [1, 1]} : vector<34x128xf32> to vector<17x32xf32>
    %197 = arith.truncf %194 : vector<17x32xf32> to vector<17x32xbf16>
    %198 = arith.truncf %195 : vector<17x32xf32> to vector<17x32xbf16>
    %cst_72 = arith.constant dense<0.000000e+00> : vector<17x17xf32>
    %199 = tpu.matmul %197, %198, %cst_72 {dimension_numbers = #tpu.dot_dimension_numbers<[1], [1], [0], [0], [0, 0, 1, 0], [], []>} : vector<17x32xbf16>, vector<17x32xbf16>, vector<17x17xf32> -> vector<17x17xf32>
    %cst_73 = arith.constant dense<0xFF800000> : vector<17xf32>
    %200 = vector.multi_reduction <maximumf>, %199, %cst_73 [1] : vector<17x17xf32> to vector<17xf32>
    %201 = vector.shape_cast %200 : vector<17xf32> to vector<17x1xf32>
    %202 = vector.broadcast %201 : vector<17x1xf32> to vector<17x17xf32>
    %203 = arith.subf %199, %202 : vector<17x17xf32>
    %204 = math.exp %203 : vector<17x17xf32>
    %cst_74 = arith.constant dense<0.000000e+00> : vector<17xf32>
    %205 = vector.multi_reduction <add>, %204, %cst_74 [1] : vector<17x17xf32> to vector<17xf32>
    %206 = vector.shape_cast %205 : vector<17xf32> to vector<17x1xf32>
    %207 = tpu.reciprocal %206 {approx = true} : vector<17x1xf32> -> vector<17x1xf32>
    %208 = vector.broadcast %207 : vector<17x1xf32> to vector<17x17xf32>
    %209 = arith.mulf %204, %208 : vector<17x17xf32>
    %210 = arith.truncf %209 : vector<17x17xf32> to vector<17x17xbf16>
    %211 = arith.truncf %196 : vector<17x32xf32> to vector<17x32xbf16>
    %cst_75 = arith.constant dense<0.000000e+00> : vector<17x32xf32>
    %212 = tpu.matmul %210, %211, %cst_75 {dimension_numbers = #tpu.dot_dimension_numbers<[1], [0], [0], [1], [0, 0, 1, 1], [], []>} : vector<17x17xbf16>, vector<17x32xbf16>, vector<17x32xf32> -> vector<17x32xf32>
    %c17_76 = arith.constant 17 : index
    %c96_77 = arith.constant 96 : index
    %213 = vector.load %arg24[%c17_76, %c96_77] : memref<34x128xf32, #tpu.memory_space<vmem>>, vector<17x32xf32>
    tpu.vector_store %arg24[%c17_76, %c96_77], %212 {strides = array<i32>} : memref<34x128xf32, #tpu.memory_space<vmem>>, vector<17x32xf32>,
    %c0_78 = arith.constant 0 : index
    %c0_79 = arith.constant 0 : index
    %214 = vector.load %arg24[%c0_78, %c0_79] : memref<34x128xf32, #tpu.memory_space<vmem>>, vector<34x128xf32>
    %215 = arith.truncf %214 : vector<34x128xf32> to vector<34x128xbf16>
    %c0_80 = arith.constant 0 : index
    %c0_81 = arith.constant 0 : index
    %c0_82 = arith.constant 0 : index
    %216 = vector.load %arg10[%c0_80, %c0_81, %c0_82] : memref<1x128x128xbf16, #tpu.memory_space<vmem>>, vector<1x128x128xbf16>
    %217 = vector.shape_cast %216 : vector<1x128x128xbf16> to vector<128x128xbf16>
    %cst_83 = arith.constant dense<0.000000e+00> : vector<34x128xf32>
    %218 = tpu.matmul %215, %217, %cst_83 {dimension_numbers = #tpu.dot_dimension_numbers<[1], [0], [0], [1], [0, 0, 1, 1], [], []>} : vector<34x128xbf16>, vector<128x128xbf16>, vector<34x128xf32> -> vector<34x128xf32>
    %c0_84 = arith.constant 0 : index
    %c0_85 = arith.constant 0 : index
    %c0_86 = arith.constant 0 : index
    %219 = vector.load %arg11[%c0_84, %c0_85, %c0_86] : memref<1x1x128xf32, #tpu.memory_space<vmem>>, vector<1x1x128xf32>
    %220 = vector.shape_cast %219 : vector<1x1x128xf32> to vector<1x128xf32>
    %221 = vector.broadcast %220 : vector<1x128xf32> to vector<34x128xf32>
    %222 = arith.addf %218, %221 : vector<34x128xf32>
    %223 = arith.addf %3, %222 : vector<34x128xf32>
    %c0_87 = arith.constant 0 : index
    %c0_88 = arith.constant 0 : index
    %c0_89 = arith.constant 0 : index
    %224 = vector.load %arg18[%c0_87, %c0_88, %c0_89] : memref<1x1x128xf32, #tpu.memory_space<vmem>>, vector<1x1x128xf32>
    %225 = vector.shape_cast %224 : vector<1x1x128xf32> to vector<1x128xf32>
    %c0_90 = arith.constant 0 : index
    %c0_91 = arith.constant 0 : index
    %c0_92 = arith.constant 0 : index
    %226 = vector.load %arg19[%c0_90, %c0_91, %c0_92] : memref<1x1x128xf32, #tpu.memory_space<vmem>>, vector<1x1x128xf32>
    %227 = vector.shape_cast %226 : vector<1x1x128xf32> to vector<1x128xf32>
    %cst_93 = arith.constant dense<0.000000e+00> : vector<34xf32>
    %228 = vector.multi_reduction <add>, %223, %cst_93 [1] : vector<34x128xf32> to vector<34xf32>
    %229 = vector.shape_cast %228 : vector<34xf32> to vector<34x1xf32>
    %cst_94 = arith.constant 1.280000e+02 : f32
    %230 = vector.broadcast %cst_94 : f32 to vector<34x1xf32>
    %231 = arith.divf %229, %230 : vector<34x1xf32>
    %232 = vector.broadcast %231 : vector<34x1xf32> to vector<34x128xf32>
    %233 = arith.subf %223, %232 : vector<34x128xf32>
    %234 = arith.mulf %233, %233 : vector<34x128xf32>
    %cst_95 = arith.constant dense<0.000000e+00> : vector<34xf32>
    %235 = vector.multi_reduction <add>, %234, %cst_95 [1] : vector<34x128xf32> to vector<34xf32>
    %236 = vector.shape_cast %235 : vector<34xf32> to vector<34x1xf32>
    %cst_96 = arith.constant 1.280000e+02 : f32
    %237 = vector.broadcast %cst_96 : f32 to vector<34x1xf32>
    %238 = arith.divf %236, %237 : vector<34x1xf32>
    %cst_97 = arith.constant 9.99999974E-6 : f32
    %239 = vector.broadcast %cst_97 : f32 to vector<34x1xf32>
    %240 = arith.addf %238, %239 : vector<34x1xf32>
    %241 = math.rsqrt %240 : vector<34x1xf32>
    %242 = vector.broadcast %241 : vector<34x1xf32> to vector<34x128xf32>
    %243 = arith.mulf %233, %242 : vector<34x128xf32>
    %244 = vector.broadcast %225 : vector<1x128xf32> to vector<34x128xf32>
    %245 = arith.mulf %243, %244 : vector<34x128xf32>
    %246 = vector.broadcast %227 : vector<1x128xf32> to vector<34x128xf32>
    %247 = arith.addf %245, %246 : vector<34x128xf32>
    %248 = arith.truncf %247 : vector<34x128xf32> to vector<34x128xbf16>
    %c0_98 = arith.constant 0 : index
    %c0_99 = arith.constant 0 : index
    %c0_100 = arith.constant 0 : index
    %249 = vector.load %arg14[%c0_98, %c0_99, %c0_100] : memref<1x128x512xbf16, #tpu.memory_space<vmem>>, vector<1x128x512xbf16>
    %250 = vector.shape_cast %249 : vector<1x128x512xbf16> to vector<128x512xbf16>
    %cst_101 = arith.constant dense<0.000000e+00> : vector<34x512xf32>
    %251 = tpu.matmul %248, %250, %cst_101 {dimension_numbers = #tpu.dot_dimension_numbers<[1], [0], [0], [1], [0, 0, 1, 1], [], []>} : vector<34x128xbf16>, vector<128x512xbf16>, vector<34x512xf32> -> vector<34x512xf32>
    %c0_102 = arith.constant 0 : index
    %c0_103 = arith.constant 0 : index
    %c0_104 = arith.constant 0 : index
    %252 = vector.load %arg15[%c0_102, %c0_103, %c0_104] : memref<1x1x512xf32, #tpu.memory_space<vmem>>, vector<1x1x512xf32>
    %253 = vector.shape_cast %252 : vector<1x1x512xf32> to vector<1x512xf32>
    %254 = vector.broadcast %253 : vector<1x512xf32> to vector<34x512xf32>
    %255 = arith.addf %251, %254 : vector<34x512xf32>
    %cst_105 = arith.constant 1.702000e+00 : f32
    %256 = vector.broadcast %cst_105 : f32 to vector<34x512xf32>
    %257 = arith.mulf %256, %255 : vector<34x512xf32>
    %258 = arith.negf %257 : vector<34x512xf32>
    %259 = math.exp %258 : vector<34x512xf32>
    %cst_106 = arith.constant 1.000000e+00 : f32
    %260 = vector.broadcast %cst_106 : f32 to vector<34x512xf32>
    %261 = arith.addf %260, %259 : vector<34x512xf32>
    %262 = arith.divf %260, %261 : vector<34x512xf32>
    %263 = arith.mulf %255, %262 : vector<34x512xf32>
    %264 = arith.truncf %263 : vector<34x512xf32> to vector<34x512xbf16>
    %c0_107 = arith.constant 0 : index
    %c0_108 = arith.constant 0 : index
    %c0_109 = arith.constant 0 : index
    %265 = vector.load %arg16[%c0_107, %c0_108, %c0_109] : memref<1x512x128xbf16, #tpu.memory_space<vmem>>, vector<1x512x128xbf16>
    %266 = vector.shape_cast %265 : vector<1x512x128xbf16> to vector<512x128xbf16>
    %cst_110 = arith.constant dense<0.000000e+00> : vector<34x128xf32>
    %267 = tpu.matmul %264, %266, %cst_110 {dimension_numbers = #tpu.dot_dimension_numbers<[1], [0], [0], [1], [0, 0, 1, 1], [], []>} : vector<34x512xbf16>, vector<512x128xbf16>, vector<34x128xf32> -> vector<34x128xf32>
    %c0_111 = arith.constant 0 : index
    %c0_112 = arith.constant 0 : index
    %c0_113 = arith.constant 0 : index
    %268 = vector.load %arg17[%c0_111, %c0_112, %c0_113] : memref<1x1x128xf32, #tpu.memory_space<vmem>>, vector<1x1x128xf32>
    %269 = vector.shape_cast %268 : vector<1x1x128xf32> to vector<1x128xf32>
    %270 = vector.broadcast %269 : vector<1x128xf32> to vector<34x128xf32>
    %271 = arith.addf %267, %270 : vector<34x128xf32>
    %272 = arith.addf %223, %271 : vector<34x128xf32>
    %c0_114 = arith.constant 0 : index
    %c0_115 = arith.constant 0 : index
    %273 = vector.load %arg23[%c0_114, %c0_115] : memref<34x128xf32, #tpu.memory_space<vmem>>, vector<34x128xf32>
    tpu.vector_store %arg23[%c0_114, %c0_115], %272 {strides = array<i32>} : memref<34x128xf32, #tpu.memory_space<vmem>>, vector<34x128xf32>,
    %c5_i32 = arith.constant 5 : i32
    %274 = arith.cmpi eq, %arg0, %c5_i32 : i32
    %275 = arith.extui %274 : i1 to i32
    %c0_i32_116 = arith.constant 0 : i32
    %276 = arith.cmpi ne, %275, %c0_i32_116 : i32
    scf.if %276 {
      %277 = arith.truncf %272 : vector<34x128xf32> to vector<34x128xbf16>
      %c0_117 = arith.constant 0 : index
      %c0_118 = arith.constant 0 : index
      %278 = vector.load %arg20[%c0_117, %c0_118] : memref<128x512xbf16, #tpu.memory_space<vmem>>, vector<128x512xbf16>
      %cst_119 = arith.constant dense<0.000000e+00> : vector<34x512xf32>
      %279 = tpu.matmul %277, %278, %cst_119 {dimension_numbers = #tpu.dot_dimension_numbers<[1], [0], [0], [1], [0, 0, 1, 1], [], []>} : vector<34x128xbf16>, vector<128x512xbf16>, vector<34x512xf32> -> vector<34x512xf32>
      %c0_120 = arith.constant 0 : index
      %c0_121 = arith.constant 0 : index
      %280 = vector.load %arg21[%c0_120, %c0_121] : memref<1x512xf32, #tpu.memory_space<vmem>>, vector<1x512xf32>
      %281 = vector.broadcast %280 : vector<1x512xf32> to vector<34x512xf32>
      %282 = arith.addf %279, %281 : vector<34x512xf32>
      %c0_122 = arith.constant 0 : index
      %c0_123 = arith.constant 0 : index
      %283 = vector.load %arg22[%c0_122, %c0_123] : memref<34x512xf32, #tpu.memory_space<vmem>>, vector<34x512xf32>
      tpu.vector_store %arg22[%c0_122, %c0_123], %282 {strides = array<i32>} : memref<34x512xf32, #tpu.memory_space<vmem>>, vector<34x512xf32>,
    } else {
    }
    return
  }
  func.func @transform_0(%arg0: i32) -> (i32, i32) {
    %c0_i32 = arith.constant 0 : i32
    %c0_i32_0 = arith.constant 0 : i32
    %c0_i32_1 = arith.constant 0 : i32
    return %c0_i32, %c0_i32_0 : i32, i32
  }
  func.func @transform_1(%arg0: i32) -> (i32, i32) {
    %c0_i32 = arith.constant 0 : i32
    %c0_i32_0 = arith.constant 0 : i32
    %c0_i32_1 = arith.constant 0 : i32
    return %c0_i32, %c0_i32_0 : i32, i32
  }
  func.func @transform_2(%arg0: i32) -> (i32, i32) {
    %c0_i32 = arith.constant 0 : i32
    %c0_i32_0 = arith.constant 0 : i32
    %c0_i32_1 = arith.constant 0 : i32
    return %c0_i32, %c0_i32_0 : i32, i32
  }
  func.func @transform_3(%arg0: i32) -> (i32, i32, i32) {
    %c0_i32 = arith.constant 0 : i32
    %c0_i32_0 = arith.constant 0 : i32
    %c0_i32_1 = arith.constant 0 : i32
    return %arg0, %c0_i32, %c0_i32_0 : i32, i32, i32
  }
  func.func @transform_4(%arg0: i32) -> (i32, i32, i32) {
    %c0_i32 = arith.constant 0 : i32
    %c0_i32_0 = arith.constant 0 : i32
    %c0_i32_1 = arith.constant 0 : i32
    return %arg0, %c0_i32, %c0_i32_0 : i32, i32, i32
  }
  func.func @transform_5(%arg0: i32) -> (i32, i32, i32) {
    %c0_i32 = arith.constant 0 : i32
    %c0_i32_0 = arith.constant 0 : i32
    %c0_i32_1 = arith.constant 0 : i32
    return %arg0, %c0_i32, %c0_i32_0 : i32, i32, i32
  }
  func.func @transform_6(%arg0: i32) -> (i32, i32, i32) {
    %c0_i32 = arith.constant 0 : i32
    %c0_i32_0 = arith.constant 0 : i32
    %c0_i32_1 = arith.constant 0 : i32
    return %arg0, %c0_i32, %c0_i32_0 : i32, i32, i32
  }
  func.func @transform_7(%arg0: i32) -> (i32, i32, i32) {
    %c0_i32 = arith.constant 0 : i32
    %c0_i32_0 = arith.constant 0 : i32
    %c0_i32_1 = arith.constant 0 : i32
    return %arg0, %c0_i32, %c0_i32_0 : i32, i32, i32
  }
  func.func @transform_8(%arg0: i32) -> (i32, i32, i32) {
    %c0_i32 = arith.constant 0 : i32
    %c0_i32_0 = arith.constant 0 : i32
    %c0_i32_1 = arith.constant 0 : i32
    return %arg0, %c0_i32, %c0_i32_0 : i32, i32, i32
  }
  func.func @transform_9(%arg0: i32) -> (i32, i32, i32) {
    %c0_i32 = arith.constant 0 : i32
    %c0_i32_0 = arith.constant 0 : i32
    %c0_i32_1 = arith.constant 0 : i32
    return %arg0, %c0_i32, %c0_i32_0 : i32, i32, i32
  }
  func.func @transform_10(%arg0: i32) -> (i32, i32, i32) {
    %c0_i32 = arith.constant 0 : i32
    %c0_i32_0 = arith.constant 0 : i32
    %c0_i32_1 = arith.constant 0 : i32
    return %arg0, %c0_i32, %c0_i32_0 : i32, i32, i32
  }
  func.func @transform_11(%arg0: i32) -> (i32, i32, i32) {
    %c0_i32 = arith.constant 0 : i32
    %c0_i32_0 = arith.constant 0 : i32
    %c0_i32_1 = arith.constant 0 : i32
    return %arg0, %c0_i32, %c0_i32_0 : i32, i32, i32
  }
  func.func @transform_12(%arg0: i32) -> (i32, i32, i32) {
    %c0_i32 = arith.constant 0 : i32
    %c0_i32_0 = arith.constant 0 : i32
    %c0_i32_1 = arith.constant 0 : i32
    return %arg0, %c0_i32, %c0_i32_0 : i32, i32, i32
  }
  func.func @transform_13(%arg0: i32) -> (i32, i32, i32) {
    %c0_i32 = arith.constant 0 : i32
    %c0_i32_0 = arith.constant 0 : i32
    %c0_i32_1 = arith.constant 0 : i32
    return %arg0, %c0_i32, %c0_i32_0 : i32, i32, i32
  }
  func.func @transform_14(%arg0: i32) -> (i32, i32, i32) {
    %c0_i32 = arith.constant 0 : i32
    %c0_i32_0 = arith.constant 0 : i32
    %c0_i32_1 = arith.constant 0 : i32
    return %arg0, %c0_i32, %c0_i32_0 : i32, i32, i32
  }
  func.func @transform_15(%arg0: i32) -> (i32, i32, i32) {
    %c0_i32 = arith.constant 0 : i32
    %c0_i32_0 = arith.constant 0 : i32
    %c0_i32_1 = arith.constant 0 : i32
    return %arg0, %c0_i32, %c0_i32_0 : i32, i32, i32
  }
  func.func @transform_16(%arg0: i32) -> (i32, i32, i32) {
    %c0_i32 = arith.constant 0 : i32
    %c0_i32_0 = arith.constant 0 : i32
    %c0_i32_1 = arith.constant 0 : i32
    return %arg0, %c0_i32, %c0_i32_0 : i32, i32, i32
  }
  func.func @transform_17(%arg0: i32) -> (i32, i32, i32) {
    %c0_i32 = arith.constant 0 : i32
    %c0_i32_0 = arith.constant 0 : i32
    %c0_i32_1 = arith.constant 0 : i32
    return %arg0, %c0_i32, %c0_i32_0 : i32, i32, i32
  }
  func.func @transform_18(%arg0: i32) -> (i32, i32, i32) {
    %c0_i32 = arith.constant 0 : i32
    %c0_i32_0 = arith.constant 0 : i32
    %c0_i32_1 = arith.constant 0 : i32
    return %arg0, %c0_i32, %c0_i32_0 : i32, i32, i32
  }
  func.func @transform_19(%arg0: i32) -> (i32, i32) {
    %c0_i32 = arith.constant 0 : i32
    %c0_i32_0 = arith.constant 0 : i32
    %c0_i32_1 = arith.constant 0 : i32
    return %c0_i32, %c0_i32_0 : i32, i32
  }
  func.func @transform_20(%arg0: i32) -> (i32, i32) {
    %c0_i32 = arith.constant 0 : i32
    %c0_i32_0 = arith.constant 0 : i32
    %c0_i32_1 = arith.constant 0 : i32
    return %c0_i32, %c0_i32_0 : i32, i32
  }
  func.func @transform_21(%arg0: i32) -> (i32, i32) {
    %c0_i32 = arith.constant 0 : i32
    %c0_i32_0 = arith.constant 0 : i32
    %c0_i32_1 = arith.constant 0 : i32
    return %c0_i32, %c0_i32_0 : i32, i32
  }
}

</mosaic_0001>

<bundles_post_ra>
// kernel: clip_image_encoder_forward.1
= control target key start
LH: loop header
LB: loop body
LE: loop exit
PB: predicated region body
PF: predicated region fallthrough
CT: control target
= control target key end

     0   :  { %s8062_s0 = inlined_call_operand.vmem [shape: f32[34,128], index: 0, kind: input, shape index: {}]   ;;  %s8063_s1 = inlined_call_operand.hbm [shape: f32[1,128], index: 1, kind: input, shape index: {}]   ;;  %s8064_s2 = inlined_call_operand.vmem [shape: f32[1,128], index: 2, kind: input, shape index: {}]   ;;  %s8065_s3 = inlined_call_operand.vmem [shape: bf16[6,128,128], index: 3, kind: input, shape index: {}]   ;;  %s8066_s4 = inlined_call_operand.vmem [shape: f32[6,1,128], index: 4, kind: input, shape index: {}]   ;;  %s8067_s5 = inlined_call_operand.vmem [shape: bf16[6,128,128], index: 5, kind: input, shape index: {}]   ;;  %s8068_s6 = inlined_call_operand.hbm [shape: f32[6,1,128], index: 6, kind: input, shape index: {}]   ;;  %s8069_s7 = inlined_call_operand.vmem [shape: bf16[6,128,128], index: 7, kind: input, shape index: {}]   ;;  %s8070_s8 = inlined_call_operand.hbm [shape: f32[6,1,128], index: 8, kind: input, shape index: {}]   ;;  %s8071_s9 = inlined_call_operand.hbm [shape: bf16[6,128,128], index: 9, kind: input, shape index: {}]   ;;  %s8072_s10 = inlined_call_operand.hbm [shape: f32[6,1,128], index: 10, kind: input, shape index: {}]   ;;  %s8073_s11 = inlined_call_operand.hbm [shape: f32[6,1,128], index: 11, kind: input, shape index: {}]   ;;  %s8074_s12 = inlined_call_operand.hbm [shape: f32[6,1,128], index: 12, kind: input, shape index: {}]   ;;  %s8075_s13 = inlined_call_operand.hbm [shape: bf16[6,128,512], index: 13, kind: input, shape index: {}]   ;;  %s8076_s14 = inlined_call_operand.vmem [shape: f32[6,1,512], index: 14, kind: input, shape index: {}]   ;;  %s8077_s15 = inlined_call_operand.hbm [shape: bf16[6,512,128], index: 15, kind: input, shape index: {}]   ;;  %s8078_s16 = inlined_call_operand.hbm [shape: f32[6,1,128], index: 16, kind: input, shape index: {}]   ;;  %s8079_s17 = inlined_call_operand.hbm [shape: f32[6,1,128], index: 17, kind: input, shape index: {}]   ;;  %s8080_s18 = inlined_call_operand.hbm [shape: f32[6,1,128], index: 18, kind: input, shape index: {}]   ;;  %s8081_s19 = inlined_call_operand.hbm [shape: bf16[128,512], index: 19, kind: input, shape index: {}]   ;;  %s8082_s20 = inlined_call_operand.hbm [shape: f32[1,512], index: 20, kind: input, shape index: {}]   ;;  %s8083_s21 = inlined_call_operand.vmem [shape: f32[34,512], index: 21, kind: output, shape index: {}]  }
   0x1   :  { %8110 = sst [smem:[#allocation42_spill]] %s8062_s0 }
   0x2   :  { %8111 = sst [smem:[#allocation43_spill]] %s8063_s1 }
   0x3   :  { %8112 = sst [smem:[#allocation44_spill]] %s8064_s2 }
   0x4   :  { %8113 = sst [smem:[#allocation45_spill]] %s8065_s3 }
   0x5   :  { %8114 = sst [smem:[#allocation46_spill]] %s8066_s4 }
   0x6   :  { %8115 = sst [smem:[#allocation47_spill]] %s8067_s5 }
   0x7   :  { %8116 = sst [smem:[#allocation48_spill]] %s8068_s6 }
   0x8   :  { %8117 = sst [smem:[#allocation49_spill]] %s8069_s7 }
   0x9   :  { %8118 = sst [smem:[#allocation50_spill]] %s8070_s8 }
   0xa   :  { %8119 = sst [smem:[#allocation51_spill]] %s8071_s9 }
   0xb   :  { %8120 = sst [smem:[#allocation52_spill]] %s8072_s10 }
   0xc   :  { %8121 = sst [smem:[#allocation53_spill]] %s8073_s11 }
   0xd   :  { %8122 = sst [smem:[#allocation54_spill]] %s8074_s12 }
   0xe   :  { %8123 = sst [smem:[#allocation55_spill]] %s8075_s13 }
   0xf   :  { %8124 = sst [smem:[#allocation56_spill]] %s8076_s14 }
  0x10   :  { %8125 = sst [smem:[#allocation57_spill]] %s8081_s19 }
  0x11   :  { %8126 = sst [smem:[#allocation58_spill]] %s8083_s21 }
  0x12   :  { %26 = vsyncpa [#allocation5], 0 }
  0x13   :  { %27 = vsyncpa [#allocation7], 0 }
  0x14   :  { %29 = vsyncpa [#allocation7 + $0x1], 0 }
  0x15   :  { %30 = vsyncpa [#allocation10], 0 }
  0x16   :  { %32 = vsyncpa [#allocation10 + $0x1], 0 }
  0x17   :  { %33 = vsyncpa [#allocation13], 0 }
  0x18   :  { %35 = vsyncpa [#allocation13 + $0x1], 0 }
  0x19   :  { %36 = vsyncpa [#allocation16], 0 }
  0x1a   :  { %38 = vsyncpa [#allocation16 + $0x1], 0 }
  0x1b   :  { %39 = vsyncpa [#allocation19], 0 }
  0x1c   :  { %41 = vsyncpa [#allocation19 + $0x1], 0 }
  0x1d   :  { %42 = vsyncpa [#allocation22], 0 }
  0x1e   :  { %44 = vsyncpa [#allocation22 + $0x1], 0 }
  0x1f   :  { %45 = vsyncpa [#allocation25], 0  ;;  %s6729_s2 = smov 0   ;;  %s6731_s25 = smov 0  }
  0x20   :  { %s6733_s26 = smov 0   ;;  %s6735_s27 = smov 0  }
  0x21 LB: > { %8127 = sst [smem:[#allocation35_spill]] %s6584_s25  ;;  %s6748_s3 = sadd.s32 4294967295, %s6592_s27   ;;  %s6592_s27 = sphi %s6735_s27, %s8193_s27   ;;  %s6588_s26 = sphi %s6733_s26, %s8196_s26   ;;  %s6584_s25 = sphi %s6731_s25, %s8195_s25   ;;  %s6580_s2 = sphi %s6729_s2, %s8194_s2  }
  0x22   : > { %8128 = sst [smem:[#allocation36_spill]] %s6588_s26  ;;  %s6751_s28 = sadd.s32 1, %s6592_s27  }
  0x23   : > { %8129 = sst [smem:[#allocation37_spill]] %s6748_s3  ;;  %s196_s29 = ssub.s32 %s6592_s27, %s6751_s28 }
  0x24   : > { %8130 = sst [smem:[#allocation38_spill]] %s6751_s28  ;;  %s199_s0 = sadd.s32 1, %s6588_s26 }
  0x25   : > { %p197_p0 = scmp.eq.s32.totalorder %s196_s29, 0  ;;  %p206_p1 = scmp.ne.s32.totalorder %s6588_s26, %s6584_s25 }
  0x26   : > { %p207_p2 = scmp.eq.s32.totalorder %s6592_s27, 0  ;;  %p212_p3 = scmp.ne.s32.totalorder %s6584_s25, %s6580_s2 }
  0x27   : > { %s6761_s4 = scalar_select %p197_p0, %s6588_s26, %s199_s0  }
  0x28   : > { %p6763_p4 = por %p207_p2, %p206_p1  ;;  %p8085_p5 = scmp.eq.s32.totalorder %s6748_s3, 0 }
  0x29   : > { %8131 = sst [smem:[#allocation39_spill]] %s6761_s4  ;;  %p4969_p6 = scmp.ge.s32.totalorder %s6592_s27, 1 }
  0x2a   : > { %p598_p7 = scmp.lt.s32.totalorder %s6592_s27, 7  ;;  %p6772_p8 = por %p8085_p5, %p212_p3 }
  0x2b   : > { %s6594_s23 = smov [#allocation23]   ;;  %p5719_p13 = scmp.lt.s32.totalorder %s6592_s27, 6 }
  0x2c   : > { %s8133_s5 = scalar_select %p6772_p8, 1, 0 }
  0x2d   : > { %p6777_p10 = pnand %p4969_p6, %p598_p7  ;;  %s627_s1 = sshll.u32 %s6594_s23, 4  ;;  %s628_s1 = int_to_ptr.vmem [resolvable:$true] %s627_s1 }
  0x2e   : > { %8134 = sst [smem:[#allocation40_spill]] %s8133_s5  ;;  %s6791_s2 = sand.u32 1, %s6588_s26  }
  0x2f   : > { %s8135_s22 = scalar_select %p6777_p10, 1, 0 }
  0x30   : > { %p5672_p11 = pneg %p6777_p10  ;;  %s6794_s29 = sand.u32 1, %s6592_s27  }
  0x31   : > { %8136 = sst [smem:[#allocation41_spill]] %s8135_s22  ;;  %p6798_p0 = pnand %p5719_p13, %p6763_p4 }
  0x32   : > { %p6785_p12 = pnand %p5672_p11, %p8085_p5  ;;  %s6151_s23 = scalar_lea.vmem %s628_s1, 4096 }
  0x33   : > { %s8138_s0 = scalar_select %p6798_p0, 1, 0 }
  0x34   : > { %s8137_s24 = scalar_select %p6785_p12, 1, 0 }
  0x35   : > { %p8097_p1 = pneg %p6785_p12  ;;  %p6152_p2 = scmp.ne.s32.totalorder %s628_s1, %s6151_s23 }
  0x36   : > { %p6159_p7 = scmp.lt.s32.totalorder %s628_s1, %s628_s1  ;;  %p6160_p11 = scmp.lt.s32.totalorder %s6151_s23, %s6151_s23 }
  0x37   : > { %p6154_p3 = pnand %p6152_p2, %p8097_p1 }
  0x38   : > { %p6161_p9 = por %p6160_p11, %p6159_p7 }
  0x39   : > { %p6155_p6 = pneg %p6154_p3 }
  0x3b   : > { %p6162_p5 = pnand %p6161_p9, %p6155_p6 }
  0x3d   : > { %6165 = shalt.err (!%p6162_p5)
}
  0x3e   : > { %s8096_s4 = smov 256   ;;  %s8099_s30 = smov 16  }
  0x3f   : > { %s8139_s19 = sld [smem:[#allocation57_spill]]  ;;  %s6816_s21 = sshll.u32 %s6592_s27, 4 }
  0x40   : > { %s8140_s6 = sld [smem:[#allocation48_spill]]  ;;  %s677_s5 = scalar_lea.vmem [#allocation6], %s6791_s2 }
  0x41   : > { %s684_s25 = sshll.u32 %s677_s5, 4  ;;  %p6830_p5 = pneg %p6798_p0  ;;  %s685_s25 = int_to_ptr.vmem [resolvable:$true] %s684_s25 }
  0x45   : > { %5678 = dma.hbm_to_vmem [thread:$0]  (!%p6785_p12), %s8139_s19, 4096, %s628_s1, [#allocation22], %s8096_s4, %s8096_s4, %s8099_s30  }
  0x46   : > { %s6822_s7 = scalar_lea.hbm %s8140_s6, %s6816_s21  ;;  %s6171_s1 = scalar_lea.hbm %s8140_s6, 96 }
  0x47   : > { %s6166_s22 = scalar_lea.hbm %s6822_s7, 16  ;;  %p6172_p2 = scmp.lt.s32.totalorder %s6822_s7, %s8140_s6 }
  0x48   : > { %p6167_p4 = scmp.ne.s32.totalorder %s6822_s7, %s6166_s22  ;;  %p6173_p3 = scmp.lt.s32.totalorder %s6171_s1, %s6166_s22 }
  0x4a   : > { %p6169_p9 = pnand %p6830_p5, %p6167_p4  ;;  %p6174_p6 = por %p6173_p3, %p6172_p2 }
  0x4c   : > { %p6170_p13 = pneg %p6169_p9 }
  0x4e   : > { %p6175_p7 = pnand %p6174_p6, %p6170_p13 }
  0x50   : > { %6178 = shalt.err (!%p6175_p7)
}
  0x51   : > { %s6179_s5 = scalar_lea.vmem %s685_s25, 16  ;;  %s6597_s30 = smov [#allocation6]  }
  0x52   : > { %p6180_p11 = scmp.ne.s32.totalorder %s685_s25, %s6179_s5  ;;  %s6184_s3 = sshll.u32 %s6597_s30, 4  ;;  %s6185_s3 = int_to_ptr.vmem [resolvable:$false] %s6184_s3 }
  0x53   : > { %s6186_s19 = scalar_lea.vmem %s6185_s3, 32  ;;  %p6187_p4 = scmp.lt.s32.totalorder %s685_s25, %s6185_s3 }
  0x54   : > { %p6182_p1 = pnand %p6180_p11, %p6830_p5  ;;  %p6188_p9 = scmp.lt.s32.totalorder %s6186_s19, %s6179_s5 }
  0x56   : > { %p6183_p8 = pneg %p6182_p1  ;;  %p6189_p10 = por %p6188_p9, %p6187_p4 }
  0x58   : > { %p6190_p12 = pnand %p6189_p10, %p6183_p8 }
  0x5a   : > { %6193 = shalt.err (!%p6190_p12)
}
  0x5b   : > { %s8142_s4 = scalar_lea.sflag [#allocation7], %s6794_s29  ;;  %s4976_s22 = sshll.u32 %s6791_s2, 6 }
  0x5c   : > { %5685 = dma.hbm_to_vmem [thread:$0]  (!%p6798_p0), %s6822_s7, 16, %s685_s25, %s8142_s4  }
  0x5d   : > { %s5200_s14 = sshll.u32 %s6592_s27, 10  ;;  %s8143_s9 = sld [smem:[#allocation51_spill]] }
  0x5e   : > { %s720_s19 = scalar_lea.vmem [#allocation9], %s4976_s22  ;;  %s8106_s23 = scalar_lea.sflag [#allocation10], %s6794_s29 }
  0x5f   : > { %s727_s1 = sshll.u32 %s720_s19, 4  ;;  %s6857_s1 = int_to_ptr.vmem [resolvable:$true] %s727_s1 }
  0x63   : > { %s6855_s3 = scalar_lea.hbm %s8143_s9, %s5200_s14  ;;  %s6199_s4 = scalar_lea.hbm %s8143_s9, 6144 }
  0x64   : > { %s6194_s5 = scalar_lea.hbm %s6855_s3, 1024  ;;  %p6200_p1 = scmp.lt.s32.totalorder %s6855_s3, %s8143_s9 }
  0x65   : > { %p6195_p8 = scmp.ne.s32.totalorder %s6855_s3, %s6194_s5  ;;  %p6201_p13 = scmp.lt.s32.totalorder %s6199_s4, %s6194_s5 }
  0x67   : > { %p6197_p10 = pnand %p6195_p8, %p6830_p5  ;;  %p6202_p2 = por %p6201_p13, %p6200_p1 }
  0x69   : > { %p6198_p12 = pneg %p6197_p10 }
  0x6b   : > { %p6203_p3 = pnand %p6202_p2, %p6198_p12 }
  0x6d   : > { %6206 = shalt.err (!%p6203_p3)
}
  0x6e   : > { %s6207_s22 = scalar_lea.vmem %s6857_s1, 1024  ;;  %s6598_s28 = smov [#allocation9]  }
  0x6f   : > { %p6208_p6 = scmp.ne.s32.totalorder %s6857_s1, %s6207_s22  ;;  %s6212_s19 = sshll.u32 %s6598_s28, 4  ;;  %s6213_s19 = int_to_ptr.vmem [resolvable:$false] %s6212_s19 }
  0x70   : > { %s6214_s7 = scalar_lea.vmem %s6213_s19, 2048  ;;  %p6215_p4 = scmp.lt.s32.totalorder %s6857_s1, %s6213_s19 }
  0x71   : > { %p6210_p7 = pnand %p6208_p6, %p6830_p5  ;;  %p6216_p9 = scmp.lt.s32.totalorder %s6214_s7, %s6207_s22 }
  0x73   : > { %p6211_p11 = pneg %p6210_p7  ;;  %p6217_p8 = por %p6216_p9, %p6215_p4 }
  0x75   : > { %p6218_p10 = pnand %p6217_p8, %p6211_p11 }
  0x77   : > { %6221 = shalt.err (!%p6218_p10)
}
  0x78   : > { %s8103_s5 = smov 64   ;;  %s8104_s25 = smov 4  }
  0x79   : > { %5691 = dma.hbm_to_vmem [thread:$0]  (!%p6798_p0), %s6855_s3, 1024, %s6857_s1, %s8106_s23, %s8103_s5, %s8103_s5, %s8104_s25  }
  0x7a   : > { %s8144_s11 = sld [smem:[#allocation53_spill]]  ;;  %s757_s22 = scalar_lea.vmem [#allocation12], %s6791_s2 }
  0x7b   : > { %s764_s28 = sshll.u32 %s757_s22, 4  ;;  %s8105_s19 = scalar_lea.sflag [#allocation13], %s6794_s29  ;;  %s765_s28 = int_to_ptr.vmem [resolvable:$true] %s764_s28 }
  0x80   : > { %s6889_s14 = scalar_lea.hbm %s8144_s11, %s6816_s21  ;;  %s6227_s3 = scalar_lea.hbm %s8144_s11, 96 }
  0x81   : > { %s6222_s7 = scalar_lea.hbm %s6889_s14, 16  ;;  %p6228_p2 = scmp.lt.s32.totalorder %s6889_s14, %s8144_s11 }
  0x82   : > { %p6223_p12 = scmp.ne.s32.totalorder %s6889_s14, %s6222_s7  ;;  %p6229_p3 = scmp.lt.s32.totalorder %s6227_s3, %s6222_s7 }
  0x84   : > { %p6225_p1 = pnand %p6223_p12, %p6830_p5  ;;  %p6230_p6 = por %p6229_p3, %p6228_p2 }
  0x86   : > { %p6226_p13 = pneg %p6225_p1 }
  0x88   : > { %p6231_p7 = pnand %p6230_p6, %p6226_p13 }
  0x8a   : > { %6234 = shalt.err (!%p6231_p7)
}
  0x8b   : > { %s6235_s30 = scalar_lea.vmem %s765_s28, 16  ;;  %s6601_s22 = smov [#allocation12]  }
  0x8c   : > { %p6236_p11 = scmp.ne.s32.totalorder %s765_s28, %s6235_s30  ;;  %s6240_s5 = sshll.u32 %s6601_s22, 4  ;;  %s6241_s5 = int_to_ptr.vmem [resolvable:$false] %s6240_s5 }
  0x8d   : > { %s6242_s25 = scalar_lea.vmem %s6241_s5, 32  ;;  %p6243_p8 = scmp.lt.s32.totalorder %s765_s28, %s6241_s5 }
  0x8e   : > { %p6238_p4 = pnand %p6236_p11, %p6830_p5  ;;  %p6244_p10 = scmp.lt.s32.totalorder %s6242_s25, %s6235_s30 }
  0x90   : > { %p6239_p9 = pneg %p6238_p4  ;;  %p6245_p12 = por %p6244_p10, %p6243_p8 }
  0x92   : > { %p6246_p1 = pnand %p6245_p12, %p6239_p9 }
  0x94   : > { %6249 = shalt.err (!%p6246_p1)
}
  0x95   : > { %5697 = dma.hbm_to_vmem [thread:$0]  (!%p6798_p0), %s6889_s14, 16, %s765_s28, %s8105_s19  }
  0x96   : > { %s4982_s6 = sshll.u32 %s6791_s2, 8  ;;  %s5201_s9 = sshll.u32 %s6592_s27, 12 }
  0x97   : > { %s8145_s13 = sld [smem:[#allocation55_spill]]  ;;  %s792_s25 = scalar_lea.vmem [#allocation15], %s4982_s6 }
  0x98   : > { %s799_s1 = sshll.u32 %s792_s25, 4  ;;  %s6925_s22 = scalar_lea.hbm %s8077_s15, %s5201_s9  ;;  %s6920_s1 = int_to_ptr.vmem [resolvable:$true] %s799_s1 }
  0x99   : > { %s789_s14 = scalar_lea.sflag [#allocation16], %s6794_s29 }
  0x9d   : > { %s6916_s5 = scalar_lea.hbm %s8145_s13, %s5201_s9  ;;  %s6255_s3 = scalar_lea.hbm %s8145_s13, 24576 }
  0x9e   : > { %s6250_s27 = scalar_lea.hbm %s6916_s5, 4096  ;;  %p6256_p6 = scmp.lt.s32.totalorder %s6916_s5, %s8145_s13 }
  0x9f   : > { %p6251_p13 = scmp.ne.s32.totalorder %s6916_s5, %s6250_s27  ;;  %p6257_p7 = scmp.lt.s32.totalorder %s6255_s3, %s6250_s27 }
  0xa1   : > { %p6253_p2 = pnand %p6251_p13, %p6830_p5  ;;  %p6258_p11 = por %p6257_p7, %p6256_p6 }
  0xa3   : > { %p6254_p3 = pneg %p6253_p2 }
  0xa5   : > { %p6259_p4 = pnand %p6258_p11, %p6254_p3 }
  0xa7   : > { %6262 = shalt.err (!%p6259_p4)
}
  0xa8   : > { %s6263_s9 = scalar_lea.vmem %s6920_s1, 4096  ;;  %s6602_s25 = smov [#allocation15]  }
  0xa9   : > { %p6264_p9 = scmp.ne.s32.totalorder %s6920_s1, %s6263_s9  ;;  %s6268_s4 = sshll.u32 %s6602_s25, 4  ;;  %s6269_s4 = int_to_ptr.vmem [resolvable:$false] %s6268_s4 }
  0xaa   : > { %s6270_s30 = scalar_lea.vmem %s6269_s4, 8192  ;;  %p6271_p12 = scmp.lt.s32.totalorder %s6920_s1, %s6269_s4 }
  0xab   : > { %p6266_p8 = pnand %p6264_p9, %p6830_p5  ;;  %p6272_p1 = scmp.lt.s32.totalorder %s6270_s30, %s6263_s9 }
  0xad   : > { %p6267_p10 = pneg %p6266_p8  ;;  %p6273_p13 = por %p6272_p1, %p6271_p12 }
  0xaf   : > { %p6274_p2 = pnand %p6273_p13, %p6267_p10 }
  0xb1   : > { %6277 = shalt.err (!%p6274_p2)
}
  0xb2   : > { %s8146_s23 = smov 16   ;;  %s8147_s19 = smov 256  }
  0xb3   : > { %5703 = dma.hbm_to_vmem [thread:$0]  (!%p6798_p0), %s6916_s5, 4096, %s6920_s1, %s789_s14, %s8147_s19, %s8147_s19, %s8146_s23  }
  0xb4   : > { %s820_s27 = scalar_lea.vmem [#allocation17], %s4982_s6  ;;  %s6961_s9 = scalar_lea.hbm %s8078_s16, %s6816_s21 }
  0xb5   : > { %s827_s28 = sshll.u32 %s820_s27, 4  ;;  %s840_s25 = scalar_lea.vmem [#allocation18], %s6791_s2  ;;  %s6955_s28 = int_to_ptr.vmem [resolvable:$true] %s827_s28 }
  0xb6   : > { %s847_s4 = sshll.u32 %s840_s25, 4  ;;  %s8109_s30 = scalar_lea.sflag [#allocation19], %s6794_s29  ;;  %s848_s4 = int_to_ptr.vmem [resolvable:$true] %s847_s4 }
  0xb7   : > { %s6278_s11 = scalar_lea.hbm %s6961_s9, 16  ;;  %s6283_s1 = scalar_lea.hbm %s8078_s16, 96 }
  0xb8   : > { %p6279_p3 = scmp.ne.s32.totalorder %s6961_s9, %s6278_s11  ;;  %p6284_p11 = scmp.lt.s32.totalorder %s6961_s9, %s8078_s16 }
  0xb9   : > { %p6285_p4 = scmp.lt.s32.totalorder %s6283_s1, %s6278_s11 }
  0xba   : > { %p6281_p6 = pnand %p6279_p3, %p6830_p5 }
  0xbb   : > { %p6286_p9 = por %p6285_p4, %p6284_p11 }
  0xbc   : > { %p6282_p7 = pneg %p6281_p6 }
  0xbe   : > { %p6287_p8 = pnand %p6286_p9, %p6282_p7 }
  0xc0   : > { %6290 = shalt.err (!%p6287_p8)
}
  0xc1   : > { %s6291_s27 = scalar_lea.vmem %s848_s4, 16  ;;  %s6603_s7 = smov [#allocation18]  }
  0xc2   : > { %p6292_p10 = scmp.ne.s32.totalorder %s848_s4, %s6291_s27  ;;  %s6296_s3 = sshll.u32 %s6603_s7, 4  ;;  %s6297_s3 = int_to_ptr.vmem [resolvable:$false] %s6296_s3 }
  0xc3   : > { %s6298_s25 = scalar_lea.vmem %s6297_s3, 32  ;;  %p6299_p13 = scmp.lt.s32.totalorder %s848_s4, %s6297_s3 }
  0xc4   : > { %p6294_p12 = pnand %p6292_p10, %p6830_p5  ;;  %p6300_p2 = scmp.lt.s32.totalorder %s6298_s25, %s6291_s27 }
  0xc6   : > { %p6295_p1 = pneg %p6294_p12  ;;  %p6301_p3 = por %p6300_p2, %p6299_p13 }
  0xc8   : > { %p6302_p6 = pnand %p6301_p3, %p6295_p1 }
  0xca   : > { %6305 = shalt.err (!%p6302_p6)
}
  0xcb   : > { %5709 = dma.hbm_to_vmem [thread:$0]  (!%p6798_p0), %s6961_s9, 16, %s848_s4, %s8109_s30  }
  0xcc   : > { %s6604_s11 = smov [#allocation4]   ;;  %s6605_s5 = smov [#allocation24]  }
  0xcd   : > { %s614_s6 = sshll.u32 %s6604_s11, 4  ;;  %s641_s1 = sshll.u32 %s6605_s5, 4  ;;  %s615_s6 = int_to_ptr.vmem [resolvable:$true] %s614_s6  ;;  %s642_s1 = int_to_ptr.vmem [resolvable:$true] %s641_s1 }
  0xce   : > { %s6317_s23 = scalar_lea.vmem %s615_s6, 16  ;;  %p8148_p11 = scmp.ne.s32.totalorder %s8137_s24, 0 }
  0xcf   : > { %p6318_p7 = scmp.ne.s32.totalorder %s615_s6, %s6317_s23  ;;  %s6324_s19 = scalar_lea.vmem %s615_s6, 32 }
  0xd0   : > { %p8149_p4 = pneg %p8148_p11  ;;  %p6325_p10 = scmp.lt.s32.totalorder %s615_s6, %s615_s6 }
  0xd1   : > { %p6326_p12 = scmp.lt.s32.totalorder %s6324_s19, %s6317_s23 }
  0xd2   : > { %p6320_p9 = pnand %p6318_p7, %p8149_p4 }
  0xd3   : > { %p6327_p1 = por %p6326_p12, %p6325_p10 }
  0xd4   : > { %p6321_p8 = pneg %p6320_p9 }
  0xd6   : > { %p6328_p13 = pnand %p6327_p1, %p6321_p8 }
  0xd8   : > { %6331 = shalt.err (!%p6328_p13)
}
  0xd9   : > { %s8150_s27 = sld [smem:[#allocation43_spill]]  ;;  %s6343_s7 = scalar_lea.vmem %s642_s1, 64 }
  0xda   : > { %p6344_p2 = scmp.ne.s32.totalorder %s642_s1, %s6343_s7  ;;  %p8151_p3 = pmov %p8149_p4 }
  0xdb   : > { %p6351_p4 = scmp.lt.s32.totalorder %s642_s1, %s642_s1  ;;  %p6352_p9 = scmp.lt.s32.totalorder %s6343_s7, %s6343_s7 }
  0xdc   : > { %p6346_p6 = pnand %p6344_p2, %p8151_p3 }
  0xdd   : > { %p6353_p0 = por %p6352_p9, %p6351_p4 }
  0xde   : > { %p6347_p7 = pneg %p6346_p6 }
  0xdf   : > { %5675 = dma.hbm_to_vmem [thread:$0]  (!%p8148_p11), %s8150_s27, 16, %s615_s6, [#allocation5]  }
  0xe0   : > { %p6354_p10 = pnand %p6353_p0, %p6347_p7 }
  0xe2   : > { %6357 = shalt.err (!%p6354_p10)
}
  0xe3   : > { %5681 = dma.hbm_to_vmem [thread:$0]  (!%p8148_p11), %s8082_s20, 64, %s642_s1, [#allocation25]  }
  0xe4   : > { %s8152_s8 = sld [smem:[#allocation50_spill]]  ;;  %s702_s23 = scalar_lea.vmem [#allocation8], %s6791_s2 }
  0xe5   : > { %s709_s19 = sshll.u32 %s702_s23, 4  ;;  %s710_s19 = int_to_ptr.vmem [resolvable:$true] %s709_s19 }
  0xea   : > { %s707_s5 = scalar_lea.hbm %s8152_s8, %s6816_s21  ;;  %s6363_s27 = scalar_lea.hbm %s8152_s8, 96 }
  0xeb   : > { %s6358_s9 = scalar_lea.hbm %s707_s5, 16  ;;  %p6364_p11 = scmp.lt.s32.totalorder %s707_s5, %s8152_s8 }
  0xec   : > { %p6359_p8 = scmp.ne.s32.totalorder %s707_s5, %s6358_s9  ;;  %p6365_p1 = scmp.lt.s32.totalorder %s6363_s27, %s6358_s9 }
  0xee   : > { %p6361_p0 = pnand %p6359_p8, %p6830_p5  ;;  %p6366_p13 = por %p6365_p1, %p6364_p11 }
  0xf0   : > { %p6362_p12 = pneg %p6361_p0 }
  0xf2   : > { %p6367_p2 = pnand %p6366_p13, %p6362_p12 }
  0xf4   : > { %6370 = shalt.err (!%p6367_p2)
}
  0xf5   : > { %s6371_s1 = scalar_lea.vmem %s710_s19, 16  ;;  %s6606_s25 = smov [#allocation8]  }
  0xf6   : > { %p6372_p3 = scmp.ne.s32.totalorder %s710_s19, %s6371_s1  ;;  %s6376_s11 = sshll.u32 %s6606_s25, 4  ;;  %s6377_s11 = int_to_ptr.vmem [resolvable:$false] %s6376_s11 }
  0xf7   : > { %s6378_s6 = scalar_lea.vmem %s6377_s11, 32  ;;  %p6379_p4 = scmp.lt.s32.totalorder %s710_s19, %s6377_s11 }
  0xf8   : > { %p6374_p6 = pnand %p6372_p3, %p6830_p5  ;;  %p6380_p9 = scmp.lt.s32.totalorder %s6378_s6, %s6371_s1 }
  0xfa   : > { %p6375_p7 = pneg %p6374_p6  ;;  %p6381_p10 = por %p6380_p9, %p6379_p4 }
  0xfc   : > { %p6382_p8 = pnand %p6381_p10, %p6375_p7 }
  0xfe   : > { %6385 = shalt.err (!%p6382_p8)
}
  0xff   : > { %p8153_p0 = scmp.ne.s32.totalorder %s8138_s0, 0  ;;  %s8154_s23 = scalar_lea.sflag [#allocation7], %s6794_s29 }
 0x100   : > { %s8155_s10 = sld [smem:[#allocation52_spill]]  ;;  %s740_s27 = scalar_lea.vmem [#allocation11], %s6791_s2 }
 0x101   : > { %5688 = dma.hbm_to_vmem [thread:$0]  (!%p8153_p0), %s707_s5, 16, %s710_s19, %s8154_s23  }
 0x102   : > { %s747_s7 = sshll.u32 %s740_s27, 4  ;;  %s748_s7 = int_to_ptr.vmem [resolvable:$true] %s747_s7 }
 0x106   : > { %s745_s4 = scalar_lea.hbm %s8155_s10, %s6816_s21  ;;  %s6391_s11 = scalar_lea.hbm %s8155_s10, 96 }
 0x107   : > { %s6386_s3 = scalar_lea.hbm %s745_s4, 16  ;;  %p6392_p13 = scmp.lt.s32.totalorder %s745_s4, %s8155_s10 }
 0x108   : > { %p6387_p12 = scmp.ne.s32.totalorder %s745_s4, %s6386_s3  ;;  %p6393_p2 = scmp.lt.s32.totalorder %s6391_s11, %s6386_s3 }
 0x10a   : > { %p6389_p11 = pnand %p6387_p12, %p6830_p5  ;;  %p6394_p3 = por %p6393_p2, %p6392_p13 }
 0x10c   : > { %p6390_p1 = pneg %p6389_p11 }
 0x10e   : > { %p6395_p6 = pnand %p6394_p3, %p6390_p1 }
 0x110   : > { %6398 = shalt.err (!%p6395_p6)
}
 0x111   : > { %s6399_s5 = scalar_lea.vmem %s748_s7, 16  ;;  %s6607_s19 = smov [#allocation11]  }
 0x112   : > { %p6400_p7 = scmp.ne.s32.totalorder %s748_s7, %s6399_s5  ;;  %s6404_s23 = sshll.u32 %s6607_s19, 4  ;;  %s6405_s23 = int_to_ptr.vmem [resolvable:$false] %s6404_s23 }
 0x113   : > { %s6406_s9 = scalar_lea.vmem %s6405_s23, 32  ;;  %p6407_p10 = scmp.lt.s32.totalorder %s748_s7, %s6405_s23 }
 0x114   : > { %p6402_p4 = pnand %p6400_p7, %p6830_p5  ;;  %p6408_p8 = scmp.lt.s32.totalorder %s6406_s9, %s6399_s5 }
 0x116   : > { %p6403_p9 = pneg %p6402_p4  ;;  %p6409_p12 = por %p6408_p8, %p6407_p10 }
 0x118   : > { %p6410_p11 = pnand %p6409_p12, %p6403_p9 }
 0x11a   : > { %6413 = shalt.err (!%p6410_p11)
}
 0x11b   : > { %s8156_s30 = scalar_lea.sflag [#allocation10], %s6794_s29  ;;  %s8157_s12 = sld [smem:[#allocation54_spill]] }
 0x11c   : > { %5694 = dma.hbm_to_vmem [thread:$0]  (!%p8153_p0), %s745_s4, 16, %s748_s7, %s8156_s30  }
 0x11d   : > { %s774_s1 = scalar_lea.vmem [#allocation14], %s6791_s2 }
 0x11e   : > { %s781_s25 = sshll.u32 %s774_s1, 4  ;;  %s782_s25 = int_to_ptr.vmem [resolvable:$true] %s781_s25 }
 0x121   : > { %s779_s3 = scalar_lea.hbm %s8157_s12, %s6816_s21  ;;  %s6419_s19 = scalar_lea.hbm %s8157_s12, 96 }
 0x122   : > { %s6414_s11 = scalar_lea.hbm %s779_s3, 16  ;;  %p6420_p3 = scmp.lt.s32.totalorder %s779_s3, %s8157_s12 }
 0x123   : > { %p6415_p1 = scmp.ne.s32.totalorder %s779_s3, %s6414_s11  ;;  %p6421_p6 = scmp.lt.s32.totalorder %s6419_s19, %s6414_s11 }
 0x125   : > { %p6417_p13 = pnand %p6415_p1, %p6830_p5  ;;  %p6422_p7 = por %p6421_p6, %p6420_p3 }
 0x127   : > { %p6418_p2 = pneg %p6417_p13 }
 0x129   : > { %p6423_p4 = pnand %p6422_p7, %p6418_p2 }
 0x12b   : > { %6426 = shalt.err (!%p6423_p4)
}
 0x12c   : > { %s6427_s4 = scalar_lea.vmem %s782_s25, 16  ;;  %s6608_s7 = smov [#allocation14]  }
 0x12d   : > { %p6428_p9 = scmp.ne.s32.totalorder %s782_s25, %s6427_s4  ;;  %s6432_s30 = sshll.u32 %s6608_s7, 4  ;;  %s6433_s30 = int_to_ptr.vmem [resolvable:$false] %s6432_s30 }
 0x12e   : > { %s6434_s24 = scalar_lea.vmem %s6433_s30, 32  ;;  %p6435_p12 = scmp.lt.s32.totalorder %s782_s25, %s6433_s30 }
 0x12f   : > { %p6430_p10 = pnand %p6428_p9, %p6830_p5  ;;  %p6436_p11 = scmp.lt.s32.totalorder %s6434_s24, %s6427_s4 }
 0x131   : > { %p6431_p8 = pneg %p6430_p10  ;;  %p6437_p1 = por %p6436_p11, %p6435_p12 }
 0x133   : > { %p6438_p13 = pnand %p6437_p1, %p6431_p8 }
 0x135   : > { %6441 = shalt.err (!%p6438_p13)
}
 0x136   : > { %s8158_s27 = scalar_lea.sflag [#allocation13], %s6794_s29  ;;  %s6442_s1 = scalar_lea.hbm %s6925_s22, 4096 }
 0x137   : > { %5700 = dma.hbm_to_vmem [thread:$0]  (!%p8153_p0), %s779_s3, 16, %s782_s25, %s8158_s27  }
 0x138   : > { %p6443_p2 = scmp.ne.s32.totalorder %s6925_s22, %s6442_s1  ;;  %s6447_s5 = scalar_lea.hbm %s8077_s15, 24576 }
 0x139   : > { %p6448_p7 = scmp.lt.s32.totalorder %s6925_s22, %s8077_s15  ;;  %p6449_p4 = scmp.lt.s32.totalorder %s6447_s5, %s6442_s1 }
 0x13a   : > { %p6445_p3 = pnand %p6443_p2, %p6830_p5 }
 0x13b   : > { %p6450_p9 = por %p6449_p4, %p6448_p7 }
 0x13c   : > { %p6446_p6 = pneg %p6445_p3 }
 0x13e   : > { %p6451_p10 = pnand %p6450_p9, %p6446_p6 }
 0x140   : > { %6454 = shalt.err (!%p6451_p10)
}
 0x141   : > { %s6455_s3 = scalar_lea.vmem %s6955_s28, 4096  ;;  %s6609_s25 = smov [#allocation17]  }
 0x142   : > { %p6456_p8 = scmp.ne.s32.totalorder %s6955_s28, %s6455_s3  ;;  %s6460_s9 = sshll.u32 %s6609_s25, 4  ;;  %s6461_s9 = int_to_ptr.vmem [resolvable:$false] %s6460_s9 }
 0x143   : > { %s6462_s4 = scalar_lea.vmem %s6461_s9, 8192  ;;  %p6463_p1 = scmp.lt.s32.totalorder %s6955_s28, %s6461_s9 }
 0x144   : > { %p6458_p12 = pnand %p6456_p8, %p6830_p5  ;;  %p6464_p13 = scmp.lt.s32.totalorder %s6462_s4, %s6455_s3 }
 0x146   : > { %p6459_p11 = pneg %p6458_p12  ;;  %p6465_p2 = por %p6464_p13, %p6463_p1 }
 0x148   : > { %p6466_p3 = pnand %p6465_p2, %p6459_p11 }
 0x14a   : > { %6469 = shalt.err (!%p6466_p3)
}
 0x14b   : > { %s8159_s7 = smov 4   ;;  %s8160_s30 = smov 64  }
 0x14c   : > { %5706 = dma.hbm_to_vmem [thread:$0]  (!%p8153_p0), %s6925_s22, 4096, %s6955_s28, %s789_s14, %s8160_s30, %s8160_s30, %s8159_s7  }
 0x14d   : > { %s862_s1 = scalar_lea.hbm %s8079_s17, %s6816_s21  ;;  %s857_s11 = scalar_lea.vmem [#allocation20], %s6791_s2 }
 0x14e   : > { %s864_s6 = sshll.u32 %s857_s11, 4  ;;  %s6470_s5 = scalar_lea.hbm %s862_s1, 16  ;;  %s865_s6 = int_to_ptr.vmem [resolvable:$true] %s864_s6 }
 0x14f   : > { %p6471_p6 = scmp.ne.s32.totalorder %s862_s1, %s6470_s5  ;;  %s6475_s3 = scalar_lea.hbm %s8079_s17, 96 }
 0x150   : > { %p6476_p9 = scmp.lt.s32.totalorder %s862_s1, %s8079_s17  ;;  %p6477_p10 = scmp.lt.s32.totalorder %s6475_s3, %s6470_s5 }
 0x151   : > { %p6473_p7 = pnand %p6471_p6, %p6830_p5 }
 0x152   : > { %p6478_p8 = por %p6477_p10, %p6476_p9 }
 0x153   : > { %p6474_p4 = pneg %p6473_p7 }
 0x155   : > { %p6479_p12 = pnand %p6478_p8, %p6474_p4 }
 0x157   : > { %6482 = shalt.err (!%p6479_p12)
}
 0x158   : > { %s6483_s22 = scalar_lea.vmem %s865_s6, 16  ;;  %s6610_s14 = smov [#allocation20]  }
 0x159   : > { %p6484_p11 = scmp.ne.s32.totalorder %s865_s6, %s6483_s22  ;;  %s6488_s28 = sshll.u32 %s6610_s14, 4  ;;  %s6489_s28 = int_to_ptr.vmem [resolvable:$false] %s6488_s28 }
 0x15a   : > { %s6490_s4 = scalar_lea.vmem %s6489_s28, 32  ;;  %p6491_p2 = scmp.lt.s32.totalorder %s865_s6, %s6489_s28 }
 0x15b   : > { %p6486_p1 = pnand %p6484_p11, %p6830_p5  ;;  %p6492_p3 = scmp.lt.s32.totalorder %s6490_s4, %s6483_s22 }
 0x15d   : > { %p6487_p13 = pneg %p6486_p1  ;;  %p6493_p6 = por %p6492_p3, %p6491_p2 }
 0x15f   : > { %p6494_p7 = pnand %p6493_p6, %p6487_p13 }
 0x161   : > { %6497 = shalt.err (!%p6494_p7)
}
 0x162   : > { %s8161_s7 = scalar_lea.sflag [#allocation19], %s6794_s29  ;;  %s7104_s27 = scalar_lea.hbm %s8080_s18, %s6816_s21 }
 0x163   : > { %5712 = dma.hbm_to_vmem [thread:$0]  (!%p8153_p0), %s862_s1, 16, %s865_s6, %s8161_s7  }
 0x164   : > { %s874_s11 = scalar_lea.vmem [#allocation21], %s6791_s2  ;;  %s872_s19 = scalar_lea.sflag [#allocation22], %s6794_s29 }
 0x165   : > { %s881_s5 = sshll.u32 %s874_s11, 4  ;;  %s6498_s23 = scalar_lea.hbm %s7104_s27, 16  ;;  %s882_s5 = int_to_ptr.vmem [resolvable:$true] %s881_s5 }
 0x166   : > { %p6499_p4 = scmp.ne.s32.totalorder %s7104_s27, %s6498_s23  ;;  %s6503_s1 = scalar_lea.hbm %s8080_s18, 96 }
 0x167   : > { %p6504_p8 = scmp.lt.s32.totalorder %s7104_s27, %s8080_s18  ;;  %p6505_p12 = scmp.lt.s32.totalorder %s6503_s1, %s6498_s23 }
 0x168   : > { %p6501_p9 = pnand %p6499_p4, %p6830_p5 }
 0x169   : > { %p6506_p11 = por %p6505_p12, %p6504_p8 }
 0x16a   : > { %p6502_p10 = pneg %p6501_p9 }
 0x16c   : > { %p6507_p1 = pnand %p6506_p11, %p6502_p10 }
 0x16e   : > { %6510 = shalt.err (!%p6507_p1)
}
 0x16f   : > { %s6511_s21 = scalar_lea.vmem %s882_s5, 16  ;;  %s6611_s2 = smov [#allocation21]  }
 0x170   : > { %p6512_p13 = scmp.ne.s32.totalorder %s882_s5, %s6511_s21  ;;  %s6516_s29 = sshll.u32 %s6611_s2, 4  ;;  %s6517_s29 = int_to_ptr.vmem [resolvable:$false] %s6516_s29 }
 0x171   : > { %s6518_s22 = scalar_lea.vmem %s6517_s29, 32  ;;  %p6519_p6 = scmp.lt.s32.totalorder %s882_s5, %s6517_s29 }
 0x172   : > { %p6514_p2 = pnand %p6512_p13, %p6830_p5  ;;  %p6520_p7 = scmp.lt.s32.totalorder %s6518_s22, %s6511_s21 }
 0x174   : > { %p6515_p3 = pneg %p6514_p2  ;;  %p6521_p4 = por %p6520_p7, %p6519_p6 }
 0x176   : > { %p6522_p9 = pnand %p6521_p4, %p6515_p3 }
 0x178   : > { %6525 = shalt.err (!%p6522_p9)
}
 0x179   : > { %5715 = dma.hbm_to_vmem [thread:$0]  (!%p8153_p0), %s7104_s27, 16, %s882_s5, %s872_s19  }
 0x17a   : > { %s8162_s14 = sld [smem:[#allocation41_spill]] }
 0x180   : > { %p8163_p10 = scmp.ne.s32.totalorder %s8162_s14, 0 }
 0x181   : > { %s8164_s28 = sld [smem:[#allocation37_spill]] (!%p8163_p10) }
 0x182   : > { %890 = sbr.rel (%p8163_p10) target bundleno = 6572 (0x19ac), region = 104 }
 0x187   : > { %p8165_p8 = scmp.eq.s32.totalorder %s8164_s28, 0 }
 0x189   : > { %6543 = dma.done.wait (%p8165_p8), [#allocation5], 16   ;;  %p8166_p5 = pmov %p8165_p8 }
 0x18a   : > { %s8167_s26 = sld [smem:[#allocation35_spill]]  ;;  %s7131_s7 = sand.u32 1, %s8164_s28  }
 0x18b   : > { %6545 = vsyncadd (%p8166_p5), [#allocation5], 4294967280  ;;  %s8168_s4 = sld [smem:[#allocation40_spill]]  ;;  %s897_s0 = scalar_lea.sflag [#allocation7], %s7131_s7 }
 0x190   : > { %s7134_s30 = sand.u32 1, %s8167_s26  }
 0x191   : > { %p8169_p0 = scmp.ne.s32.totalorder %s8168_s4, 0 }
 0x193   : > { %6547 = dma.done.wait (%p8169_p0), %s897_s0, 32  }
 0x194   : > { %6549 = vsyncadd (%p8169_p0), %s897_s0, 4294967264  ;;  %s4993_s27 = sshll.u32 %s7134_s30, 6  ;;  %s913_s5 = scalar_lea.sflag [#allocation10], %s7131_s7 }
 0x195   : > { %s7145_s19 = scalar_lea.vmem [#allocation9], %s4993_s27 }
 0x196   : > { %6551 = dma.done.wait (%p8169_p0), %s913_s5, 1040  }
 0x197   : > { %6553 = vsyncadd (%p8169_p0), %s913_s5, 4294966256  ;;  %s930_s3 = scalar_lea.sflag [#allocation13], %s7131_s7 }
 0x198   : > { %6555 = dma.done.wait (%p8169_p0), %s930_s3, 32  }
 0x199   : > { %6557 = vsyncadd (%p8169_p0), %s930_s3, 4294967264  ;;  %s4994_s1 = sshll.u32 %s7134_s30, 8  ;;  %s946_s9 = scalar_lea.sflag [#allocation16], %s7131_s7 }
 0x19a   : > { %s7161_s21 = scalar_lea.vmem [#allocation15], %s4994_s1 }
 0x19b   : > { %6559 = dma.done.wait (%p8169_p0), %s946_s9, 8192  }
 0x19c   : > { %6561 = vsyncadd (%p8169_p0), %s946_s9, 4294959104  ;;  %s7167_s2 = scalar_lea.vmem [#allocation17], %s4994_s1  ;;  %s964_s29 = scalar_lea.sflag [#allocation19], %s7131_s7 }
 0x19d   : > { %6563 = dma.done.wait (%p8169_p0), %s964_s29, 32  }
 0x19e   : > { %6565 = vsyncadd (%p8169_p0), %s964_s29, 4294967264  ;;  %s980_s26 = scalar_lea.sflag [#allocation22], %s7131_s7 }
 0x19f   : > { %6567 = dma.done.wait (%p8169_p0), %s980_s26, 16  }
 0x1a0   : > { %6569 = vsyncadd (%p8169_p0), %s980_s26, 4294967280  ;;  %p8170_p12 = pmov %p8166_p5 }
 0x1a1   : > { %p8171_p11 = pmov %p8166_p5 }
 0x1a2   : > { %6571 = dma.done.wait (%p8170_p12), [#allocation22], 4096  }
 0x1a3   : > { %6573 = vsyncadd (%p8171_p11), [#allocation22], 4294963200  ;;  %p8172_p1 = pmov %p8166_p5 }
 0x1a5   : > { %6575 = dma.done.wait (%p8172_p1), [#allocation25], 64   ;;  %p8173_p13 = pmov %p8172_p1 }
 0x1a6   : > { %p1108_p2 = scmp.lt.s32.totalorder %s8164_s28, 5  ;;  %s8174_s3 = sld [smem:[#allocation46_spill]] }
 0x1a7   : > { %6577 = vsyncadd (%p8173_p13), [#allocation25], 4294967232  ;;  %s8175_s26 = sld [smem:[#allocation45_spill]]  ;;  %p8179_p3 = scmp.ne.s32.totalorder %s8164_s28, 0 }
 0x1a8   : > { %s7192_s7 = scalar_select %p1108_p2, %s8164_s28, 5 }
 0x1a9   : > { %s8176_s23 = sld [smem:[#allocation47_spill]] }
 0x1aa   : > { %s5203_s4 = sshll.u32 %s7192_s7, 6  ;;  %s8177_s25 = sld [smem:[#allocation49_spill]] }
 0x1ab   : > { %s5004_s10 = sshll.u32 %s7192_s7, 2  ;;  %s8178_s27 = sld [smem:[#allocation56_spill]] }
 0x1ac   : > { %s1115_s1 = scalar_lea.vmem %s8174_s3, %s7192_s7  ;;  %s8180_s29 = sld [smem:[#allocation42_spill]] (!%p8179_p3) }
 0x1ad   : > { %s7202_s22 = scalar_lea.vmem %s8175_s26, %s5203_s4  ;;  %1134 = sbr.rel (%p8179_p3) target bundleno = 755 (0x2f3), region = 164 }
 0x1af   : > { %s7207_s11 = scalar_lea.vmem %s8176_s23, %s5203_s4 }
 0x1b0   : > { %s7212_s8 = scalar_lea.vmem %s8177_s25, %s5203_s4  ;;  %s8181_s4 = sld [smem:[#allocation44_spill]] (!%p8179_p3) }
 0x1b1   : > { %s7218_s5 = scalar_lea.vmem %s8178_s27, %s5004_s10 }
 0x1b2   : > { %v1136_v0 = vld [vmem:[%s8180_s29 + $0x8] sm:$0xff]  ;;  %v1139_v1 = vld [vmem:[%s8180_s29 + $0x20] sm:$0x3]  ;;  %vm1150_vm0 = vcmask 1041408   ;;  %v1137_v3 = vld [vmem:[%s8180_s29 + $0x10] sm:$0xff] }
 0x1b3   : > { %1144 = vadd.xlane.f32.xlu1 %v1136_v0  ;;  %v1151_v2 = vsel %vm1150_vm0, %v1139_v1, 0.0  ;;  %v1135_v4 = vld [vmem:[%s8180_s29] sm:$0xff]  ;;  %v1138_v5 = vld [vmem:[%s8180_s29 + $0x18] sm:$0xff]  ;;  %v5006_v43 = vld [vmem:[#allocation4] ss:$0 sm:$0xff] }
 0x1b4   : > { %1152 = vadd.xlane.f32.xlu0 %v1151_v2 }
 0x1b6   : > { %v5007_v45 = vld [vmem:[%s8181_s4] ss:$0 sm:$0xff] }
 0x1b7   : > { %1146 = vadd.xlane.f32.xlu1 %v1137_v3 }
 0x1b8   : > { %1142 = vadd.xlane.f32.xlu0 %v1135_v4 }
 0x1bc   : > { %1148 = vadd.xlane.f32.xlu0 %v1138_v5 }
 0x23c   : > { %v1145_v6 = vpop.xlane.xlu1 %1144 }
 0x23d   : > { %v1156_v7 = vmul.f32 0.0078125, %v1145_v6  ;;  %v1153_v8 = vpop.xlane.xlu0 %1152 }
 0x23e   : > { %v1159_v15 = vmul.f32 0.0078125, %v1153_v8 }
 0x23f   : > { %v1161_v9 = vsub.f32 %v1136_v0, %v1156_v7 }
 0x240   : > { %v1147_v10 = vpop.xlane.xlu1 %1146  ;;  %v1164_v21 = vsub.f32 %v1139_v1, %v1159_v15 }
 0x241   : > { %v1143_v11 = vpop.xlane.xlu0 %1142  ;;  %v1166_v12 = vmul.f32 %v1161_v9, %v1161_v9  ;;  %v1157_v13 = vmul.f32 0.0078125, %v1147_v10 }
 0x242   : > { %v1155_v14 = vmul.f32 0.0078125, %v1143_v11  ;;  %v1169_v25 = vmul.f32 %v1164_v21, %v1164_v21 }
 0x243   : > { %1172 = vadd.xlane.f32.xlu0 %v1166_v12  ;;  %v1162_v17 = vsub.f32 %v1137_v3, %v1157_v13 }
 0x244   : > { %v1160_v16 = vsub.f32 %v1135_v4, %v1155_v14  ;;  %v1178_v26 = vsel %vm1150_vm0, %v1169_v25, 0.0 }
 0x245   : > { %v1149_v18 = vpop.xlane.xlu0 %1148  ;;  %v1167_v23 = vmul.f32 %v1162_v17, %v1162_v17 }
 0x246   : > { %v1158_v19 = vmul.f32 0.0078125, %v1149_v18  ;;  %v1165_v20 = vmul.f32 %v1160_v16, %v1160_v16 }
 0x248   : > { %v1163_v22 = vsub.f32 %v1138_v5, %v1158_v19  ;;  %1170 = vadd.xlane.f32.xlu1 %v1165_v20 }
 0x24a   : > { %v1168_v24 = vmul.f32 %v1163_v22, %v1163_v22 }
 0x24c   : > { %1174 = vadd.xlane.f32.xlu1 %v1167_v23  ;;  %1176 = vadd.xlane.f32.xlu0 %v1168_v24 }
 0x250   : > { %1179 = vadd.xlane.f32.xlu1 %v1178_v26 }
 0x2cc   : > { %v1173_v27 = vpop.xlane.xlu0 %1172 }
 0x2cd   : > { %v1182_v28 = vmul.f32 0.0078125, %v1173_v27 }
 0x2cf   : > { %v1187_v29 = vadd.f32 1e-05, %v1182_v28 }
 0x2d1   : > { %5769 = vrsqrt.f32 %v1187_v29  ;;  %v1171_v30 = vpop.xlane.xlu1 %1170 }
 0x2d2   : > { %v1181_v31 = vmul.f32 0.0078125, %v1171_v30 }
 0x2d4   : > { %v1186_v32 = vadd.f32 1e-05, %v1181_v31 }
 0x2d5   : > { %v1175_v33 = vpop.xlane.xlu1 %1174  ;;  %v1177_v34 = vpop.xlane.xlu0 %1176 }
 0x2d6   : > { %5771 = vrsqrt.f32 %v1186_v32  ;;  %v1183_v35 = vmul.f32 0.0078125, %v1175_v33  ;;  %v1184_v36 = vmul.f32 0.0078125, %v1177_v34 }
 0x2d8   : > { %v1188_v37 = vadd.f32 1e-05, %v1183_v35  ;;  %v1189_v38 = vadd.f32 1e-05, %v1184_v36 }
 0x2d9   : > { %v1180_v39 = vpop.xlane.xlu1 %1179 }
 0x2da   : > { %5773 = vrsqrt.f32 %v1188_v37  ;;  %v1185_v40 = vmul.f32 0.0078125, %v1180_v39 }
 0x2db   : > { %5775 = vrsqrt.f32 %v1189_v38 }
 0x2dc   : > { %v1190_v41 = vadd.f32 1e-05, %v1185_v40 }
 0x2de   : > { %v5770_v42 = vpop.eup %5769  ;;  %5777 = vrsqrt.f32 %v1190_v41 }
 0x2df   : > { %v1197_v44 = vmul.f32 %v5770_v42, %v1161_v9 }
 0x2e1   : > { %v1208_v46 = vmul.f32 %v5006_v43, %v1197_v44 }
 0x2e3   : > { %v5772_v47 = vpop.eup %5771  ;;  %v1219_v48 = vadd.f32 %v5007_v45, %v1208_v46 }
 0x2e4   : > { %v1196_v49 = vmul.f32 %v5772_v47, %v1160_v16 }
 0x2e5   : > { %1224 = vst [vmem:[#allocation2] sm:$0xff] %v1219_v48 }
 0x2e6   : > { %v1207_v50 = vmul.f32 %v5006_v43, %v1196_v49 }
 0x2e7   : > { %v5774_v51 = vpop.eup %5773 }
 0x2e8   : > { %v5776_v52 = vpop.eup %5775  ;;  %v1218_v53 = vadd.f32 %v5007_v45, %v1207_v50  ;;  %v1198_v54 = vmul.f32 %v5774_v51, %v1162_v17 }
 0x2e9   : > { %v1199_v55 = vmul.f32 %v5776_v52, %v1163_v22 }
 0x2ea   : > { %1223 = vst [vmem:[#allocation2 + $0x8] sm:$0xff] %v1218_v53  ;;  %v1209_v56 = vmul.f32 %v5006_v43, %v1198_v54 }
 0x2eb   : > { %v5778_v57 = vpop.eup %5777  ;;  %v1210_v58 = vmul.f32 %v5006_v43, %v1199_v55 }
 0x2ec   : > { %v1220_v59 = vadd.f32 %v5007_v45, %v1209_v56  ;;  %v1200_v60 = vmul.f32 %v5778_v57, %v1164_v21 }
 0x2ed   : > { %v1221_v61 = vadd.f32 %v5007_v45, %v1210_v58 }
 0x2ee   : > { %1225 = vst [vmem:[#allocation2 + $0x20] sm:$0xff] %v1220_v59  ;;  %v1211_v62 = vmul.f32 %v5006_v43, %v1200_v60 }
 0x2ef   : > { %1226 = vst [vmem:[#allocation2 + $0x10] sm:$0xff] %v1221_v61 }
 0x2f0   : > { %v1222_v63 = vadd.f32 %v5007_v45, %v1211_v62 }
 0x2f2   : > { %1227 = vst [vmem:[#allocation2 + $0x18] sm:$0x3] %v1222_v63 }
 0x2f3 PF: > { %v1228_v0 = vld [vmem:[#allocation2 + $0x8] sm:$0xff]  ;;  %v1229_v2 = vld [vmem:[#allocation2] sm:$0xff]  ;;  %v5779_v4 = vld [vmem:[%s7202_s22 + $0x38] sm:$0xff]   ;;  %v6612_v6 = vmov 0.0   ;;  %vm1243_vm1 = vcmask 1041408   ;;  %vm6613_vm2 = vmmov 0  }
 0x2f4   : > { %1235 = vadd.xlane.f32.xlu0 %v1228_v0  ;;  %v5780_v5 = vld [vmem:[%s7207_s11 + $0x38] sm:$0xff]   ;;  %5382 = vmatprep.subr.bf16.mxu0 %v6612_v6  ;;  %v5781_v25 = vld [vmem:[%s7202_s22 + $0x30] sm:$0xff]   ;;  %v5783_v27 = vld [vmem:[%s7202_s22 + $0x28] sm:$0xff]   ;;  %s8185_s3 = scalar_lea.vmem [#allocation6], %s7134_s30  ;;  %vm1709_vm3 = vcmask 261120   ;;  %vm1815_vm5 = vcmask 1040384  }
 0x2f5   : > { %v1230_v1 = vld [vmem:[#allocation2 + $0x20] sm:$0xff]  ;;  %5410 = vmatprep.subr.bf16.mxu1 %v6612_v6  ;;  %5383 = vmatpush3.bf16.msra.mxu0 %v5779_v4  ;;  %v5782_v26 = vld [vmem:[%s7207_s11 + $0x30] sm:$0xff]   ;;  %v5784_v28 = vld [vmem:[%s7207_s11 + $0x28] sm:$0xff]   ;;  %vm2429_vm4 = vsmask.f32 7424  ;;  %s8186_s7 = scalar_lea.vmem [#allocation8], %s7134_s30 }
 0x2f6   : > { %1239 = vadd.xlane.f32.xlu1 %v1230_v1  ;;  %v1231_v3 = vld [vmem:[#allocation2 + $0x10] sm:$0xff]  ;;  %5411 = vmatpush3.bf16.msra.mxu1 %v5780_v5  ;;  %v5785_v29 = vld [vmem:[%s7202_s22 + $0x20] sm:$0xff]   ;;  %v5787_v31 = vld [vmem:[%s7202_s22 + $0x18] sm:$0xff]   ;;  %vm1770_vm6 = vcmask 138240   ;;  %vm1777_vm7 = vcmask 131072   ;;  %s6616_s9 = smov 64  }
 0x2f7   : > { %5384 = vmatprep.subr.bf16.mxu0 %v6612_v6  ;;  %5412 = vmatprep.subr.bf16.mxu1 %v6612_v6  ;;  %v5786_v30 = vld [vmem:[%s7207_s11 + $0x20] sm:$0xff]   ;;  %v5788_v32 = vld [vmem:[%s7207_s11 + $0x18] sm:$0xff]   ;;  %v5789_v33 = vld [vmem:[%s7202_s22 + $0x10] sm:$0xff]   ;;  %vm1871_vm8 = vcmask 253952   ;;  %s6617_s23 = smov 32   ;;  %vm2056_vm9 = vcmask 523520  }
 0x2f8   : > { %1237 = vadd.xlane.f32.xlu0 %v1229_v2  ;;  %v5790_v34 = vld [vmem:[%s7207_s11 + $0x10] sm:$0xff]   ;;  %5398 = vmatprep.mubr.msk.bf16.mxu0 %vm6613_vm2, %v6612_v6  ;;  %v5791_v35 = vld [vmem:[%s7202_s22 + $0x8] sm:$0xff]   ;;  %v5793_v37 = vld [vmem:[%s7202_s22] sm:$0xff]   ;;  %s8183_s22 = scalar_lea.vmem [#allocation14], %s7134_s30  ;;  %vm2238_vm10 = vcmask 785920   ;;  %vm2420_vm11 = vcmask 1048320  }
 0x2f9   : > { %v7262_v22 = vld [vmem:[#allocation2 + $0x18] sm:$0x3]  ;;  %5385 = vmatpush3.bf16.msra.mxu0 %v5781_v25  ;;  %5426 = vmatprep.mubr.msk.bf16.mxu1 %vm6613_vm2, %v6612_v6  ;;  %v5792_v36 = vld [vmem:[%s7207_s11 + $0x8] sm:$0xff]   ;;  %v5794_v38 = vld [vmem:[%s7207_s11] sm:$0xff]   ;;  %s8182_s11 = scalar_lea.vmem [#allocation12], %s7134_s30  ;;  %vm2059_vm12 = vcmask 516352  }
 0x2fa   : > { %1241 = vadd.xlane.f32.xlu1 %v1231_v3  ;;  %v1244_v24 = vsel %vm1243_vm1, %v7262_v22, 0.0  ;;  %5413 = vmatpush3.bf16.msra.mxu1 %v5782_v26  ;;  %v5008_v58 = vld [vmem:[%s8182_s11] ss:$0 sm:$0xff]  ;;  %vm2241_vm13 = vcmask 778752   ;;  %vm2423_vm14 = vcmask 1041152   ;;  %s8189_s14 = scalar_lea.vmem [#allocation21], %s7134_s30 }
 0x2fb   : > { %5386 = vmatprep.subr.bf16.mxu0 %v6612_v6  ;;  %5414 = vmatprep.subr.bf16.mxu1 %v6612_v6  ;;  %v5009_v63 = vld [vmem:[%s8183_s22] ss:$0 sm:$0xff] }
 0x2fd   : > { %5387 = vmatpush3.bf16.msra.mxu0 %v5783_v27 }
 0x2fe   : > { %5415 = vmatpush3.bf16.msra.mxu1 %v5784_v28  ;;  %5388 = vmatprep.subr.bf16.mxu0 %v6612_v6 }
 0x2ff   : > { %5416 = vmatprep.subr.bf16.mxu1 %v6612_v6 }
 0x301   : > { %5389 = vmatpush3.bf16.msra.mxu0 %v5785_v29  ;;  %v5010_v29 = vld [vmem:[%s1115_s1] ss:$0 sm:$0xff]  ;;  %s6615_s1 = smov 96  }
 0x302   : > { %5417 = vmatpush3.bf16.msra.mxu1 %v5786_v30  ;;  %5390 = vmatprep.subr.bf16.mxu0 %v6612_v6 }
 0x303   : > { %5418 = vmatprep.subr.bf16.mxu1 %v6612_v6 }
 0x305   : > { %5391 = vmatpush3.bf16.msra.mxu0 %v5787_v31 }
 0x306   : > { %5419 = vmatpush3.bf16.msra.mxu1 %v5788_v32  ;;  %5392 = vmatprep.subr.bf16.mxu0 %v6612_v6 }
 0x307   : > { %5420 = vmatprep.subr.bf16.mxu1 %v6612_v6 }
 0x309   : > { %5393 = vmatpush3.bf16.msra.mxu0 %v5789_v33 }
 0x30a   : > { %5421 = vmatpush3.bf16.msra.mxu1 %v5790_v34  ;;  %5394 = vmatprep.subr.bf16.mxu0 %v6612_v6 }
 0x30b   : > { %5422 = vmatprep.subr.bf16.mxu1 %v6612_v6 }
 0x30d   : > { %5395 = vmatpush3.bf16.msra.mxu0 %v5791_v35 }
 0x30e   : > { %5423 = vmatpush3.bf16.msra.mxu1 %v5792_v36  ;;  %5396 = vmatprep.subr.bf16.mxu0 %v6612_v6 }
 0x30f   : > { %5424 = vmatprep.subr.bf16.mxu1 %v6612_v6 }
 0x311   : > { %5397 = vmatpush3.bf16.msra.mxu0 %v5793_v37 }
 0x312   : > { %5425 = vmatpush3.bf16.msra.mxu1 %v5794_v38  ;;  %5438 = vmatprep.subr.bf16.mxu0 %v6612_v6 }
 0x37d   : > { %v1236_v7 = vpop.xlane.xlu0 %1235 }
 0x37e   : > { %v1248_v9 = vmul.f32 0.0078125, %v1236_v7 }
 0x37f   : > { %v1240_v8 = vpop.xlane.xlu1 %1239 }
 0x380   : > { %v1250_v10 = vmul.f32 0.0078125, %v1240_v8  ;;  %v7248_v11 = vsub.f32 %v1228_v0, %v1248_v9  ;;  %v5795_v9 = vld [vmem:[%s7212_s8 + $0x38] sm:$0xff]  }
 0x381   : > { %v1238_v13 = vpop.xlane.xlu0 %1237 }
 0x382   : > { %v7250_v12 = vsub.f32 %v1230_v1, %v1250_v10  ;;  %v1249_v15 = vmul.f32 0.0078125, %v1238_v13  ;;  %v1258_v16 = vmul.f32 %v7248_v11, %v7248_v11 }
 0x383   : > { %v1242_v14 = vpop.xlane.xlu1 %1241 }
 0x384   : > { %v1251_v17 = vmul.f32 0.0078125, %v1242_v14  ;;  %1263 = vadd.xlane.f32.xlu0 %v1258_v16  ;;  %v1260_v18 = vmul.f32 %v7250_v12, %v7250_v12  ;;  %v7256_v19 = vsub.f32 %v1229_v2, %v1249_v15  ;;  %v5797_v15 = vld [vmem:[%s7212_s8 + $0x28] sm:$0xff]   ;;  %v5798_v16 = vld [vmem:[%s7212_s8 + $0x20] sm:$0xff]  }
 0x386   : > { %v7258_v20 = vsub.f32 %v1231_v3, %v1251_v17  ;;  %v1259_v21 = vmul.f32 %v7256_v19, %v7256_v19  ;;  %v5799_v17 = vld [vmem:[%s7212_s8 + $0x18] sm:$0xff]  }
 0x388   : > { %1267 = vadd.xlane.f32.xlu0 %v1260_v18  ;;  %1265 = vadd.xlane.f32.xlu1 %v1259_v21  ;;  %v1261_v23 = vmul.f32 %v7258_v20, %v7258_v20  ;;  %v5800_v18 = vld [vmem:[%s7212_s8 + $0x10] sm:$0xff]  }
 0x38c   : > { %1245 = vadd.xlane.f32.xlu0 %v1244_v24  ;;  %1269 = vadd.xlane.f32.xlu1 %v1261_v23 }
 0x40d   : > { %v1264_v39 = vpop.xlane.xlu0 %1263 }
 0x40e   : > { %v1274_v40 = vmul.f32 0.0078125, %v1264_v39 }
 0x410   : > { %v1279_v41 = vadd.f32 1e-05, %v1274_v40 }
 0x411   : > { %v1266_v42 = vpop.xlane.xlu1 %1265  ;;  %v1268_v43 = vpop.xlane.xlu0 %1267 }
 0x412   : > { %5891 = vrsqrt.f32 %v1279_v41  ;;  %v1275_v44 = vmul.f32 0.0078125, %v1266_v42  ;;  %v1276_v45 = vmul.f32 0.0078125, %v1268_v43  ;;  %v5019_v42 = vld [vmem:[%s8185_s3] ss:$0 sm:$0xff] }
 0x414   : > { %v1280_v46 = vadd.f32 1e-05, %v1275_v44  ;;  %v1281_v47 = vadd.f32 1e-05, %v1276_v45 }
 0x415   : > { %v1270_v48 = vpop.xlane.xlu1 %1269  ;;  %v1246_v49 = vpop.xlane.xlu0 %1245 }
 0x416   : > { %5893 = vrsqrt.f32 %v1280_v46  ;;  %v1277_v50 = vmul.f32 0.0078125, %v1270_v48  ;;  %v1252_v51 = vmul.f32 0.0078125, %v1246_v49 }
 0x417   : > { %5895 = vrsqrt.f32 %v1281_v47 }
 0x418   : > { %v1282_v52 = vadd.f32 1e-05, %v1277_v50  ;;  %v1257_v53 = vsub.f32 %v7262_v22, %v1252_v51 }
 0x41a   : > { %5897 = vrsqrt.f32 %v1282_v52  ;;  %v1262_v54 = vmul.f32 %v1257_v53, %v1257_v53 }
 0x41c   : > { %v1271_v55 = vsel %vm1243_vm1, %v1262_v54, 0.0 }
 0x41d   : > { %1272 = vadd.xlane.f32.xlu1 %v1271_v55 }
 0x41f   : > { %v5892_v56 = vpop.eup %5891 }
 0x420   : > { %v1289_v57 = vmul.f32 %v5892_v56, %v7248_v11 }
 0x422   : > { %v1300_v61 = vmul.f32 %v5008_v58, %v1289_v57 }
 0x423   : > { %v5894_v59 = vpop.eup %5893 }
 0x424   : > { %v1290_v60 = vmul.f32 %v5894_v59, %v7256_v19  ;;  %v5896_v62 = vpop.eup %5895  ;;  %v1311_v2 = vadd.f32 %v5009_v63, %v1300_v61  ;;  %v5801_v19 = vld [vmem:[%s7212_s8 + $0x8] sm:$0xff]  }
 0x425   : > { %v1291_v4 = vmul.f32 %v5896_v62, %v7250_v12  ;;  %v5796_v12 = vld [vmem:[%s7212_s8 + $0x30] sm:$0xff]  }
 0x426   : > { %v1301_v0 = vmul.f32 %v5008_v58, %v1290_v60 }
 0x427   : > { %v5898_v1 = vpop.eup %5897  ;;  %v1302_v10 = vmul.f32 %v5008_v58, %v1291_v4 }
 0x428   : > { %v1312_v3 = vadd.f32 %v5009_v63, %v1301_v0  ;;  %v1292_v5 = vmul.f32 %v5898_v1, %v7258_v20  ;;  %v5802_v20 = vld [vmem:[%s7212_s8] sm:$0xff]  }
 0x429   : > { %v1313_v13 = vadd.f32 %v5009_v63, %v1302_v10 }
 0x42a   : > { %v1316_v7 = vpack.c.bf16 %v1312_v3, %v1311_v2  ;;  %v1303_v8 = vmul.f32 %v5008_v58, %v1292_v5 }
 0x42c   : > { %5399 = vmatmul.mubr.bf16.vlgmr.msra.gmra.mxu0 %v1316_v7  ;;  %5427 = vmatmul.mubr.bf16.vlgmr.msra.gmra.mxu1 %v1316_v7  ;;  %v1314_v11 = vadd.f32 %v5009_v63, %v1303_v8 }
 0x42d   : > { %5402 = vmatprep.mubr.msk.bf16.mxu0 %vm6613_vm2, %v6612_v6  ;;  %5430 = vmatprep.mubr.msk.bf16.mxu1 %vm6613_vm2, %v6612_v6 }
 0x42e   : > { %5439 = vmatpush3.bf16.msra.mxu0 %v5795_v9  ;;  %v1317_v14 = vpack.c.bf16 %v1314_v11, %v1313_v13 }
 0x42f   : > { %5440 = vmatprep.subr.bf16.mxu0 %v6612_v6 }
 0x432   : > { %5441 = vmatpush3.bf16.msra.mxu0 %v5796_v12 }
 0x433   : > { %5442 = vmatprep.subr.bf16.mxu0 %v6612_v6 }
 0x434   : > { %5403 = vmatmul.mubr.bf16.gmra.mxu0 %v1317_v14  ;;  %5431 = vmatmul.mubr.bf16.gmra.mxu1 %v1317_v14 }
 0x435   : > { %5406 = vmatprep.mubr.msk.bf16.mxu0 %vm6613_vm2, %v6612_v6  ;;  %5434 = vmatprep.mubr.msk.bf16.mxu1 %vm6613_vm2, %v6612_v6 }
 0x436   : > { %5443 = vmatpush3.bf16.msra.mxu0 %v5797_v15 }
 0x437   : > { %5444 = vmatprep.subr.bf16.mxu0 %v6612_v6 }
 0x43a   : > { %5445 = vmatpush3.bf16.msra.mxu0 %v5798_v16 }
 0x43b   : > { %5446 = vmatprep.subr.bf16.mxu0 %v6612_v6 }
 0x43e   : > { %5447 = vmatpush3.bf16.msra.mxu0 %v5799_v17 }
 0x43f   : > { %5448 = vmatprep.subr.bf16.mxu0 %v6612_v6 }
 0x442   : > { %5449 = vmatpush3.bf16.msra.mxu0 %v5800_v18 }
 0x443   : > { %5450 = vmatprep.subr.bf16.mxu0 %v6612_v6 }
 0x446   : > { %5451 = vmatpush3.bf16.msra.mxu0 %v5801_v19 }
 0x447   : > { %5452 = vmatprep.subr.bf16.mxu0 %v6612_v6 }
 0x44a   : > { %5453 = vmatpush3.bf16.msra.mxu0 %v5802_v20 }
 0x4a6   : > { %v1273_v21 = vpop.xlane.xlu1 %1272 }
 0x4a7   : > { %v1278_v22 = vmul.f32 0.0078125, %v1273_v21 }
 0x4a9   : > { %v1283_v23 = vadd.f32 1e-05, %v1278_v22 }
 0x4ab   : > { %5899 = vrsqrt.f32 %v1283_v23 }
 0x4b8   : > { %v5900_v24 = vpop.eup %5899 }
 0x4b9   : > { %v1293_v25 = vmul.f32 %v5900_v24, %v1257_v53 }
 0x4bb   : > { %v1304_v26 = vmul.f32 %v5008_v58, %v1293_v25 }
 0x4bd   : > { %v1315_v27 = vadd.f32 %v5009_v63, %v1304_v26 }
 0x4bf   : > { %v1318_v28 = vpack.c.bf16 %v1315_v27, %v1315_v27 }
 0x4c1   : > { %5407 = vmatmul.mubr.bf16.gmra.mxu0 %v1318_v28  ;;  %5435 = vmatmul.mubr.bf16.gmra.mxu1 %v1318_v28 }
 0x4c2   : > { %5454 = vmatprep.mubr.msk.bf16.mxu0 %vm6613_vm2, %v6612_v6 }
 0x4c9   : > { %5455 = vmatmul.mubr.bf16.vlgmr.msra.gmra.mxu0 %v1316_v7 }
 0x4ca   : > { %5458 = vmatprep.mubr.msk.bf16.mxu0 %vm6613_vm2, %v6612_v6 }
 0x4d1   : > { %5459 = vmatmul.mubr.bf16.gmra.mxu0 %v1317_v14 }
 0x4d2   : > { %5462 = vmatprep.mubr.msk.bf16.mxu0 %vm6613_vm2, %v6612_v6 }
 0x4d9   : > { %5463 = vmatmul.mubr.bf16.gmra.mxu0 %v1318_v28 }
 0x4ec   : > { %v1424_v30 = vpop.f32.mrf.mxu0  ;;  %v1556_v31 = vpop.f32.mrf.mxu1 }
 0x4ed   : > { %v1425_v34 = vadd.f32 %v5010_v29, %v1424_v30  ;;  %v1557_v50 = vadd.f32 %v5019_v42, %v1556_v31 }
 0x4ee   : > { %v5400_v32 = vpop.f32.mrf.mxu0  ;;  %v5428_v33 = vpop.f32.mrf.mxu1 }
 0x4ef   : > { %v1446_v40 = vmul.f32 0.17677669, %v1425_v34 }
 0x4f0   : > { %v1427_v35 = vpop.f32.mrf.mxu0  ;;  %v1559_v36 = vpop.f32.mrf.mxu1 }
 0x4f1   : > { %v1428_v37 = vadd.f32 %v5010_v29, %v1427_v35  ;;  %v1560_v46 = vadd.f32 %v5019_v42, %v1559_v36  ;;  %v5028_v35 = vld [vmem:[%s8186_s7] ss:$0 sm:$0xff] }
 0x4f2   : > { %v5401_v38 = vpop.f32.mrf.mxu0  ;;  %v5429_v39 = vpop.f32.mrf.mxu1 }
 0x4f3   : > { %v1447_v41 = vmul.f32 0.17677669, %v1428_v37  ;;  %v7351_v55 = vpack.c.bf16 %v1560_v46, %v1557_v50  ;;  %v6614_v39 = vmov 0  }
 0x4f4   : > { %v1432_v43 = vpop.f32.mrf.mxu0  ;;  %v1564_v44 = vpop.f32.mrf.mxu1 }
 0x4f5   : > { %v7345_v45 = vpack.c.bf16 %v1447_v41, %v1446_v40  ;;  %v1565_v47 = vadd.f32 %v5019_v42, %v1564_v44  ;;  %v1433_v51 = vadd.f32 %v5010_v29, %v1432_v43  ;;  %v1717_v1 = vsel %vm1709_vm3, %v7351_v55, 0 }
 0x4f6   : > { %v5404_v48 = vpop.f32.mrf.mxu0  ;;  %v5432_v49 = vpop.f32.mrf.mxu1  ;;  %v7380_v40 = vsel %vm1815_vm5, 65535, %v6614_v39 }
 0x4f7   : > { %v7347_v52 = vpack.c.bf16 %v1565_v47, %v1565_v47  ;;  %5470 = vmatprep.mubr.msk.bf16.mxu1 %vm1709_vm3, %v7345_v45  ;;  %v1448_v61 = vmul.f32 0.17677669, %v1433_v51 }
 0x4f8   : > { %v1435_v53 = vpop.f32.mrf.mxu0  ;;  %v1567_v54 = vpop.f32.mrf.mxu1 }
 0x4f9   : > { %v1436_v56 = vadd.f32 %v5010_v29, %v1435_v53  ;;  %v1568_v57 = vadd.f32 %v5019_v42, %v1567_v54  ;;  %5622 = vmatprep.subr.msk.bf16.mxu1 %vm1709_vm3, %v7347_v52  ;;  %v1720_v58 = vsel %vm1709_vm3, %v7347_v52, 0  ;;  %v7361_v2 = vpack.c.bf16 %v1448_v61, %v1448_v61 }
 0x4fa   : > { %v5405_v59 = vpop.f32.mrf.mxu0  ;;  %v5433_v60 = vpop.f32.mrf.mxu1  ;;  %5467 = vmatpush3.bf16.xpose.msra.mxu1 %v1720_v58 }
 0x4fb   : > { %v1449_v62 = vmul.f32 0.17677669, %v1436_v56  ;;  %v2427_v63 = vpack.c.bf16 %v1568_v57, %v1565_v47  ;;  %5623 = vmatprep.subr.msk.bf16.mxu1 %vm1709_vm3, %v7351_v55 }
 0x4fd   : > { %v2425_v0 = vpack.c.bf16 %v1449_v62, %v1448_v61  ;;  %v2447_v3 = vshll.u32 %v2427_v63, 16  ;;  %v2445_v18 = vshrl.u32 %v2427_v63, 16 }
 0x4ff   : > { %v2433_v7 = vshll.u32 %v2425_v0, 16  ;;  %v2449_v12 = vrot.slane %v2447_v3, 1  ;;  %v2431_v23 = vshrl.u32 %v2425_v0, 16 }
 0x501   : > { %v2435_v17 = vrot.slane %v2433_v7, 1  ;;  %v2450_v24 = vor.u32 %v2449_v12, %v2445_v18 }
 0x502   : > { %5469 = vmatpush3.bf16.xpose.msra.mxu1 %v1717_v1 }
 0x503   : > { %v2436_v28 = vor.u32 %v2435_v17, %v2431_v23 }
 0x509   : > { %5471 = vmatmul.mubr.msk.bf16.vlgmr.msra.gmra.mxu1 %vm1709_vm3, %v7361_v2 }
 0x581   : > { %v1440_v4 = vpop.f32.mrf.mxu0  ;;  %v1572_v5 = vpop.f32.mrf.mxu1 }
 0x582   : > { %v1441_v8 = vadd.f32 %v5010_v29, %v1440_v4  ;;  %v1573_v9 = vadd.f32 %v5019_v42, %v1572_v5 }
 0x583   : > { %v5408_v10 = vpop.f32.mrf.mxu0  ;;  %v5436_v11 = vpop.f32.mrf.mxu1 }
 0x584   : > { %v1450_v13 = vmul.f32 0.17677669, %v1441_v8  ;;  %v7365_v14 = vpack.c.bf16 %v1573_v9, %v1573_v9 }
 0x585   : > { %v1443_v15 = vpop.f32.mrf.mxu0  ;;  %v1575_v16 = vpop.f32.mrf.mxu1 }
 0x586   : > { %v7367_v19 = vpack.c.bf16 %v1450_v13, %v1450_v13  ;;  %v2452_v20 = vshll.u32 %v7365_v14, 16 }
 0x587   : > { %v5409_v21 = vpop.f32.mrf.mxu0  ;;  %v5437_v22 = vpop.f32.mrf.mxu1 }
 0x588   : > { %v2438_v25 = vshll.u32 %v7367_v19, 16  ;;  %v2454_v26 = vrot.slane %v2452_v20, 1 }
 0x589   : > { %v1683_v27 = vpop.f32.mrf.mxu0 }
 0x58a   : > { %v2440_v29 = vrot.slane %v2438_v25, 1  ;;  %v7372_v30 = vsel %vm2429_vm4, %v2450_v24, %v2454_v26  ;;  %v1684_v44 = vadd.f32 %v5028_v35, %v1683_v27 }
 0x58b   : > { %v5456_v31 = vpop.f32.mrf.mxu0 }
 0x58c   : > { %v7375_v32 = vsel %vm2429_vm4, %v2436_v28, %v2440_v29 }
 0x58d   : > { %v1686_v33 = vpop.f32.mrf.mxu0 }
 0x58e   : > { %v1687_v41 = vadd.f32 %v5028_v35, %v1686_v33 }
 0x58f   : > { %v5457_v34 = vpop.f32.mrf.mxu0 }
 0x590   : > { %v7386_v49 = vpack.c.bf16 %v1687_v41, %v1684_v44 }
 0x591   : > { %v1691_v36 = vpop.f32.mrf.mxu0 }
 0x592   : > { %v1692_v37 = vadd.f32 %v5028_v35, %v1691_v36 }
 0x593   : > { %v5460_v38 = vpop.f32.mrf.mxu0 }
 0x594   : > { %v7382_v42 = vpack.c.bf16 %v1692_v37, %v1692_v37 }
 0x595   : > { %v1694_v43 = vpop.f32.mrf.mxu0 }
 0x596   : > { %v1695_v46 = vadd.f32 %v5028_v35, %v1694_v43  ;;  %v1819_v47 = vand.u32 %v7380_v40, %v7382_v42 }
 0x597   : > { %v5461_v48 = vpop.f32.mrf.mxu0 }
 0x598   : > { %v2553_v50 = vpack.c.bf16 %v1695_v46, %v1692_v37  ;;  %5474 = vmatprep.subr.bf16.mxu1 %v1819_v47 }
 0x599   : > { %v1699_v51 = vpop.f32.mrf.mxu0  ;;  %5475 = vmatpush3.bf16.msra.mxu1 %v1819_v47 }
 0x59a   : > { %v2558_v53 = vshll.u32 %v2553_v50, 16  ;;  %v1700_v54 = vadd.f32 %v5028_v35, %v1699_v51  ;;  %5476 = vmatprep.subr.bf16.mxu1 %v7386_v49  ;;  %v2556_v60 = vshrl.u32 %v2553_v50, 16 }
 0x59b   : > { %v5464_v56 = vpop.f32.mrf.mxu0 }
 0x59c   : > { %v2560_v57 = vrot.slane %v2558_v53, 1  ;;  %v7389_v58 = vpack.c.bf16 %v1700_v54, %v1700_v54 }
 0x59d   : > { %v1702_v59 = vpop.f32.mrf.mxu0  ;;  %5477 = vmatpush3.bf16.msra.mxu1 %v7386_v49 }
 0x59e   : > { %v2563_v61 = vshll.u32 %v7389_v58, 16  ;;  %v2561_v63 = vor.u32 %v2560_v57, %v2556_v60 }
 0x59f   : > { %v5465_v62 = vpop.f32.mrf.mxu0 }
 0x5a0   : > { %v2565_v0 = vrot.slane %v2563_v61, 1 }
 0x5a2   : > { %v7394_v1 = vsel %vm2429_vm4, %v2561_v63, %v2565_v0 }
 0x5c9   : > { %v5472_v3 = vpop.f32.mrf.mxu1 }
 0x5ca   : > { %v1778_v9 = vsel %vm1777_vm7, %v5472_v3, -inf }
 0x5cb   : > { %v1756_v4 = vpop.f32.mrf.mxu1 }
 0x5cc   : > { %v1771_v5 = vsel %vm1770_vm6, %v1756_v4, -inf }
 0x5cd   : > { %1772 = vmax.xlane.f32.xlu0 %v1771_v5  ;;  %v5473_v7 = vpop.f32.mrf.mxu1 }
 0x5cf   : > { %v1759_v8 = vpop.f32.mrf.mxu1 }
 0x5d0   : > { %v1774_v10 = vsel %vm1770_vm6, %v1759_v8, -inf }
 0x5d1   : > { %1779 = vmax.xlane.f32.xlu0 %v1778_v9  ;;  %1775 = vmax.xlane.f32.xlu1 %v1774_v10 }
 0x656   : > { %v1773_v11 = vpop.xlane.xlu0 %1772 }
 0x657   : > { %v1781_v12 = vsub.f32 %v1756_v4, %v1773_v11 }
 0x659   : > { %v1784_v18 = vmul.f32 1.442695, %v1781_v12 }
 0x65a   : > { %v1780_v13 = vpop.xlane.xlu0 %1779  ;;  %v1776_v15 = vpop.xlane.xlu1 %1775 }
 0x65b   : > { %v1783_v16 = vsub.f32 %v5472_v3, %v1780_v13  ;;  %v1782_v17 = vsub.f32 %v1759_v8, %v1776_v15 }
 0x65d   : > { %v1788_v20 = vmul.f32 1.442695, %v1783_v16  ;;  %v1786_v21 = vmul.f32 1.442695, %v1782_v17 }
 0x65f   : > { %5901 = vpow2.f32 %v1788_v20 }
 0x660   : > { %5903 = vpow2.f32 %v1786_v21 }
 0x661   : > { %5905 = vpow2.f32 %v1784_v18 }
 0x66c   : > { %v5902_v22 = vpop.eup %5901 }
 0x66d   : > { %v5904_v23 = vpop.eup %5903  ;;  %v1796_v24 = vsel %vm1777_vm7, %v5902_v22, 0.0 }
 0x66e   : > { %v5906_v25 = vpop.eup %5905  ;;  %1797 = vadd.xlane.f32.xlu1 %v1796_v24  ;;  %v1793_v26 = vsel %vm1770_vm6, %v5904_v23, 0.0 }
 0x66f   : > { %1794 = vadd.xlane.f32.xlu0 %v1793_v26  ;;  %v1790_v27 = vsel %vm1770_vm6, %v5906_v25, 0.0 }
 0x672   : > { %1791 = vadd.xlane.f32.xlu1 %v1790_v27 }
 0x683   : > { %1881 = vrot.lane.b32.xlu1 %v7351_v55, %s6615_s1 }
 0x685   : > { %1883 = vrot.lane.b32.xlu0 %v7347_v52, %s6615_s1 }
 0x687   : > { %2067 = vrot.lane.b32.xlu1 %v7347_v52, %s6616_s9 }
 0x689   : > { %1877 = vrot.lane.b32.xlu0 %v7361_v2, %s6615_s1 }
 0x68b   : > { %1875 = vrot.lane.b32.xlu1 %v7345_v45, %s6615_s1 }
 0x68d   : > { %2061 = vrot.lane.b32.xlu0 %v7345_v45, %s6616_s9 }
 0x68f   : > { %2065 = vrot.lane.b32.xlu1 %v7351_v55, %s6616_s9 }
 0x693   : > { %2063 = vrot.lane.b32.xlu1 %v7361_v2, %s6616_s9 }
 0x6f7   : > { %v1798_v28 = vpop.xlane.xlu1 %1797 }
 0x6f8   : > { %v1795_v29 = vpop.xlane.xlu0 %1794  ;;  %5907 = vrcp.f32 %v1798_v28 }
 0x6f9   : > { %5909 = vrcp.f32 %v1795_v29 }
 0x6fb   : > { %v1792_v31 = vpop.xlane.xlu1 %1791 }
 0x6fc   : > { %v1884_v33 = vpop.permute.xlu0 %1883  ;;  %5911 = vrcp.f32 %v1792_v31 }
 0x6fd   : > { %5624 = vmatprep.subr.msk.bf16.mxu0 %vm1709_vm3, %v1884_v33  ;;  %v1895_v34 = vsel %vm1709_vm3, %v1884_v33, 0 }
 0x6fe   : > { %5483 = vmatpush3.bf16.xpose.msra.mxu0 %v1895_v34 }
 0x6ff   : > { %v1882_v35 = vpop.permute.xlu1 %1881 }
 0x700   : > { %5625 = vmatprep.subr.msk.bf16.mxu0 %vm1709_vm3, %v1882_v35  ;;  %v1892_v37 = vsel %vm1709_vm3, %v1882_v35, 0  ;;  %v1878_v46 = vpop.permute.xlu0 %1877 }
 0x703   : > { %v2068_v36 = vpop.permute.xlu1 %2067 }
 0x704   : > { %5626 = vmatprep.subr.msk.bf16.mxu1 %vm1709_vm3, %v2068_v36  ;;  %v2062_v54 = vpop.permute.xlu0 %2061  ;;  %v2079_v56 = vsel %vm1709_vm3, %v2068_v36, 0 }
 0x705   : > { %v5908_v38 = vpop.eup %5907 }
 0x706   : > { %5485 = vmatpush3.bf16.xpose.msra.mxu0 %v1892_v37  ;;  %v5910_v41 = vpop.eup %5909  ;;  %v1804_v47 = vmul.f32 %v5908_v38, %v5902_v22 }
 0x707   : > { %v1876_v43 = vpop.permute.xlu1 %1875  ;;  %v1803_v50 = vmul.f32 %v5910_v41, %v5904_v23 }
 0x708   : > { %5486 = vmatprep.mubr.msk.bf16.mxu0 %vm1709_vm3, %v1876_v43  ;;  %v1806_v53 = vpack.c.bf16 %v1804_v47, %v1804_v47 }
 0x709   : > { %v5912_v44 = vpop.eup %5911 }
 0x70a   : > { %v1802_v48 = vmul.f32 %v5912_v44, %v5906_v25 }
 0x70b   : > { %v2066_v57 = vpop.permute.xlu1 %2065 }
 0x70c   : > { %v1805_v51 = vpack.c.bf16 %v1803_v50, %v1802_v48  ;;  %v2076_v59 = vsel %vm1709_vm3, %v2066_v57, 0 }
 0x70d   : > { %5487 = vmatmul.mubr.msk.bf16.vlgmr.msra.gmra.mxu0 %vm1709_vm3, %v1878_v46 }
 0x70e   : > { %5478 = vmatprep.mubr.msk.bf16.mxu1 %vm1770_vm6, %v1805_v51 }
 0x70f   : > { %5479 = vmatmul.mubr.msk.bf16.vlgmr.msra.gmra.mxu1 %vm1770_vm6, %v1806_v53  ;;  %v2064_v60 = vpop.permute.xlu1 %2063 }
 0x710   : > { %5499 = vmatpush3.bf16.xpose.msra.mxu1 %v2079_v56  ;;  %5502 = vmatprep.mubr.msk.bf16.mxu1 %vm1709_vm3, %v2062_v54 }
 0x711   : > { %5627 = vmatprep.subr.msk.bf16.mxu1 %vm1709_vm3, %v2066_v57 }
 0x718   : > { %5501 = vmatpush3.bf16.xpose.msra.mxu1 %v2076_v59 }
 0x71f   : > { %5503 = vmatmul.mubr.msk.bf16.vlgmr.msra.gmra.mxu1 %vm1709_vm3, %v2064_v60 }
 0x7cd   : > { %v5488_v61 = vpop.f32.mrf.mxu0 }
 0x7ce   : > { %v1951_v8 = vsel %vm1777_vm7, %v5488_v61, -inf }
 0x7cf   : > { %v1931_v62 = vpop.f32.mrf.mxu0  ;;  %v5480_v63 = vpop.f32.mrf.mxu1 }
 0x7d0   : > { %1872 = vst.msk [vmem:[#allocation3 + $0x10] sm:$0x1] %vm1871_vm8, %v5480_v63  ;;  %v1945_v0 = vsel %vm1770_vm6, %v1931_v62, -inf }
 0x7d1   : > { %1946 = vmax.xlane.f32.xlu0 %v1945_v0  ;;  %v5489_v3 = vpop.f32.mrf.mxu0  ;;  %v1855_v4 = vpop.f32.mrf.mxu1 }
 0x7d2   : > { %1869 = vst.msk [vmem:[#allocation3] sm:$0xff] %vm1709_vm3, %v1855_v4 }
 0x7d3   : > { %v1934_v5 = vpop.f32.mrf.mxu0  ;;  %v5481_v7 = vpop.f32.mrf.mxu1 }
 0x7d4   : > { %v1948_v9 = vsel %vm1770_vm6, %v1934_v5, -inf }
 0x7d5   : > { %1952 = vmax.xlane.f32.xlu0 %v1951_v8  ;;  %1949 = vmax.xlane.f32.xlu1 %v1948_v9  ;;  %v1858_v10 = vpop.f32.mrf.mxu1 }
 0x7d6   : > { %1870 = vst.msk [vmem:[#allocation3 + $0x8] sm:$0xff] %vm1709_vm3, %v1858_v10 }
 0x7df   : > { %v5504_v11 = vpop.f32.mrf.mxu1 }
 0x7e0   : > { %v2135_v12 = vsel %vm1777_vm7, %v5504_v11, -inf }
 0x7e1   : > { %v2115_v13 = vpop.f32.mrf.mxu1  ;;  %2136 = vmax.xlane.f32.xlu1 %v2135_v12 }
 0x7e2   : > { %v2129_v15 = vsel %vm1770_vm6, %v2115_v13, -inf }
 0x7e3   : > { %v5505_v16 = vpop.f32.mrf.mxu1  ;;  %2130 = vmax.xlane.f32.xlu0 %v2129_v15 }
 0x7e5   : > { %v2118_v17 = vpop.f32.mrf.mxu1 }
 0x7e6   : > { %v2132_v18 = vsel %vm1770_vm6, %v2118_v17, -inf }
 0x7e7   : > { %2133 = vmax.xlane.f32.xlu0 %v2132_v18 }
 0x85a   : > { %v1947_v20 = vpop.xlane.xlu0 %1946 }
 0x85b   : > { %v1954_v21 = vsub.f32 %v1931_v62, %v1947_v20 }
 0x85d   : > { %v1957_v22 = vmul.f32 1.442695, %v1954_v21 }
 0x85e   : > { %v1953_v23 = vpop.xlane.xlu0 %1952  ;;  %v1950_v24 = vpop.xlane.xlu1 %1949 }
 0x85f   : > { %5913 = vpow2.f32 %v1957_v22  ;;  %v1956_v25 = vsub.f32 %v5488_v61, %v1953_v23  ;;  %v1955_v26 = vsub.f32 %v1934_v5, %v1950_v24 }
 0x861   : > { %v1961_v27 = vmul.f32 1.442695, %v1956_v25  ;;  %v1959_v28 = vmul.f32 1.442695, %v1955_v26 }
 0x863   : > { %5915 = vpow2.f32 %v1961_v27 }
 0x864   : > { %5917 = vpow2.f32 %v1959_v28 }
 0x86a   : > { %v2137_v43 = vpop.xlane.xlu1 %2136 }
 0x86b   : > { %v2140_v46 = vsub.f32 %v5504_v11, %v2137_v43 }
 0x86c   : > { %v5914_v29 = vpop.eup %5913  ;;  %v2131_v37 = vpop.xlane.xlu0 %2130 }
 0x86d   : > { %v1963_v31 = vsel %vm1770_vm6, %v5914_v29, 0.0  ;;  %v2145_v47 = vmul.f32 1.442695, %v2140_v46  ;;  %v2138_v48 = vsub.f32 %v2115_v13, %v2131_v37 }
 0x86e   : > { %1964 = vadd.xlane.f32.xlu0 %v1963_v31 }
 0x86f   : > { %v2141_v50 = vmul.f32 1.442695, %v2138_v48 }
 0x870   : > { %v5916_v33 = vpop.eup %5915  ;;  %v2134_v38 = vpop.xlane.xlu0 %2133 }
 0x871   : > { %v5918_v34 = vpop.eup %5917  ;;  %v1969_v35 = vsel %vm1777_vm7, %v5916_v33, 0.0  ;;  %v2139_v41 = vsub.f32 %v2118_v17, %v2134_v38 }
 0x872   : > { %1970 = vadd.xlane.f32.xlu0 %v1969_v35  ;;  %v1966_v36 = vsel %vm1770_vm6, %v5918_v34, 0.0 }
 0x873   : > { %1967 = vadd.xlane.f32.xlu1 %v1966_v36  ;;  %v2143_v44 = vmul.f32 1.442695, %v2139_v41 }
 0x875   : > { %5919 = vpow2.f32 %v2143_v44 }
 0x876   : > { %5921 = vpow2.f32 %v2145_v47 }
 0x877   : > { %5923 = vpow2.f32 %v2141_v50 }
 0x882   : > { %v5920_v51 = vpop.eup %5919 }
 0x883   : > { %v2150_v53 = vsel %vm1770_vm6, %v5920_v51, 0.0  ;;  %v5922_v54 = vpop.eup %5921 }
 0x884   : > { %1982 = vrot.lane.b32.xlu1 %v7386_v49, %s6615_s1  ;;  %v2153_v56 = vsel %vm1777_vm7, %v5922_v54, 0.0  ;;  %v5924_v57 = vpop.eup %5923 }
 0x885   : > { %v2147_v59 = vsel %vm1770_vm6, %v5924_v57, 0.0 }
 0x888   : > { %2166 = vrot.lane.b32.xlu1 %v7382_v42, %s6616_s9  ;;  %1984 = vrot.lane.b32.xlu0 %v7382_v42, %s6615_s1 }
 0x8a7   : > { %2151 = vadd.xlane.f32.xlu0 %v2150_v53 }
 0x8ac   : > { %2154 = vadd.xlane.f32.xlu1 %v2153_v56 }
 0x8b0   : > { %2148 = vadd.xlane.f32.xlu1 %v2147_v59 }
 0x8bd   : > { %2249 = vrot.lane.b32.xlu0 %v7347_v52, %s6617_s23 }
 0x8c1   : > { %2164 = vrot.lane.b32.xlu1 %v7386_v49, %s6616_s9  ;;  %2243 = vrot.lane.b32.xlu0 %v7345_v45, %s6617_s23 }
 0x8c5   : > { %2247 = vrot.lane.b32.xlu1 %v7351_v55, %s6617_s23 }
 0x8c9   : > { %2245 = vrot.lane.b32.xlu1 %v7361_v2, %s6617_s23 }
 0x8f7   : > { %v1965_v60 = vpop.xlane.xlu0 %1964 }
 0x8f8   : > { %5925 = vrcp.f32 %v1965_v60 }
 0x8fb   : > { %v1971_v61 = vpop.xlane.xlu0 %1970 }
 0x8fc   : > { %5927 = vrcp.f32 %v1971_v61  ;;  %v1968_v62 = vpop.xlane.xlu1 %1967 }
 0x8fd   : > { %5929 = vrcp.f32 %v1968_v62 }
 0x8ff   : > { %v1985_v63 = vpop.permute.xlu0 %1984 }
 0x900   : > { %v1994_v52 = vand.u32 %v1985_v63, %v7380_v40  ;;  %v1983_v0 = vpop.permute.xlu1 %1982 }
 0x902   : > { %5490 = vmatprep.subr.bf16.mxu0 %v1994_v52 }
 0x903   : > { %5491 = vmatpush3.bf16.msra.mxu0 %v1994_v52 }
 0x904   : > { %v2167_v3 = vpop.permute.xlu1 %2166  ;;  %5492 = vmatprep.subr.bf16.mxu0 %v1983_v0 }
 0x905   : > { %v2176_v45 = vand.u32 %v2167_v3, %v7380_v40  ;;  %v5926_v55 = vpop.eup %5925 }
 0x906   : > { %v1975_v7 = vmul.f32 %v5926_v55, %v5914_v29  ;;  %v7474_v29 = vshrl.u32 %v7389_v58, 16 }
 0x907   : > { %5493 = vmatpush3.bf16.msra.mxu0 %v1983_v0 }
 0x908   : > { %5506 = vmatprep.subr.bf16.mxu0 %v2176_v45 }
 0x909   : > { %v5928_v2 = vpop.eup %5927 }
 0x90a   : > { %v5930_v4 = vpop.eup %5929  ;;  %v1977_v5 = vmul.f32 %v5928_v2, %v5916_v33  ;;  %v2577_v33 = vand.u32 %v7474_v29, %v7380_v40 }
 0x90b   : > { %v1976_v8 = vmul.f32 %v5930_v4, %v5918_v34 }
 0x90c   : > { %v1979_v9 = vpack.c.bf16 %v1977_v5, %v1977_v5 }
 0x90d   : > { %v1978_v10 = vpack.c.bf16 %v1976_v8, %v1975_v7 }
 0x90f   : > { %5494 = vmatprep.mubr.msk.bf16.mxu0 %vm1770_vm6, %v1978_v10 }
 0x910   : > { %5495 = vmatmul.mubr.msk.bf16.vlgmr.msra.gmra.mxu0 %vm1770_vm6, %v1979_v9 }
 0x911   : > { %5507 = vmatpush3.bf16.msra.mxu0 %v2176_v45 }
 0x930   : > { %v2152_v11 = vpop.xlane.xlu0 %2151 }
 0x934   : > { %v2250_v16 = vpop.permute.xlu0 %2249 }
 0x935   : > { %v2155_v12 = vpop.xlane.xlu1 %2154  ;;  %v2261_v26 = vsel %vm1709_vm3, %v2250_v16, 0 }
 0x936   : > { %5931 = vrcp.f32 %v2155_v12 }
 0x937   : > { %5933 = vrcp.f32 %v2152_v11 }
 0x938   : > { %v2244_v27 = vpop.permute.xlu0 %2243 }
 0x939   : > { %v2149_v13 = vpop.xlane.xlu1 %2148 }
 0x93a   : > { %5935 = vrcp.f32 %v2149_v13  ;;  %v7506_v13 = vshrl.u32 %v7365_v14, 16 }
 0x93c   : > { %v2468_v14 = vsel %vm1709_vm3, %v7506_v13, 0 }
 0x93d   : > { %v2165_v15 = vpop.permute.xlu1 %2164 }
 0x93e   : > { %5508 = vmatprep.subr.bf16.mxu0 %v2165_v15 }
 0x93f   : > { %5509 = vmatpush3.bf16.msra.mxu0 %v2165_v15 }
 0x940   : > { %5628 = vmatprep.subr.msk.bf16.mxu0 %vm1709_vm3, %v2250_v16 }
 0x941   : > { %v2248_v28 = vpop.permute.xlu1 %2247 }
 0x942   : > { %v2258_v31 = vsel %vm1709_vm3, %v2248_v28, 0 }
 0x943   : > { %v5932_v17 = vpop.eup %5931 }
 0x944   : > { %v5934_v18 = vpop.eup %5933  ;;  %v2161_v21 = vmul.f32 %v5932_v17, %v5922_v54 }
 0x945   : > { %v2160_v23 = vmul.f32 %v5934_v18, %v5920_v51  ;;  %v2246_v34 = vpop.permute.xlu1 %2245 }
 0x946   : > { %v2163_v25 = vpack.c.bf16 %v2161_v21, %v2161_v21 }
 0x947   : > { %v5936_v20 = vpop.eup %5935 }
 0x948   : > { %v2159_v22 = vmul.f32 %v5936_v20, %v5924_v57 }
 0x94a   : > { %v2162_v24 = vpack.c.bf16 %v2160_v23, %v2159_v22  ;;  %v2465_v22 = vsel %vm1709_vm3, %v7372_v30, 0  ;;  %v7521_v23 = vshrl.u32 %v7367_v19, 16 }
 0x94c   : > { %5510 = vmatprep.mubr.msk.bf16.mxu0 %vm1770_vm6, %v2162_v24 }
 0x94d   : > { %5511 = vmatmul.mubr.msk.bf16.vlgmr.msra.gmra.mxu0 %vm1770_vm6, %v2163_v25 }
 0x94e   : > { %5515 = vmatpush3.bf16.xpose.msra.mxu0 %v2261_v26  ;;  %5518 = vmatprep.mubr.msk.bf16.mxu0 %vm1709_vm3, %v2244_v27 }
 0x94f   : > { %5629 = vmatprep.subr.msk.bf16.mxu0 %vm1709_vm3, %v2248_v28 }
 0x956   : > { %5517 = vmatpush3.bf16.xpose.msra.mxu0 %v2258_v31 }
 0x957   : > { %5538 = vmatprep.subr.bf16.mxu0 %v2577_v33 }
 0x95d   : > { %5519 = vmatmul.mubr.msk.bf16.vlgmr.msra.gmra.mxu0 %vm1709_vm3, %v2246_v34 }
 0x95e   : > { %5539 = vmatpush3.bf16.msra.mxu0 %v2577_v33 }
 0x95f   : > { %5540 = vmatprep.subr.bf16.mxu0 %v7394_v1 }
 0x962   : > { %5541 = vmatpush3.bf16.msra.mxu0 %v7394_v1 }
 0x9d0   : > { %v7482_v35 = vpop.f32.mrf.mxu0 }
 0x9d2   : > { %v7484_v36 = vpop.f32.mrf.mxu0 }
 0x9d4   : > { %v5497_v58 = vpop.f32.mrf.mxu0 }
 0x9d6   : > { %v7486_v37 = vpop.f32.mrf.mxu0 }
 0xa0d   : > { %v7488_v38 = vpop.f32.mrf.mxu0 }
 0xa0f   : > { %v7490_v41 = vpop.f32.mrf.mxu0 }
 0xa11   : > { %v5513_v43 = vpop.f32.mrf.mxu0 }
 0xa13   : > { %v7492_v44 = vpop.f32.mrf.mxu0 }
 0xa1d   : > { %v5520_v46 = vpop.f32.mrf.mxu0 }
 0xa1e   : > { %v2317_v53 = vsel %vm1777_vm7, %v5520_v46, -inf }
 0xa1f   : > { %v2297_v47 = vpop.f32.mrf.mxu0 }
 0xa20   : > { %v2311_v48 = vsel %vm1770_vm6, %v2297_v47, -inf }
 0xa21   : > { %2312 = vmax.xlane.f32.xlu0 %v2311_v48  ;;  %v5521_v50 = vpop.f32.mrf.mxu0 }
 0xa23   : > { %v2300_v51 = vpop.f32.mrf.mxu0 }
 0xa24   : > { %v2314_v54 = vsel %vm1770_vm6, %v2300_v51, -inf }
 0xa25   : > { %2318 = vmax.xlane.f32.xlu0 %v2317_v53  ;;  %2315 = vmax.xlane.f32.xlu1 %v2314_v54 }
 0xaaa   : > { %v2313_v56 = vpop.xlane.xlu0 %2312 }
 0xaab   : > { %v2320_v57 = vsub.f32 %v2297_v47, %v2313_v56 }
 0xaad   : > { %v2323_v59 = vmul.f32 1.442695, %v2320_v57 }
 0xaae   : > { %v2319_v60 = vpop.xlane.xlu0 %2318  ;;  %v2316_v61 = vpop.xlane.xlu1 %2315 }
 0xaaf   : > { %5937 = vpow2.f32 %v2323_v59  ;;  %v2322_v62 = vsub.f32 %v5520_v46, %v2319_v60  ;;  %v2321_v63 = vsub.f32 %v2300_v51, %v2316_v61 }
 0xab1   : > { %v2327_v52 = vmul.f32 1.442695, %v2322_v62  ;;  %v2325_v0 = vmul.f32 1.442695, %v2321_v63 }
 0xab3   : > { %5939 = vpow2.f32 %v2327_v52 }
 0xab4   : > { %5941 = vpow2.f32 %v2325_v0 }
 0xabc   : > { %v5938_v3 = vpop.eup %5937 }
 0xabd   : > { %v2329_v45 = vsel %vm1770_vm6, %v5938_v3, 0.0 }
 0xabe   : > { %2330 = vadd.xlane.f32.xlu0 %v2329_v45 }
 0xac0   : > { %v5940_v55 = vpop.eup %5939 }
 0xac1   : > { %v5942_v2 = vpop.eup %5941  ;;  %v2335_v4 = vsel %vm1777_vm7, %v5940_v55, 0.0 }
 0xac2   : > { %2336 = vadd.xlane.f32.xlu1 %v2335_v4  ;;  %v2332_v5 = vsel %vm1770_vm6, %v5942_v2, 0.0 }
 0xac3   : > { %2333 = vadd.xlane.f32.xlu0 %v2332_v5 }
 0xad3   : > { %2346 = vrot.lane.b32.xlu1 %v7386_v49, %s6617_s23 }
 0xad9   : > { %2348 = vrot.lane.b32.xlu0 %v7382_v42, %s6617_s23 }
 0xb47   : > { %v2331_v7 = vpop.xlane.xlu0 %2330 }
 0xb48   : > { %5943 = vrcp.f32 %v2331_v7 }
 0xb4b   : > { %v2337_v8 = vpop.xlane.xlu1 %2336 }
 0xb4c   : > { %v2334_v9 = vpop.xlane.xlu0 %2333  ;;  %5945 = vrcp.f32 %v2337_v8 }
 0xb4d   : > { %5947 = vrcp.f32 %v2334_v9 }
 0xb4f   : > { %v2347_v12 = vpop.permute.xlu1 %2346 }
 0xb50   : > { %v2349_v10 = vpop.permute.xlu0 %2348 }
 0xb51   : > { %v2358_v11 = vand.u32 %v2349_v10, %v7380_v40 }
 0xb53   : > { %5522 = vmatprep.subr.bf16.mxu1 %v2358_v11 }
 0xb54   : > { %5523 = vmatpush3.bf16.msra.mxu1 %v2358_v11 }
 0xb55   : > { %5524 = vmatprep.subr.bf16.mxu1 %v2347_v12  ;;  %v5944_v49 = vpop.eup %5943 }
 0xb56   : > { %v2341_v17 = vmul.f32 %v5944_v49, %v5938_v3 }
 0xb58   : > { %5525 = vmatpush3.bf16.msra.mxu1 %v2347_v12 }
 0xb59   : > { %v5946_v15 = vpop.eup %5945  ;;  %5630 = vmatprep.subr.msk.bf16.mxu1 %vm1709_vm3, %v7506_v13 }
 0xb5a   : > { %v5948_v42 = vpop.eup %5947  ;;  %v2343_v16 = vmul.f32 %v5946_v15, %v5940_v55 }
 0xb5b   : > { %v2342_v18 = vmul.f32 %v5948_v42, %v5942_v2 }
 0xb5c   : > { %v2345_v20 = vpack.c.bf16 %v2343_v16, %v2343_v16 }
 0xb5d   : > { %v2344_v21 = vpack.c.bf16 %v2342_v18, %v2341_v17 }
 0xb5f   : > { %5526 = vmatprep.mubr.msk.bf16.mxu1 %vm1770_vm6, %v2344_v21 }
 0xb60   : > { %5527 = vmatmul.mubr.msk.bf16.vlgmr.msra.gmra.mxu1 %vm1770_vm6, %v2345_v20 }
 0xb61   : > { %5531 = vmatpush3.bf16.xpose.msra.mxu1 %v2468_v14  ;;  %5534 = vmatprep.mubr.msk.bf16.mxu1 %vm1709_vm3, %v7375_v32 }
 0xb62   : > { %5631 = vmatprep.subr.msk.bf16.mxu1 %vm1709_vm3, %v7372_v30 }
 0xb69   : > { %5533 = vmatpush3.bf16.xpose.msra.mxu1 %v2465_v22 }
 0xb70   : > { %5535 = vmatmul.mubr.msk.bf16.vlgmr.msra.gmra.mxu1 %vm1709_vm3, %v7521_v23 }
 0xc20   : > { %v7525_v24 = vpop.f32.mrf.mxu1 }
 0xc22   : > { %v7527_v25 = vpop.f32.mrf.mxu1 }
 0xc24   : > { %v5529_v26 = vpop.f32.mrf.mxu1 }
 0xc26   : > { %v7529_v27 = vpop.f32.mrf.mxu1 }
 0xc30   : > { %v5536_v28 = vpop.f32.mrf.mxu1 }
 0xc31   : > { %v2524_v43 = vsel %vm1777_vm7, %v5536_v28, -inf }
 0xc32   : > { %v2504_v31 = vpop.f32.mrf.mxu1 }
 0xc33   : > { %v2518_v33 = vsel %vm1770_vm6, %v2504_v31, -inf }
 0xc34   : > { %2519 = vmax.xlane.f32.xlu1 %v2518_v33  ;;  %v5537_v34 = vpop.f32.mrf.mxu1 }
 0xc36   : > { %v2507_v58 = vpop.f32.mrf.mxu1 }
 0xc37   : > { %v2521_v19 = vsel %vm1770_vm6, %v2507_v58, -inf }
 0xc38   : > { %2522 = vmax.xlane.f32.xlu0 %v2521_v19 }
 0xc3c   : > { %2525 = vmax.xlane.f32.xlu0 %v2524_v43 }
 0xcbd   : > { %v2520_v46 = vpop.xlane.xlu1 %2519 }
 0xcbe   : > { %v2527_v47 = vsub.f32 %v2504_v31, %v2520_v46 }
 0xcc0   : > { %v2530_v48 = vmul.f32 1.442695, %v2527_v47 }
 0xcc1   : > { %v2523_v50 = vpop.xlane.xlu0 %2522 }
 0xcc2   : > { %5949 = vpow2.f32 %v2530_v48  ;;  %v2528_v51 = vsub.f32 %v2507_v58, %v2523_v50 }
 0xcc4   : > { %v2532_v53 = vmul.f32 1.442695, %v2528_v51 }
 0xcc5   : > { %v2526_v54 = vpop.xlane.xlu0 %2525 }
 0xcc6   : > { %5951 = vpow2.f32 %v2532_v53  ;;  %v2529_v56 = vsub.f32 %v5536_v28, %v2526_v54 }
 0xcc8   : > { %v2534_v57 = vmul.f32 1.442695, %v2529_v56 }
 0xcca   : > { %5953 = vpow2.f32 %v2534_v57 }
 0xccf   : > { %v5950_v59 = vpop.eup %5949 }
 0xcd0   : > { %v2536_v60 = vsel %vm1770_vm6, %v5950_v59, 0.0 }
 0xcd1   : > { %2537 = vadd.xlane.f32.xlu1 %v2536_v60 }
 0xcd3   : > { %v5952_v61 = vpop.eup %5951 }
 0xcd4   : > { %v2539_v62 = vsel %vm1770_vm6, %v5952_v61, 0.0 }
 0xcd5   : > { %2540 = vadd.xlane.f32.xlu0 %v2539_v62 }
 0xcd7   : > { %v5954_v63 = vpop.eup %5953 }
 0xcd8   : > { %v2542_v52 = vsel %vm1777_vm7, %v5954_v63, 0.0 }
 0xcd9   : > { %2543 = vadd.xlane.f32.xlu1 %v2542_v52 }
 0xcea   : > { %2634 = vrot.lane.b32.xlu1 %v7372_v30, %s6615_s1 }
 0xceb   : > { %2636 = vrot.lane.b32.xlu0 %v7506_v13, %s6615_s1 }
 0xcee   : > { %2630 = vrot.lane.b32.xlu1 %v7375_v32, %s6615_s1 }
 0xcf2   : > { %2632 = vrot.lane.b32.xlu1 %v7521_v23, %s6615_s1 }
 0xd5a   : > { %v2538_v0 = vpop.xlane.xlu1 %2537 }
 0xd5b   : > { %5955 = vrcp.f32 %v2538_v0 }
 0xd5e   : > { %v2541_v3 = vpop.xlane.xlu0 %2540 }
 0xd5f   : > { %5957 = vrcp.f32 %v2541_v3 }
 0xd62   : > { %v2544_v45 = vpop.xlane.xlu1 %2543  ;;  %v2637_v55 = vpop.permute.xlu0 %2636 }
 0xd63   : > { %5959 = vrcp.f32 %v2544_v45  ;;  %5632 = vmatprep.subr.msk.bf16.mxu0 %vm1709_vm3, %v2637_v55  ;;  %v2648_v49 = vsel %vm1709_vm3, %v2637_v55, 0 }
 0xd66   : > { %v2635_v8 = vpop.permute.xlu1 %2634 }
 0xd67   : > { %v2645_v42 = vsel %vm1709_vm3, %v2635_v8, 0 }
 0xd68   : > { %v5956_v2 = vpop.eup %5955 }
 0xd69   : > { %v2548_v5 = vmul.f32 %v5956_v2, %v5950_v59 }
 0xd6a   : > { %v2631_v15 = vpop.permute.xlu1 %2630 }
 0xd6c   : > { %v5958_v4 = vpop.eup %5957 }
 0xd6d   : > { %v2549_v7 = vmul.f32 %v5958_v4, %v5952_v61 }
 0xd6e   : > { %v2633_v16 = vpop.permute.xlu1 %2632 }
 0xd6f   : > { %v2551_v9 = vpack.c.bf16 %v2549_v7, %v2548_v5 }
 0xd70   : > { %v5960_v10 = vpop.eup %5959 }
 0xd71   : > { %5542 = vmatprep.mubr.msk.bf16.mxu0 %vm1770_vm6, %v2551_v9  ;;  %v2550_v11 = vmul.f32 %v5960_v10, %v5954_v63 }
 0xd73   : > { %v2552_v12 = vpack.c.bf16 %v2550_v11, %v2550_v11 }
 0xd75   : > { %5543 = vmatmul.mubr.msk.bf16.vlgmr.msra.gmra.mxu0 %vm1770_vm6, %v2552_v12 }
 0xd76   : > { %5547 = vmatpush3.bf16.xpose.msra.mxu0 %v2648_v49  ;;  %5550 = vmatprep.mubr.msk.bf16.mxu0 %vm1709_vm3, %v2631_v15 }
 0xd77   : > { %5633 = vmatprep.subr.msk.bf16.mxu0 %vm1709_vm3, %v2635_v8 }
 0xd7e   : > { %5549 = vmatpush3.bf16.xpose.msra.mxu0 %v2645_v42 }
 0xd85   : > { %5551 = vmatmul.mubr.msk.bf16.vlgmr.msra.gmra.mxu0 %vm1709_vm3, %v2633_v16 }
 0xe35   : > { %v5544_v17 = vpop.f32.mrf.mxu0 }
 0xe36   : > { %2629 = vst.msk [vmem:[#allocation3 + $0x21] sm:$0x1] %vm1871_vm8, %v5544_v17 }
 0xe37   : > { %v2613_v18 = vpop.f32.mrf.mxu0 }
 0xe38   : > { %2627 = vst.msk [vmem:[#allocation3 + $0x11] sm:$0xff] %vm1709_vm3, %v2613_v18 }
 0xe39   : > { %v5545_v20 = vpop.f32.mrf.mxu0 }
 0xe3b   : > { %v2616_v21 = vpop.f32.mrf.mxu0 }
 0xe3c   : > { %2628 = vst.msk [vmem:[#allocation3 + $0x19] sm:$0xff] %vm1709_vm3, %v2616_v21 }
 0xe45   : > { %v5552_v14 = vpop.f32.mrf.mxu0 }
 0xe46   : > { %v2704_v33 = vsel %vm1777_vm7, %v5552_v14, -inf }
 0xe47   : > { %v2684_v22 = vpop.f32.mrf.mxu0 }
 0xe48   : > { %v2698_v26 = vsel %vm1770_vm6, %v2684_v22, -inf }
 0xe49   : > { %2699 = vmax.xlane.f32.xlu0 %v2698_v26  ;;  %v5553_v28 = vpop.f32.mrf.mxu0 }
 0xe4b   : > { %v2687_v31 = vpop.f32.mrf.mxu0 }
 0xe4c   : > { %v2701_v34 = vsel %vm1770_vm6, %v2687_v31, -inf }
 0xe4d   : > { %2705 = vmax.xlane.f32.xlu0 %v2704_v33  ;;  %2702 = vmax.xlane.f32.xlu1 %v2701_v34 }
 0xed2   : > { %v2700_v58 = vpop.xlane.xlu0 %2699 }
 0xed3   : > { %v2707_v19 = vsub.f32 %v2684_v22, %v2700_v58 }
 0xed5   : > { %v2710_v43 = vmul.f32 1.442695, %v2707_v19 }
 0xed6   : > { %v2706_v46 = vpop.xlane.xlu0 %2705  ;;  %v2703_v47 = vpop.xlane.xlu1 %2702 }
 0xed7   : > { %5961 = vpow2.f32 %v2710_v43  ;;  %v2709_v48 = vsub.f32 %v5552_v14, %v2706_v46  ;;  %v2708_v50 = vsub.f32 %v2687_v31, %v2703_v47 }
 0xed9   : > { %v2714_v51 = vmul.f32 1.442695, %v2709_v48  ;;  %v2712_v53 = vmul.f32 1.442695, %v2708_v50 }
 0xedb   : > { %5963 = vpow2.f32 %v2714_v51 }
 0xedc   : > { %5965 = vpow2.f32 %v2712_v53 }
 0xee4   : > { %v5962_v54 = vpop.eup %5961 }
 0xee5   : > { %v2716_v56 = vsel %vm1770_vm6, %v5962_v54, 0.0 }
 0xee6   : > { %2717 = vadd.xlane.f32.xlu0 %v2716_v56 }
 0xee8   : > { %v5964_v57 = vpop.eup %5963 }
 0xee9   : > { %v5966_v59 = vpop.eup %5965  ;;  %v2722_v60 = vsel %vm1777_vm7, %v5964_v57, 0.0 }
 0xeea   : > { %2723 = vadd.xlane.f32.xlu1 %v2722_v60  ;;  %v2719_v61 = vsel %vm1770_vm6, %v5966_v59, 0.0 }
 0xeeb   : > { %2720 = vadd.xlane.f32.xlu0 %v2719_v61 }
 0xefb   : > { %2733 = vrot.lane.b32.xlu1 %v7394_v1, %s6615_s1 }
 0xeff   : > { %2816 = vrot.lane.b32.xlu1 %v7506_v13, %s6616_s9 }
 0xf01   : > { %2735 = vrot.lane.b32.xlu0 %v7474_v29, %s6615_s1 }
 0xf03   : > { %2814 = vrot.lane.b32.xlu1 %v7372_v30, %s6616_s9 }
 0xf05   : > { %2810 = vrot.lane.b32.xlu0 %v7375_v32, %s6616_s9 }
 0xf07   : > { %2812 = vrot.lane.b32.xlu1 %v7521_v23, %s6616_s9 }
 0xf6f   : > { %v2718_v62 = vpop.xlane.xlu0 %2717 }
 0xf70   : > { %5967 = vrcp.f32 %v2718_v62 }
 0xf73   : > { %v2724_v63 = vpop.xlane.xlu1 %2723 }
 0xf74   : > { %v2721_v52 = vpop.xlane.xlu0 %2720  ;;  %5969 = vrcp.f32 %v2724_v63 }
 0xf75   : > { %5971 = vrcp.f32 %v2721_v52 }
 0xf77   : > { %v2734_v45 = vpop.permute.xlu1 %2733 }
 0xf78   : > { %v2736_v0 = vpop.permute.xlu0 %2735 }
 0xf79   : > { %v2745_v3 = vand.u32 %v2736_v0, %v7380_v40 }
 0xf7b   : > { %5554 = vmatprep.subr.bf16.mxu1 %v2745_v3  ;;  %v2817_v2 = vpop.permute.xlu1 %2816 }
 0xf7c   : > { %5555 = vmatpush3.bf16.msra.mxu1 %v2745_v3  ;;  %v2811_v12 = vpop.permute.xlu0 %2810  ;;  %v2828_v49 = vsel %vm1709_vm3, %v2817_v2, 0 }
 0xf7d   : > { %5556 = vmatprep.subr.bf16.mxu1 %v2734_v45  ;;  %v5968_v55 = vpop.eup %5967 }
 0xf7e   : > { %v2728_v8 = vmul.f32 %v5968_v55, %v5962_v54 }
 0xf7f   : > { %v2815_v15 = vpop.permute.xlu1 %2814 }
 0xf80   : > { %5557 = vmatpush3.bf16.msra.mxu1 %v2734_v45  ;;  %v2825_v42 = vsel %vm1709_vm3, %v2815_v15, 0 }
 0xf81   : > { %v5970_v4 = vpop.eup %5969  ;;  %5634 = vmatprep.subr.msk.bf16.mxu1 %vm1709_vm3, %v2817_v2 }
 0xf82   : > { %v5972_v5 = vpop.eup %5971  ;;  %v2730_v7 = vmul.f32 %v5970_v4, %v5964_v57 }
 0xf83   : > { %v2729_v9 = vmul.f32 %v5972_v5, %v5966_v59  ;;  %v2813_v16 = vpop.permute.xlu1 %2812 }
 0xf84   : > { %v2732_v10 = vpack.c.bf16 %v2730_v7, %v2730_v7 }
 0xf85   : > { %v2731_v11 = vpack.c.bf16 %v2729_v9, %v2728_v8 }
 0xf87   : > { %5558 = vmatprep.mubr.msk.bf16.mxu1 %vm1770_vm6, %v2731_v11 }
 0xf88   : > { %5559 = vmatmul.mubr.msk.bf16.vlgmr.msra.gmra.mxu1 %vm1770_vm6, %v2732_v10 }
 0xf89   : > { %5563 = vmatpush3.bf16.xpose.msra.mxu1 %v2828_v49  ;;  %5566 = vmatprep.mubr.msk.bf16.mxu1 %vm1709_vm3, %v2811_v12 }
 0xf8a   : > { %5635 = vmatprep.subr.msk.bf16.mxu1 %vm1709_vm3, %v2815_v15 }
 0xf91   : > { %5565 = vmatpush3.bf16.xpose.msra.mxu1 %v2825_v42 }
 0xf98   : > { %5567 = vmatmul.mubr.msk.bf16.vlgmr.msra.gmra.mxu1 %vm1709_vm3, %v2813_v16 }
0x1048   : > { %v7583_v17 = vpop.f32.mrf.mxu1 }
0x104a   : > { %v7585_v18 = vpop.f32.mrf.mxu1 }
0x104c   : > { %v5561_v20 = vpop.f32.mrf.mxu1 }
0x104e   : > { %v7587_v21 = vpop.f32.mrf.mxu1 }
0x1058   : > { %v5568_v14 = vpop.f32.mrf.mxu1 }
0x1059   : > { %v2884_v33 = vsel %vm1777_vm7, %v5568_v14, -inf }
0x105a   : > { %v2864_v22 = vpop.f32.mrf.mxu1 }
0x105b   : > { %v2878_v26 = vsel %vm1770_vm6, %v2864_v22, -inf }
0x105c   : > { %2879 = vmax.xlane.f32.xlu0 %v2878_v26  ;;  %v5569_v28 = vpop.f32.mrf.mxu1 }
0x105e   : > { %v2867_v31 = vpop.f32.mrf.mxu1 }
0x105f   : > { %v2881_v34 = vsel %vm1770_vm6, %v2867_v31, -inf }
0x1060   : > { %2885 = vmax.xlane.f32.xlu0 %v2884_v33  ;;  %2882 = vmax.xlane.f32.xlu1 %v2881_v34 }
0x10e5   : > { %v2880_v58 = vpop.xlane.xlu0 %2879 }
0x10e6   : > { %v2887_v19 = vsub.f32 %v2864_v22, %v2880_v58 }
0x10e8   : > { %v2890_v43 = vmul.f32 1.442695, %v2887_v19 }
0x10e9   : > { %v2886_v46 = vpop.xlane.xlu0 %2885  ;;  %v2883_v47 = vpop.xlane.xlu1 %2882 }
0x10ea   : > { %5973 = vpow2.f32 %v2890_v43  ;;  %v2889_v48 = vsub.f32 %v5568_v14, %v2886_v46  ;;  %v2888_v50 = vsub.f32 %v2867_v31, %v2883_v47 }
0x10ec   : > { %v2894_v51 = vmul.f32 1.442695, %v2889_v48  ;;  %v2892_v53 = vmul.f32 1.442695, %v2888_v50 }
0x10ee   : > { %5975 = vpow2.f32 %v2894_v51 }
0x10ef   : > { %5977 = vpow2.f32 %v2892_v53 }
0x10f7   : > { %v5974_v54 = vpop.eup %5973 }
0x10f8   : > { %v2896_v56 = vsel %vm1770_vm6, %v5974_v54, 0.0 }
0x10f9   : > { %2897 = vadd.xlane.f32.xlu0 %v2896_v56 }
0x10fb   : > { %v5976_v57 = vpop.eup %5975 }
0x10fc   : > { %v5978_v59 = vpop.eup %5977  ;;  %v2902_v60 = vsel %vm1777_vm7, %v5976_v57, 0.0 }
0x10fd   : > { %2903 = vadd.xlane.f32.xlu1 %v2902_v60  ;;  %v2899_v61 = vsel %vm1770_vm6, %v5978_v59, 0.0 }
0x10fe   : > { %2900 = vadd.xlane.f32.xlu0 %v2899_v61 }
0x110e   : > { %2913 = vrot.lane.b32.xlu1 %v7394_v1, %s6616_s9 }
0x1112   : > { %2996 = vrot.lane.b32.xlu1 %v7506_v13, %s6617_s23 }
0x1114   : > { %2915 = vrot.lane.b32.xlu0 %v7474_v29, %s6616_s9 }
0x1116   : > { %2994 = vrot.lane.b32.xlu1 %v7372_v30, %s6617_s23 }
0x1118   : > { %2990 = vrot.lane.b32.xlu0 %v7375_v32, %s6617_s23 }
0x111a   : > { %2992 = vrot.lane.b32.xlu1 %v7521_v23, %s6617_s23 }
0x1182   : > { %v2898_v62 = vpop.xlane.xlu0 %2897 }
0x1183   : > { %5979 = vrcp.f32 %v2898_v62 }
0x1186   : > { %v2904_v63 = vpop.xlane.xlu1 %2903 }
0x1187   : > { %v2901_v52 = vpop.xlane.xlu0 %2900  ;;  %5981 = vrcp.f32 %v2904_v63 }
0x1188   : > { %5983 = vrcp.f32 %v2901_v52 }
0x118a   : > { %v2914_v3 = vpop.permute.xlu1 %2913 }
0x118b   : > { %v2916_v0 = vpop.permute.xlu0 %2915 }
0x118c   : > { %v2925_v13 = vand.u32 %v2916_v0, %v7380_v40 }
0x118e   : > { %5570 = vmatprep.subr.bf16.mxu0 %v2925_v13  ;;  %v2997_v45 = vpop.permute.xlu1 %2996 }
0x118f   : > { %5571 = vmatpush3.bf16.msra.mxu0 %v2925_v13  ;;  %v2991_v8 = vpop.permute.xlu0 %2990  ;;  %v3008_v9 = vsel %vm1709_vm3, %v2997_v45, 0 }
0x1190   : > { %5572 = vmatprep.subr.bf16.mxu0 %v2914_v3  ;;  %v5980_v30 = vpop.eup %5979 }
0x1191   : > { %v2908_v2 = vmul.f32 %v5980_v30, %v5974_v54 }
0x1192   : > { %v2995_v10 = vpop.permute.xlu1 %2994 }
0x1193   : > { %5573 = vmatpush3.bf16.msra.mxu0 %v2914_v3  ;;  %v3005_v11 = vsel %vm1709_vm3, %v2995_v10, 0  ;;  %v5803_v3 = vld [vmem:[%s7145_s19 + $0x38] sm:$0xff]  }
0x1194   : > { %v5982_v32 = vpop.eup %5981  ;;  %5636 = vmatprep.subr.msk.bf16.mxu0 %vm1709_vm3, %v2997_v45 }
0x1195   : > { %v5984_v23 = vpop.eup %5983  ;;  %v2910_v55 = vmul.f32 %v5982_v32, %v5976_v57  ;;  %v5804_v32 = vld [vmem:[%s7145_s19 + $0x30] sm:$0xff]  }
0x1196   : > { %v2909_v4 = vmul.f32 %v5984_v23, %v5978_v59  ;;  %v2993_v12 = vpop.permute.xlu1 %2992 }
0x1197   : > { %v2912_v5 = vpack.c.bf16 %v2910_v55, %v2910_v55 }
0x1198   : > { %v2911_v7 = vpack.c.bf16 %v2909_v4, %v2908_v2  ;;  %v5805_v2 = vld [vmem:[%s7145_s19 + $0x28] sm:$0xff]  }
0x119a   : > { %5574 = vmatprep.mubr.msk.bf16.mxu0 %vm1770_vm6, %v2911_v7  ;;  %v5806_v7 = vld [vmem:[%s7145_s19 + $0x20] sm:$0xff]  }
0x119b   : > { %5575 = vmatmul.mubr.msk.bf16.vlgmr.msra.gmra.mxu0 %vm1770_vm6, %v2912_v5 }
0x119c   : > { %5579 = vmatpush3.bf16.xpose.msra.mxu0 %v3008_v9  ;;  %5582 = vmatprep.mubr.msk.bf16.mxu0 %vm1709_vm3, %v2991_v8  ;;  %v5807_v9 = vld [vmem:[%s7145_s19 + $0x18] sm:$0xff]  }
0x119d   : > { %5637 = vmatprep.subr.msk.bf16.mxu0 %vm1709_vm3, %v2995_v10  ;;  %v5808_v10 = vld [vmem:[%s7145_s19 + $0x10] sm:$0xff]  }
0x11a4   : > { %5581 = vmatpush3.bf16.xpose.msra.mxu0 %v3005_v11  ;;  %v5809_v11 = vld [vmem:[%s7145_s19 + $0x8] sm:$0xff]  }
0x11ab   : > { %5583 = vmatmul.mubr.msk.bf16.vlgmr.msra.gmra.mxu0 %vm1709_vm3, %v2993_v12  ;;  %v5810_v12 = vld [vmem:[%s7145_s19] sm:$0xff]   ;;  %s8187_s19 = scalar_lea.vmem [#allocation11], %s7134_s30 }
0x11ac   : > { %3640 = vmatprep.mubr.bf16.mxu0 %v6614_v39 }
0x125b   : > { %v7617_v49 = vpop.f32.mrf.mxu0 }
0x125d   : > { %v2961_v15 = vpop.f32.mrf.mxu0 }
0x125f   : > { %v5577_v42 = vpop.f32.mrf.mxu0 }
0x1261   : > { %v2964_v16 = vpop.f32.mrf.mxu0 }
0x126b   : > { %v5584_v20 = vpop.f32.mrf.mxu0 }
0x126c   : > { %v3064_v31 = vsel %vm1777_vm7, %v5584_v20, -inf }
0x126d   : > { %v3044_v14 = vpop.f32.mrf.mxu0 }
0x126e   : > { %v3058_v22 = vsel %vm1770_vm6, %v3044_v14, -inf }
0x126f   : > { %3059 = vmax.xlane.f32.xlu0 %v3058_v22  ;;  %v5585_v26 = vpop.f32.mrf.mxu0 }
0x1271   : > { %v3047_v28 = vpop.f32.mrf.mxu0 }
0x1272   : > { %v3061_v33 = vsel %vm1770_vm6, %v3047_v28, -inf }
0x1273   : > { %3065 = vmax.xlane.f32.xlu0 %v3064_v31  ;;  %3062 = vmax.xlane.f32.xlu1 %v3061_v33  ;;  %v5069_v31 = vld [vmem:[%s8187_s19] ss:$0 sm:$0xff] }
0x12f8   : > { %v3060_v34 = vpop.xlane.xlu0 %3059 }
0x12f9   : > { %v3067_v58 = vsub.f32 %v3044_v14, %v3060_v34 }
0x12fb   : > { %v3070_v19 = vmul.f32 1.442695, %v3067_v58 }
0x12fc   : > { %v3066_v43 = vpop.xlane.xlu0 %3065  ;;  %v3063_v46 = vpop.xlane.xlu1 %3062 }
0x12fd   : > { %5985 = vpow2.f32 %v3070_v19  ;;  %v3069_v47 = vsub.f32 %v5584_v20, %v3066_v43  ;;  %v3068_v48 = vsub.f32 %v3047_v28, %v3063_v46  ;;  %v6087_v43 = vld [vmem:[#allocation2 + $0x8] sm:$0xff] }
0x12ff   : > { %v3074_v50 = vmul.f32 1.442695, %v3069_v47  ;;  %v3072_v51 = vmul.f32 1.442695, %v3068_v48 }
0x1301   : > { %5987 = vpow2.f32 %v3074_v50 }
0x1302   : > { %5989 = vpow2.f32 %v3072_v51 }
0x130a   : > { %v5986_v53 = vpop.eup %5985 }
0x130b   : > { %v3076_v54 = vsel %vm1770_vm6, %v5986_v53, 0.0 }
0x130c   : > { %3077 = vadd.xlane.f32.xlu0 %v3076_v54 }
0x130e   : > { %v5988_v56 = vpop.eup %5987 }
0x130f   : > { %v5990_v57 = vpop.eup %5989  ;;  %v3082_v59 = vsel %vm1777_vm7, %v5988_v56, 0.0 }
0x1310   : > { %3083 = vadd.xlane.f32.xlu1 %v3082_v59  ;;  %v3079_v60 = vsel %vm1770_vm6, %v5990_v57, 0.0 }
0x1311   : > { %3080 = vadd.xlane.f32.xlu0 %v3079_v60 }
0x1321   : > { %3093 = vrot.lane.b32.xlu1 %v7394_v1, %s6617_s23 }
0x1325   : > { %2047 = vrot.lane.b32.xlu1 %v7484_v36, %s6617_s23 }
0x1327   : > { %3095 = vrot.lane.b32.xlu0 %v7474_v29, %s6617_s23 }
0x1329   : > { %2049 = vrot.lane.b32.xlu1 %v7486_v37, %s6617_s23 }
0x132b   : > { %2229 = vrot.lane.b32.xlu0 %v7490_v41, %s6616_s9 }
0x132d   : > { %2231 = vrot.lane.b32.xlu1 %v7492_v44, %s6616_s9 }
0x132f   : > { %2411 = vrot.lane.b32.xlu0 %v7527_v25, %s6615_s1 }
0x1331   : > { %2413 = vrot.lane.b32.xlu1 %v7529_v27, %s6615_s1 }
0x1333   : > { %2051 = vrot.lane.b32.xlu0 %v7482_v35, %s6617_s23 }
0x1335   : > { %2798 = vrot.lane.b32.xlu1 %v7585_v18, %s6617_s23 }
0x1337   : > { %2800 = vrot.lane.b32.xlu0 %v7587_v21, %s6617_s23 }
0x1339   : > { %2233 = vrot.lane.b32.xlu1 %v7488_v38, %s6616_s9 }
0x133b   : > { %2978 = vrot.lane.b32.xlu0 %v2961_v15, %s6616_s9 }
0x133d   : > { %2980 = vrot.lane.b32.xlu1 %v2964_v16, %s6616_s9 }
0x133f   : > { %2415 = vrot.lane.b32.xlu0 %v7525_v24, %s6615_s1 }
0x1395   : > { %v3078_v1 = vpop.xlane.xlu0 %3077 }
0x1396   : > { %5991 = vrcp.f32 %v3078_v1 }
0x1399   : > { %v3084_v29 = vpop.xlane.xlu1 %3083 }
0x139a   : > { %v3081_v35 = vpop.xlane.xlu0 %3080  ;;  %5993 = vrcp.f32 %v3084_v29 }
0x139b   : > { %5995 = vrcp.f32 %v3081_v35 }
0x139d   : > { %v3094_v36 = vpop.permute.xlu1 %3093 }
0x139e   : > { %v3096_v37 = vpop.permute.xlu0 %3095 }
0x139f   : > { %v3105_v41 = vand.u32 %v3096_v37, %v7380_v40 }
0x13a1   : > { %5586 = vmatprep.subr.bf16.mxu1 %v3105_v41  ;;  %v2048_v38 = vpop.permute.xlu1 %2047 }
0x13a2   : > { %5587 = vmatpush3.bf16.msra.mxu1 %v3105_v41  ;;  %v2230_v44 = vpop.permute.xlu0 %2229  ;;  %2057 = vst.msk [vmem:[#allocation3] sm:$0xff] %vm2056_vm9, %v2048_v38 }
0x13a3   : > { %5588 = vmatprep.subr.bf16.mxu1 %v3094_v36  ;;  %2239 = vst.msk [vmem:[#allocation3] sm:$0xff] %vm2238_vm10, %v2230_v44  ;;  %v5992_v25 = vpop.eup %5991 }
0x13a4   : > { %v3088_v62 = vmul.f32 %v5992_v25, %v5986_v53 }
0x13a5   : > { %v2050_v24 = vpop.permute.xlu1 %2049 }
0x13a6   : > { %v2412_v27 = vpop.permute.xlu0 %2411  ;;  %5589 = vmatpush3.bf16.msra.mxu1 %v3094_v36  ;;  %2058 = vst.msk [vmem:[#allocation3 + $0x8] sm:$0xff] %vm2056_vm9, %v2050_v24  ;;  %v6089_v24 = vld [vmem:[#allocation2 + $0x20] sm:$0xff] }
0x13a7   : > { %v5994_v40 = vpop.eup %5993  ;;  %2421 = vst.msk [vmem:[#allocation3] sm:$0xff] %vm2420_vm11, %v2412_v27  ;;  %5594 = vmatprep.subr.bf16.mxu1 %v6612_v6 }
0x13a8   : > { %v5996_v18 = vpop.eup %5995  ;;  %v3090_v21 = vmul.f32 %v5994_v40, %v5988_v56 }
0x13a9   : > { %v2232_v61 = vpop.permute.xlu1 %2231  ;;  %v3089_v63 = vmul.f32 %v5996_v18, %v5990_v57 }
0x13aa   : > { %v2052_v52 = vpop.permute.xlu0 %2051  ;;  %2240 = vst.msk [vmem:[#allocation3 + $0x8] sm:$0xff] %vm2238_vm10, %v2232_v61  ;;  %v3092_v0 = vpack.c.bf16 %v3090_v21, %v3090_v21  ;;  %v6090_v21 = vld [vmem:[#allocation2 + $0x10] sm:$0xff] }
0x13ab   : > { %2060 = vst.msk [vmem:[#allocation3 + $0x10] sm:$0x1] %vm2059_vm12, %v2052_v52  ;;  %v3091_v13 = vpack.c.bf16 %v3089_v63, %v3088_v62 }
0x13ad   : > { %5590 = vmatprep.mubr.msk.bf16.mxu1 %vm1770_vm6, %v3091_v13  ;;  %v2414_v30 = vpop.permute.xlu1 %2413  ;;  %v6091_v13 = vld [vmem:[#allocation2 + $0x18] sm:$0x3] }
0x13ae   : > { %v2801_v45 = vpop.permute.xlu0 %2800  ;;  %5591 = vmatmul.mubr.msk.bf16.vlgmr.msra.gmra.mxu1 %vm1770_vm6, %v3092_v0  ;;  %2422 = vst.msk [vmem:[#allocation3 + $0x8] sm:$0xff] %vm2420_vm11, %v2414_v30  ;;  %v3170_v42 = vld [vmem:[#allocation3] sm:$0xff] }
0x13af   : > { %2808 = vst.msk [vmem:[#allocation3 + $0x19] sm:$0xff] %vm2056_vm9, %v2801_v45  ;;  %5595 = vmatpush3.bf16.msra.mxu1 %v5803_v3  ;;  %5610 = vmatprep.mubr.msk.bf16.mxu1 %vm6613_vm2, %v6612_v6 }
0x13b0   : > { %5596 = vmatprep.subr.bf16.mxu1 %v6612_v6 }
0x13b1   : > { %v2799_v23 = vpop.permute.xlu1 %2798 }
0x13b2   : > { %v2979_v55 = vpop.permute.xlu0 %2978  ;;  %2807 = vst.msk [vmem:[#allocation3 + $0x11] sm:$0xff] %vm2056_vm9, %v2799_v23 }
0x13b3   : > { %5597 = vmatpush3.bf16.msra.mxu1 %v5804_v32  ;;  %2987 = vst.msk [vmem:[#allocation3 + $0x11] sm:$0xff] %vm2238_vm10, %v2979_v55 }
0x13b4   : > { %5598 = vmatprep.subr.bf16.mxu1 %v6612_v6 }
0x13b5   : > { %v2234_v4 = vpop.permute.xlu1 %2233  ;;  %v3171_v15 = vld [vmem:[#allocation3 + $0x8] sm:$0xff] }
0x13b6   : > { %v2416_v5 = vpop.permute.xlu0 %2415  ;;  %2242 = vst.msk [vmem:[#allocation3 + $0x10] sm:$0x1] %vm2241_vm13, %v2234_v4  ;;  %v3175_v16 = vpack.c.bf16 %v3171_v15, %v3170_v42  ;;  %v5813_v4 = vld [vmem:[%s7161_s21 + $0xe4] ss:$16 sps:$4 sm:$0xff]   ;;  %v5828_v15 = vld [vmem:[%s7161_s21 + $0xac] ss:$16 sps:$4 sm:$0xff]  }
0x13b7   : > { %5599 = vmatpush3.bf16.msra.mxu1 %v5805_v2  ;;  %2424 = vst.msk [vmem:[#allocation3 + $0x10] sm:$0x1] %vm2423_vm14, %v2416_v5  ;;  %v5811_v2 = vld [vmem:[%s7161_s21 + $0xe0] ss:$16 sps:$4 sm:$0xff]   ;;  %v5814_v5 = vld [vmem:[%s7161_s21 + $0xe8] ss:$16 sps:$4 sm:$0xff]   ;;  %3608 = vmatprep.subr.bf16.mxu0 %v5813_v4 }
0x13b8   : > { %5600 = vmatprep.subr.bf16.mxu1 %v6612_v6  ;;  %3609 = vmatpush1.bf16.msra.mxu0 %v5811_v2  ;;  %v5823_v42 = vld [vmem:[%s7161_s21 + $0xa0] ss:$16 sps:$4 sm:$0xff]   ;;  %v7789_v4 = vld [vmem:[%s8189_s14] ss:$0 sm:$0xff] }
0x13b9   : > { %v2981_v8 = vpop.permute.xlu1 %2980 }
0x13ba   : > { %2988 = vst.msk [vmem:[#allocation3 + $0x19] sm:$0xff] %vm2238_vm10, %v2981_v8  ;;  %v5819_v8 = vld [vmem:[%s7161_s21 + $0xc4] ss:$16 sps:$4 sm:$0xff]  }
0x13bb   : > { %5601 = vmatpush3.bf16.msra.mxu1 %v5806_v7  ;;  %v5816_v7 = vld [vmem:[%s7161_s21 + $0xec] ss:$16 sps:$4 sm:$0xff]   ;;  %3610 = vmatprep.subr.bf16.mxu0 %v5819_v8 }
0x13bc   : > { %5602 = vmatprep.subr.bf16.mxu1 %v6612_v6 }
0x13bf   : > { %5603 = vmatpush3.bf16.msra.mxu1 %v5807_v9  ;;  %v5822_v9 = vld [vmem:[%s7161_s21 + $0xcc] ss:$16 sps:$4 sm:$0xff]  }
0x13c0   : > { %5604 = vmatprep.subr.bf16.mxu1 %v6612_v6 }
0x13c3   : > { %5605 = vmatpush3.bf16.msra.mxu1 %v5808_v10  ;;  %v5817_v10 = vld [vmem:[%s7161_s21 + $0xc0] ss:$16 sps:$4 sm:$0xff]  }
0x13c4   : > { %5606 = vmatprep.subr.bf16.mxu1 %v6612_v6  ;;  %3611 = vmatpush1.bf16.msra.mxu0 %v5817_v10  ;;  %v5861_v10 = vld [vmem:[%s7167_s2 + $0x38] sm:$0xff]  }
0x13c7   : > { %5607 = vmatpush3.bf16.msra.mxu1 %v5809_v11  ;;  %v5820_v11 = vld [vmem:[%s7161_s21 + $0xc8] ss:$16 sps:$4 sm:$0xff]  }
0x13c8   : > { %5608 = vmatprep.subr.bf16.mxu1 %v6612_v6 }
0x13cb   : > { %5609 = vmatpush3.bf16.msra.mxu1 %v5810_v12  ;;  %v5825_v12 = vld [vmem:[%s7161_s21 + $0xa4] ss:$16 sps:$4 sm:$0xff]  }
0x13cc   : > { %3669 = vmatprep.subr.bf16.mxu1 %v5816_v7  ;;  %3612 = vmatprep.subr.bf16.mxu0 %v5825_v12  ;;  %v5863_v12 = vld [vmem:[%s7167_s2 + $0x70] sm:$0xff]  }
0x13cd   : > { %3613 = vmatpush1.bf16.msra.mxu0 %v5823_v42  ;;  %v5865_v42 = vld [vmem:[%s7167_s2 + $0x30] sm:$0xff]  }
0x13ce   : > { %5611 = vmatmul.mubr.bf16.vlgmr.msra.gmra.mxu1 %v3175_v16  ;;  %v5826_v16 = vld [vmem:[%s7161_s21 + $0xa8] ss:$16 sps:$4 sm:$0xff]  }
0x13cf   : > { %5614 = vmatprep.mubr.msk.bf16.mxu1 %vm6613_vm2, %v6612_v6  ;;  %3670 = vmatpush1.bf16.msra.mxu1 %v5814_v5 }
0x13d0   : > { %3671 = vmatprep.subr.bf16.mxu1 %v5822_v9  ;;  %v5860_v9 = vld [vmem:[%s7167_s2 + $0xf8] sm:$0xff]  }
0x13d3   : > { %3672 = vmatpush1.bf16.msra.mxu1 %v5820_v11  ;;  %v5862_v11 = vld [vmem:[%s7167_s2 + $0xb8] sm:$0xff]  }
0x13d4   : > { %3673 = vmatprep.subr.bf16.mxu1 %v5828_v15  ;;  %v5864_v15 = vld [vmem:[%s7167_s2 + $0xf0] sm:$0xff]  }
0x13d7   : > { %3674 = vmatpush1.bf16.msra.mxu1 %v5826_v16  ;;  %v5866_v16 = vld [vmem:[%s7167_s2 + $0xb0] sm:$0xff]  }
0x146e   : > { %v5592_v20 = vpop.f32.mrf.mxu1 }
0x1470   : > { %v3141_v14 = vpop.f32.mrf.mxu1 }
0x1471   : > { %3158 = vrot.lane.b32.xlu1 %v3141_v14, %s6615_s1  ;;  %v5831_v14 = vld [vmem:[%s7161_s21 + $0x84] ss:$16 sps:$4 sm:$0xff]  }
0x1472   : > { %v5593_v22 = vpop.f32.mrf.mxu1  ;;  %3614 = vmatprep.subr.bf16.mxu0 %v5831_v14  ;;  %v5868_v14 = vld [vmem:[%s7167_s2 + $0xe8] sm:$0xff]  }
0x1473   : > { %v5832_v22 = vld [vmem:[%s7161_s21 + $0x88] ss:$16 sps:$4 sm:$0xff]  }
0x1474   : > { %v3144_v26 = vpop.f32.mrf.mxu1 }
0x1475   : > { %2802 = vrot.lane.b32.xlu1 %v7583_v17, %s6617_s23  ;;  %3160 = vrot.lane.b32.xlu0 %v3144_v26, %s6615_s1  ;;  %v6088_v17 = vld [vmem:[#allocation2] sm:$0xff]  ;;  %v5834_v26 = vld [vmem:[%s7161_s21 + $0x8c] ss:$16 sps:$4 sm:$0xff]  }
0x1476   : > { %3675 = vmatprep.subr.bf16.mxu1 %v5834_v26  ;;  %v5870_v26 = vld [vmem:[%s7167_s2 + $0xa8] sm:$0xff]  }
0x1477   : > { %3676 = vmatpush1.bf16.msra.mxu1 %v5832_v22  ;;  %v5869_v22 = vld [vmem:[%s7167_s2 + $0x28] sm:$0xff]  }
0x1479   : > { %3162 = vrot.lane.b32.xlu1 %v5592_v20, %s6615_s1  ;;  %2982 = vrot.lane.b32.xlu0 %v7617_v49, %s6616_s9  ;;  %v5829_v20 = vld [vmem:[%s7161_s21 + $0x80] ss:$16 sps:$4 sm:$0xff]  }
0x147a   : > { %3615 = vmatpush1.bf16.msra.mxu0 %v5829_v20  ;;  %v5867_v20 = vld [vmem:[%s7167_s2 + $0x68] sm:$0xff]  }
0x148e   : > { %v3283_v28 = vpop.f32.mrf.mxu1 }
0x148f   : > { %v3284_v34 = vadd.f32 %v5069_v31, %v3283_v28  ;;  %v5837_v28 = vld [vmem:[%s7161_s21 + $0x64] ss:$16 sps:$4 sm:$0xff]  }
0x1490   : > { %v5612_v33 = vpop.f32.mrf.mxu1  ;;  %3616 = vmatprep.subr.bf16.mxu0 %v5837_v28  ;;  %v5871_v28 = vld [vmem:[%s7167_s2 + $0x60] sm:$0xff]  }
0x1491   : > { %v7698_v46 = vadd.f32 %v6087_v43, %v3284_v34  ;;  %v5835_v33 = vld [vmem:[%s7161_s21 + $0x60] ss:$16 sps:$4 sm:$0xff]   ;;  %v5838_v34 = vld [vmem:[%s7161_s21 + $0x68] ss:$16 sps:$4 sm:$0xff]  }
0x1492   : > { %v3286_v58 = vpop.f32.mrf.mxu1  ;;  %3617 = vmatpush1.bf16.msra.mxu0 %v5835_v33  ;;  %v5841_v43 = vld [vmem:[%s7161_s21 + $0x40] ss:$16 sps:$4 sm:$0xff]  }
0x1493   : > { %v3287_v47 = vadd.f32 %v5069_v31, %v3286_v58  ;;  %v5843_v58 = vld [vmem:[%s7161_s21 + $0x44] ss:$16 sps:$4 sm:$0xff]  }
0x1494   : > { %v5613_v19 = vpop.f32.mrf.mxu1  ;;  %3618 = vmatprep.subr.bf16.mxu0 %v5843_v58  ;;  %v5873_v33 = vld [vmem:[%s7167_s2 + $0x20] sm:$0xff]   ;;  %v5875_v58 = vld [vmem:[%s7167_s2 + $0x58] sm:$0xff]  }
0x1495   : > { %v7701_v48 = vadd.f32 %v6088_v17, %v3287_v47  ;;  %v5846_v19 = vld [vmem:[%s7161_s21 + $0x4c] ss:$16 sps:$4 sm:$0xff]   ;;  %v5844_v47 = vld [vmem:[%s7161_s21 + $0x48] ss:$16 sps:$4 sm:$0xff]   ;;  %v5849_v17 = vld [vmem:[%s7161_s21 + $0x24] ss:$16 sps:$4 sm:$0xff]  }
0x1496   : > { %3619 = vmatpush1.bf16.msra.mxu0 %v5841_v43  ;;  %v5877_v43 = vld [vmem:[%s7167_s2 + $0x18] sm:$0xff]  }
0x1497   : > { %3620 = vmatprep.subr.bf16.mxu0 %v5849_v17  ;;  %v5879_v17 = vld [vmem:[%s7167_s2 + $0x50] sm:$0xff]  }
0x1498   : > { %3312 = vadd.xlane.f32.xlu0 %v7698_v46 }
0x149d   : > { %3314 = vadd.xlane.f32.xlu1 %v7701_v48 }
0x14e3   : > { %v3159_v50 = vpop.permute.xlu1 %3158 }
0x14e4   : > { %3167 = vst.msk [vmem:[#allocation3 + $0x11] sm:$0xff] %vm2420_vm11, %v3159_v50  ;;  %v5852_v50 = vld [vmem:[%s7161_s21 + $0x2c] ss:$16 sps:$4 sm:$0xff]  }
0x14e7   : > { %v3161_v49 = vpop.permute.xlu0 %3160  ;;  %v2803_v51 = vpop.permute.xlu1 %2802 }
0x14e8   : > { %3168 = vst.msk [vmem:[#allocation3 + $0x19] sm:$0xff] %vm2420_vm11, %v3161_v49  ;;  %v5847_v49 = vld [vmem:[%s7161_s21 + $0x20] ss:$16 sps:$4 sm:$0xff]  }
0x14e9   : > { %2809 = vst.msk [vmem:[#allocation3 + $0x21] sm:$0x1] %vm2059_vm12, %v2803_v51  ;;  %v5850_v51 = vld [vmem:[%s7161_s21 + $0x28] ss:$16 sps:$4 sm:$0xff]   ;;  %3621 = vmatpush1.bf16.msra.mxu0 %v5847_v49  ;;  %v5881_v49 = vld [vmem:[%s7167_s2 + $0x10] sm:$0xff]  }
0x14eb   : > { %v2983_v53 = vpop.permute.xlu0 %2982  ;;  %v3163_v54 = vpop.permute.xlu1 %3162  ;;  %v3172_v56 = vld [vmem:[#allocation3 + $0x10] sm:$0xff] }
0x14ec   : > { %2989 = vst.msk [vmem:[#allocation3 + $0x21] sm:$0x1] %vm2241_vm13, %v2983_v53  ;;  %v5855_v53 = vld [vmem:[%s7161_s21 + $0x4] ss:$16 sps:$4 sm:$0xff]  }
0x14ed   : > { %3169 = vst.msk [vmem:[#allocation3 + $0x21] sm:$0x1] %vm2423_vm14, %v3163_v54  ;;  %v5858_v54 = vld [vmem:[%s7161_s21 + $0xc] ss:$16 sps:$4 sm:$0xff]   ;;  %3622 = vmatprep.subr.bf16.mxu0 %v5855_v53 }
0x14ee   : > { %v5883_v53 = vld [vmem:[%s7167_s2 + $0x48] sm:$0xff]  }
0x14ef   : > { %v3173_v57 = vld [vmem:[#allocation3 + $0x18] sm:$0xff] }
0x14f0   : > { %v3176_v59 = vpack.c.bf16 %v3173_v57, %v3172_v56  ;;  %v5853_v56 = vld [vmem:[%s7161_s21] ss:$16 sps:$4 sm:$0xff]   ;;  %v5856_v57 = vld [vmem:[%s7161_s21 + $0x8] ss:$16 sps:$4 sm:$0xff]  }
0x14f1   : > { %3623 = vmatpush1.bf16.msra.mxu0 %v5853_v56 }
0x14f2   : > { %5615 = vmatmul.mubr.bf16.gmra.mxu1 %v3176_v59 }
0x14f3   : > { %5618 = vmatprep.mubr.msk.bf16.mxu1 %vm6613_vm2, %v6612_v6 }
0x14f4   : > { %v3174_v60 = vld [vmem:[#allocation3 + $0x20] sm:$0x3] }
0x14f5   : > { %v3177_v1 = vpack.c.bf16 %v3174_v60, %v3174_v60 }
0x14fa   : > { %5619 = vmatmul.mubr.bf16.gmra.mxu1 %v3177_v1 }
0x14fb   : > { %3701 = vmatprep.mubr.bf16.mxu1 %v6614_v39 }
0x1521   : > { %v3313_v29 = vpop.xlane.xlu0 %3312 }
0x1522   : > { %v3323_v35 = vmul.f32 0.0078125, %v3313_v29 }
0x1524   : > { %v7713_v36 = vsub.f32 %v7698_v46, %v3323_v35 }
0x1526   : > { %v3333_v37 = vmul.f32 %v7713_v36, %v7713_v36  ;;  %v3315_v27 = vpop.xlane.xlu1 %3314 }
0x1527   : > { %v3324_v62 = vmul.f32 0.0078125, %v3315_v27 }
0x1528   : > { %3338 = vadd.xlane.f32.xlu1 %v3333_v37 }
0x1529   : > { %v7726_v30 = vsub.f32 %v7701_v48, %v3324_v62 }
0x152b   : > { %v3334_v55 = vmul.f32 %v7726_v30, %v7726_v30 }
0x15b1   : > { %v3339_v60 = vpop.xlane.xlu1 %3338 }
0x15b2   : > { %v3291_v41 = vpop.f32.mrf.mxu1  ;;  %v3349_v35 = vmul.f32 0.0078125, %v3339_v60 }
0x15b3   : > { %v3292_v38 = vadd.f32 %v5069_v31, %v3291_v41 }
0x15b4   : > { %v5616_v44 = vpop.f32.mrf.mxu1 }
0x15b5   : > { %v7717_v25 = vadd.f32 %v6089_v24, %v3292_v38  ;;  %v3354_v24 = vadd.f32 1e-05, %v3349_v35  ;;  %v5887_v35 = vld [vmem:[%s7167_s2 + $0x40] sm:$0xff]  }
0x15b6   : > { %v3294_v6 = vpop.f32.mrf.mxu1 }
0x15b7   : > { %v3295_v40 = vadd.f32 %v5069_v31, %v3294_v6  ;;  %3316 = vadd.xlane.f32.xlu0 %v7717_v25  ;;  %5997 = vrsqrt.f32 %v3354_v24  ;;  %v5890_v24 = vld [vmem:[%s7167_s2 + $0x80] sm:$0xff]  }
0x15b8   : > { %v5617_v18 = vpop.f32.mrf.mxu1 }
0x15b9   : > { %v7720_v61 = vadd.f32 %v6090_v21, %v3295_v40 }
0x15ba   : > { %v3299_v63 = vpop.f32.mrf.mxu1 }
0x15bb   : > { %v3300_v52 = vadd.f32 %v5069_v31, %v3299_v63  ;;  %3318 = vadd.xlane.f32.xlu0 %v7720_v61  ;;  %v5840_v31 = vld [vmem:[%s7161_s21 + $0x6c] ss:$16 sps:$4 sm:$0xff]   ;;  %s8188_s21 = scalar_lea.vmem [#allocation20], %s7134_s30 }
0x15bc   : > { %v5620_v0 = vpop.f32.mrf.mxu1  ;;  %3677 = vmatprep.subr.bf16.mxu1 %v5840_v31  ;;  %v5872_v31 = vld [vmem:[%s7167_s2 + $0xe0] sm:$0xff]  }
0x15bd   : > { %v7723_v3 = vadd.f32 %v6091_v13, %v3300_v52  ;;  %3678 = vmatpush1.bf16.msra.mxu1 %v5838_v34  ;;  %v5874_v34 = vld [vmem:[%s7167_s2 + $0xa0] sm:$0xff]  }
0x15be   : > { %v3302_v45 = vpop.f32.mrf.mxu1  ;;  %3679 = vmatprep.subr.bf16.mxu1 %v5846_v19  ;;  %v5876_v19 = vld [vmem:[%s7167_s2 + $0xd8] sm:$0xff]  }
0x15bf   : > { %v3320_v32 = vsel %vm1243_vm1, %v7723_v3, 0.0 }
0x15c0   : > { %3321 = vadd.xlane.f32.xlu0 %v3320_v32  ;;  %v5621_v23 = vpop.f32.mrf.mxu1  ;;  %v7783_v32 = vld [vmem:[%s8188_s21] ss:$0 sm:$0xff] }
0x15c1   : > { %3680 = vmatpush1.bf16.msra.mxu1 %v5844_v47  ;;  %v5878_v47 = vld [vmem:[%s7167_s2 + $0x98] sm:$0xff]  }
0x15c2   : > { %3681 = vmatprep.subr.bf16.mxu1 %v5852_v50  ;;  %v5880_v50 = vld [vmem:[%s7167_s2 + $0xd0] sm:$0xff]  }
0x15c4   : > { %3340 = vadd.xlane.f32.xlu0 %v3334_v55  ;;  %v5998_v13 = vpop.eup %5997 }
0x15c5   : > { %3682 = vmatpush1.bf16.msra.mxu1 %v5850_v51  ;;  %v3364_v45 = vmul.f32 %v5998_v13, %v7713_v36  ;;  %v5882_v51 = vld [vmem:[%s7167_s2 + $0x90] sm:$0xff]  }
0x15c6   : > { %3683 = vmatprep.subr.bf16.mxu1 %v5858_v54  ;;  %v5884_v54 = vld [vmem:[%s7167_s2 + $0xc8] sm:$0xff]  }
0x15c7   : > { %v3375_v2 = vmul.f32 %v7783_v32, %v3364_v45 }
0x15c9   : > { %3684 = vmatpush1.bf16.msra.mxu1 %v5856_v57  ;;  %v3386_v7 = vadd.f32 %v7789_v4, %v3375_v2  ;;  %v5885_v57 = vld [vmem:[%s7167_s2 + $0x8] sm:$0xff]  }
0x15ca   : > { %5348 = vmatprep.subr.bf16.mxu1 %v5860_v9 }
0x1640   : > { %v3317_v59 = vpop.xlane.xlu0 %3316 }
0x1641   : > { %v3325_v1 = vmul.f32 0.0078125, %v3317_v59  ;;  %v5886_v59 = vld [vmem:[%s7167_s2 + $0x88] sm:$0xff]  }
0x1643   : > { %v7765_v29 = vsub.f32 %v7717_v25, %v3325_v1 }
0x1644   : > { %v3319_v37 = vpop.xlane.xlu0 %3318 }
0x1645   : > { %v3326_v41 = vmul.f32 0.0078125, %v3319_v37  ;;  %v3335_v38 = vmul.f32 %v7765_v29, %v7765_v29  ;;  %v5888_v37 = vld [vmem:[%s7167_s2 + $0xc0] sm:$0xff]  }
0x1647   : > { %v7770_v44 = vsub.f32 %v7720_v61, %v3326_v41  ;;  %3342 = vadd.xlane.f32.xlu1 %v3335_v38  ;;  %v5889_v38 = vld [vmem:[%s7167_s2] sm:$0xff]  }
0x1649   : > { %v3322_v6 = vpop.xlane.xlu0 %3321  ;;  %v3336_v27 = vmul.f32 %v7770_v44, %v7770_v44 }
0x164a   : > { %v3327_v40 = vmul.f32 0.0078125, %v3322_v6 }
0x164b   : > { %3344 = vadd.xlane.f32.xlu0 %v3336_v27 }
0x164c   : > { %v7775_v18 = vsub.f32 %v7723_v3, %v3327_v40 }
0x164d   : > { %v3341_v21 = vpop.xlane.xlu0 %3340 }
0x164e   : > { %v3350_v62 = vmul.f32 0.0078125, %v3341_v21  ;;  %v3337_v63 = vmul.f32 %v7775_v18, %v7775_v18 }
0x1650   : > { %v3355_v52 = vadd.f32 1e-05, %v3350_v62  ;;  %v3346_v0 = vsel %vm1243_vm1, %v3337_v63, 0.0 }
0x1651   : > { %3347 = vadd.xlane.f32.xlu1 %v3346_v0 }
0x1652   : > { %5999 = vrsqrt.f32 %v3355_v52 }
0x165f   : > { %v6000_v23 = vpop.eup %5999 }
0x1660   : > { %v3365_v55 = vmul.f32 %v6000_v23, %v7726_v30  ;;  %v5859_v30 = vld [vmem:[%s7167_s2 + $0x78] sm:$0xff]   ;;  %s8190_s2 = scalar_lea.vmem [#allocation18], %s7134_s30  ;;  %s8191_s30 = sld [smem:[#allocation37_spill]] }
0x1661   : > { %5314 = vmatprep.subr.bf16.mxu0 %v5859_v30  ;;  %v3428_v30 = vlaneseq }
0x1662   : > { %v3376_v5 = vmul.f32 %v7783_v32, %v3365_v55 }
0x1663   : > { %v7839_v9 = vshrl.u32 %v3428_v30, 7 }
0x1664   : > { %v3387_v36 = vadd.f32 %v7789_v4, %v3376_v5 }
0x1666   : > { %v3391_v8 = vpack.c.bf16 %v3387_v36, %v3386_v7  ;;  %p5165_p6 = scmp.ne.s32.totalorder %s8191_s30, 5 }
0x1667   : > { %s8192_s12 = sld [smem:[#allocation58_spill]] (!%p5165_p6) }
0x1668   : > { %3641 = vmatmul.mubr.bf16.vlgmr.msra.gmra.mxu0 %v3391_v8  ;;  %3702 = vmatmul.mubr.bf16.vlgmr.msra.gmra.mxu1 %v3391_v8 }
0x1669   : > { %3650 = vmatprep.mubr.bf16.mxu0 %v6614_v39  ;;  %3711 = vmatprep.mubr.bf16.mxu1 %v6614_v39 }
0x166a   : > { %5315 = vmatpush3.bf16.msra.mxu0 %v5861_v10  ;;  %5349 = vmatpush3.bf16.msra.mxu1 %v5862_v11  ;;  %v3430_v10 = vsub.s32 0, %v7839_v9  ;;  %v3426_v11 = vld [vmem:[%s7218_s5] sm:$0xf] }
0x166b   : > { %5316 = vmatprep.subr.bf16.mxu0 %v5863_v12  ;;  %5350 = vmatprep.subr.bf16.mxu1 %v5864_v15  ;;  %v3434_v12 = vsub.s32 1, %v7839_v9 }
0x166d   : > { %v7856_v15 = vrot.slane %v3426_v11, %v3434_v12 }
0x166e   : > { %5317 = vmatpush3.bf16.msra.mxu0 %v5865_v42  ;;  %5351 = vmatpush3.bf16.msra.mxu1 %v5866_v16 }
0x166f   : > { %5318 = vmatprep.subr.bf16.mxu0 %v5867_v20  ;;  %5352 = vmatprep.subr.bf16.mxu1 %v5868_v14 }
0x1672   : > { %5319 = vmatpush3.bf16.msra.mxu0 %v5869_v22  ;;  %5353 = vmatpush3.bf16.msra.mxu1 %v5870_v26 }
0x1673   : > { %5320 = vmatprep.subr.bf16.mxu0 %v5871_v28  ;;  %5354 = vmatprep.subr.bf16.mxu1 %v5872_v31 }
0x1676   : > { %5321 = vmatpush3.bf16.msra.mxu0 %v5873_v33  ;;  %5355 = vmatpush3.bf16.msra.mxu1 %v5874_v34 }
0x1677   : > { %5322 = vmatprep.subr.bf16.mxu0 %v5875_v58  ;;  %5356 = vmatprep.subr.bf16.mxu1 %v5876_v19 }
0x167a   : > { %5323 = vmatpush3.bf16.msra.mxu0 %v5877_v43  ;;  %5357 = vmatpush3.bf16.msra.mxu1 %v5878_v47 }
0x167b   : > { %5324 = vmatprep.subr.bf16.mxu0 %v5879_v17  ;;  %5358 = vmatprep.subr.bf16.mxu1 %v5880_v50 }
0x167e   : > { %5325 = vmatpush3.bf16.msra.mxu0 %v5881_v49  ;;  %5359 = vmatpush3.bf16.msra.mxu1 %v5882_v51 }
0x167f   : > { %5326 = vmatprep.subr.bf16.mxu0 %v5883_v53  ;;  %5360 = vmatprep.subr.bf16.mxu1 %v5884_v54 }
0x1682   : > { %5327 = vmatpush3.bf16.msra.mxu0 %v5885_v57  ;;  %5361 = vmatpush3.bf16.msra.mxu1 %v5886_v59 }
0x1683   : > { %5328 = vmatprep.subr.bf16.mxu0 %v5887_v35  ;;  %5362 = vmatprep.subr.bf16.mxu1 %v5888_v37 }
0x1686   : > { %5329 = vmatpush3.bf16.msra.mxu0 %v5889_v38  ;;  %5363 = vmatpush3.bf16.msra.mxu1 %v5890_v24 }
0x16d0   : > { %v3343_v56 = vpop.xlane.xlu1 %3342 }
0x16d1   : > { %v3351_v60 = vmul.f32 0.0078125, %v3343_v56 }
0x16d3   : > { %v3356_v1 = vadd.f32 1e-05, %v3351_v60 }
0x16d4   : > { %v3345_v41 = vpop.xlane.xlu0 %3344 }
0x16d5   : > { %6001 = vrsqrt.f32 %v3356_v1  ;;  %v3352_v6 = vmul.f32 0.0078125, %v3345_v41 }
0x16d7   : > { %v3357_v27 = vadd.f32 1e-05, %v3352_v6 }
0x16d9   : > { %6003 = vrsqrt.f32 %v3357_v27 }
0x16da   : > { %v3348_v40 = vpop.xlane.xlu1 %3347 }
0x16db   : > { %v3353_v21 = vmul.f32 0.0078125, %v3348_v40 }
0x16dd   : > { %v3358_v62 = vadd.f32 1e-05, %v3353_v21 }
0x16df   : > { %6005 = vrsqrt.f32 %v3358_v62 }
0x16e2   : > { %v6002_v63 = vpop.eup %6001 }
0x16e3   : > { %v3366_v52 = vmul.f32 %v6002_v63, %v7765_v29 }
0x16e5   : > { %v3377_v45 = vmul.f32 %v7783_v32, %v3366_v52 }
0x16e6   : > { %v6004_v0 = vpop.eup %6003 }
0x16e7   : > { %v3367_v13 = vmul.f32 %v6004_v0, %v7770_v44  ;;  %v3388_v55 = vadd.f32 %v7789_v4, %v3377_v45 }
0x16e9   : > { %v3378_v23 = vmul.f32 %v7783_v32, %v3367_v13 }
0x16eb   : > { %v3389_v2 = vadd.f32 %v7789_v4, %v3378_v23 }
0x16ec   : > { %v6006_v5 = vpop.eup %6005 }
0x16ed   : > { %v3392_v7 = vpack.c.bf16 %v3389_v2, %v3388_v55  ;;  %v3368_v36 = vmul.f32 %v6006_v5, %v7775_v18  ;;  %v3438_v18 = vsub.s32 2, %v7839_v9 }
0x16ef   : > { %3651 = vmatmul.mubr.bf16.gmra.mxu0 %v3392_v7  ;;  %3712 = vmatmul.mubr.bf16.gmra.mxu1 %v3392_v7  ;;  %v3379_v29 = vmul.f32 %v7783_v32, %v3368_v36  ;;  %v3442_v32 = vsub.s32 3, %v7839_v9 }
0x16f0   : > { %3660 = vmatprep.mubr.bf16.mxu0 %v6614_v39  ;;  %3721 = vmatprep.mubr.bf16.mxu1 %v6614_v39  ;;  %v7848_v39 = vrot.slane %v3426_v11, %v3430_v10 }
0x16f1   : > { %v3390_v44 = vadd.f32 %v7789_v4, %v3379_v29  ;;  %v7852_v4 = vrot.slane %v3426_v11, %v3438_v18  ;;  %v7860_v42 = vrot.slane %v3426_v11, %v3442_v32 }
0x16f3   : > { %v3393_v8 = vpack.c.bf16 %v3390_v44, %v3390_v44 }
0x16f7   : > { %3661 = vmatmul.mubr.bf16.gmra.mxu0 %v3393_v8  ;;  %3722 = vmatmul.mubr.bf16.gmra.mxu1 %v3393_v8 }
0x1728   : > { %v3642_v16 = vpop.f32.mrf.mxu0  ;;  %v3703_v20 = vpop.f32.mrf.mxu1 }
0x1729   : > { %v7863_v14 = vadd.f32 %v3642_v16, %v7848_v39  ;;  %v7866_v22 = vadd.f32 %v3703_v20, %v7852_v4 }
0x172a   : > { %v3644_v26 = vpop.f32.mrf.mxu0  ;;  %v3705_v28 = vpop.f32.mrf.mxu1 }
0x172b   : > { %v5112_v31 = vmul.f32 -1.702, %v7863_v14  ;;  %v5114_v33 = vmul.f32 -1.702, %v7866_v22  ;;  %v7871_v34 = vadd.f32 %v3644_v26, %v7856_v15  ;;  %v7874_v58 = vadd.f32 %v3705_v28, %v7860_v42 }
0x172c   : > { %v3646_v19 = vpop.f32.mrf.mxu0  ;;  %v3707_v43 = vpop.f32.mrf.mxu1 }
0x172d   : > { %v3770_v47 = vmul.f32 1.442695, %v5112_v31  ;;  %v3774_v17 = vmul.f32 1.442695, %v5114_v33  ;;  %v5113_v50 = vmul.f32 -1.702, %v7871_v34  ;;  %v3647_v49 = vadd.f32 %v3646_v19, %v7848_v39 }
0x172e   : > { %v5115_v51 = vmul.f32 -1.702, %v7874_v58  ;;  %v3708_v53 = vadd.f32 %v3707_v43, %v7852_v4  ;;  %v3648_v54 = vpop.f32.mrf.mxu0  ;;  %v3709_v56 = vpop.f32.mrf.mxu1 }
0x172f   : > { %6007 = vpow2.f32 %v3770_v47  ;;  %v3772_v57 = vmul.f32 1.442695, %v5113_v50  ;;  %v5116_v59 = vmul.f32 -1.702, %v3647_v49  ;;  %v3649_v60 = vadd.f32 %v3648_v54, %v7856_v15 }
0x1730   : > { %6009 = vpow2.f32 %v3774_v17  ;;  %v3776_v1 = vmul.f32 1.442695, %v5115_v51  ;;  %v5118_v35 = vmul.f32 -1.702, %v3708_v53  ;;  %v3710_v37 = vadd.f32 %v3709_v56, %v7860_v42 }
0x1731   : > { %6011 = vpow2.f32 %v3772_v57  ;;  %v3778_v41 = vmul.f32 1.442695, %v5116_v59  ;;  %v5117_v38 = vmul.f32 -1.702, %v3649_v60 }
0x1732   : > { %6013 = vpow2.f32 %v3776_v1  ;;  %v3782_v24 = vmul.f32 1.442695, %v5118_v35  ;;  %v5119_v6 = vmul.f32 -1.702, %v3710_v37 }
0x1733   : > { %6015 = vpow2.f32 %v3778_v41  ;;  %v3780_v27 = vmul.f32 1.442695, %v5117_v38 }
0x1734   : > { %6017 = vpow2.f32 %v3782_v24  ;;  %v3784_v40 = vmul.f32 1.442695, %v5119_v6 }
0x1735   : > { %6019 = vpow2.f32 %v3780_v27 }
0x1736   : > { %6021 = vpow2.f32 %v3784_v40 }
0x173c   : > { %v6008_v21 = vpop.eup %6007 }
0x173d   : > { %v6010_v62 = vpop.eup %6009  ;;  %v3810_v63 = vadd.f32 1.0, %v6008_v21 }
0x173e   : > { %v6012_v52 = vpop.eup %6011  ;;  %v3812_v0 = vadd.f32 1.0, %v6010_v62 }
0x173f   : > { %v6014_v13 = vpop.eup %6013  ;;  %6023 = vrcp.f32 %v3810_v63  ;;  %v3811_v45 = vadd.f32 1.0, %v6012_v52 }
0x1740   : > { %v6016_v23 = vpop.eup %6015  ;;  %6025 = vrcp.f32 %v3812_v0  ;;  %v3813_v55 = vadd.f32 1.0, %v6014_v13 }
0x1741   : > { %v6018_v2 = vpop.eup %6017  ;;  %6027 = vrcp.f32 %v3811_v45  ;;  %v3814_v5 = vadd.f32 1.0, %v6016_v23 }
0x1742   : > { %v6020_v7 = vpop.eup %6019  ;;  %6029 = vrcp.f32 %v3813_v55  ;;  %v3816_v36 = vadd.f32 1.0, %v6018_v2 }
0x1743   : > { %v6022_v29 = vpop.eup %6021  ;;  %6031 = vrcp.f32 %v3814_v5  ;;  %v3815_v44 = vadd.f32 1.0, %v6020_v7 }
0x1744   : > { %6033 = vrcp.f32 %v3816_v36  ;;  %v3817_v8 = vadd.f32 1.0, %v6022_v29 }
0x1745   : > { %6035 = vrcp.f32 %v3815_v44 }
0x1746   : > { %6037 = vrcp.f32 %v3817_v8 }
0x174c   : > { %v6024_v30 = vpop.eup %6023 }
0x174d   : > { %v6026_v11 = vpop.eup %6025  ;;  %v3870_v50 = vmul.f32 %v6024_v30, %v7863_v14 }
0x174e   : > { %v6028_v16 = vpop.eup %6027  ;;  %v3872_v56 = vmul.f32 %v6026_v11, %v7866_v22 }
0x174f   : > { %v6030_v20 = vpop.eup %6029  ;;  %v3871_v43 = vmul.f32 %v6028_v16, %v7871_v34 }
0x1750   : > { %v6032_v26 = vpop.eup %6031  ;;  %v3873_v51 = vmul.f32 %v6030_v20, %v7874_v58 }
0x1751   : > { %v6034_v28 = vpop.eup %6033  ;;  %v3874_v33 = vmul.f32 %v6032_v26, %v3647_v49 }
0x1752   : > { %v6036_v31 = vpop.eup %6035  ;;  %v3876_v47 = vmul.f32 %v6034_v28, %v3708_v53 }
0x1753   : > { %v6038_v19 = vpop.eup %6037  ;;  %v3875_v17 = vmul.f32 %v6036_v31, %v3649_v60  ;;  %v3890_v59 = vpack.c.bf16 %v3874_v33, %v3870_v50 }
0x1754   : > { %v3877_v54 = vmul.f32 %v6038_v19, %v3710_v37  ;;  %v3892_v35 = vpack.c.bf16 %v3876_v47, %v3872_v56 }
0x1755   : > { %v3891_v57 = vpack.c.bf16 %v3875_v17, %v3871_v43 }
0x1756   : > { %v3893_v1 = vpack.c.bf16 %v3877_v54, %v3873_v51 }
0x1757   : > { %4197 = vmatprep.mubr.bf16.mxu0 %v3891_v57 }
0x1758   : > { %4253 = vmatprep.mubr.bf16.mxu1 %v3893_v1  ;;  %4198 = vmatmul.mubr.bf16.vlgmr.msra.gmra.mxu0 %v3890_v59 }
0x1759   : > { %4254 = vmatmul.mubr.bf16.vlgmr.msra.gmra.mxu1 %v3892_v35 }
0x17af   : > { %v3652_v49 = vpop.f32.mrf.mxu0  ;;  %v3713_v41 = vpop.f32.mrf.mxu1 }
0x17b0   : > { %v7887_v34 = vadd.f32 %v3652_v49, %v7848_v39  ;;  %v7890_v14 = vadd.f32 %v3713_v41, %v7852_v4 }
0x17b1   : > { %v3654_v58 = vpop.f32.mrf.mxu0  ;;  %v3715_v53 = vpop.f32.mrf.mxu1 }
0x17b2   : > { %v5120_v22 = vmul.f32 -1.702, %v7887_v34  ;;  %v5122_v60 = vmul.f32 -1.702, %v7890_v14  ;;  %v7895_v37 = vadd.f32 %v3654_v58, %v7856_v15  ;;  %v7898_v38 = vadd.f32 %v3715_v53, %v7860_v42 }
0x17b3   : > { %v3656_v24 = vpop.f32.mrf.mxu0  ;;  %v3717_v6 = vpop.f32.mrf.mxu1 }
0x17b4   : > { %v3786_v27 = vmul.f32 1.442695, %v5120_v22  ;;  %v3790_v40 = vmul.f32 1.442695, %v5122_v60  ;;  %v5121_v21 = vmul.f32 -1.702, %v7895_v37  ;;  %v7902_v62 = vadd.f32 %v3656_v24, %v7848_v39 }
0x17b5   : > { %v5123_v63 = vmul.f32 -1.702, %v7898_v38  ;;  %v7906_v52 = vadd.f32 %v3717_v6, %v7852_v4  ;;  %v3658_v0 = vpop.f32.mrf.mxu0  ;;  %v3719_v13 = vpop.f32.mrf.mxu1 }
0x17b6   : > { %6039 = vpow2.f32 %v3786_v27  ;;  %v3788_v45 = vmul.f32 1.442695, %v5121_v21  ;;  %v5124_v23 = vmul.f32 -1.702, %v7902_v62  ;;  %v7910_v55 = vadd.f32 %v3658_v0, %v7856_v15 }
0x17b7   : > { %6041 = vpow2.f32 %v3790_v40  ;;  %v3792_v2 = vmul.f32 1.442695, %v5123_v63  ;;  %v5126_v5 = vmul.f32 -1.702, %v7906_v52  ;;  %v7914_v7 = vadd.f32 %v3719_v13, %v7860_v42  ;;  %v3662_v36 = vpop.f32.mrf.mxu0  ;;  %v3723_v29 = vpop.f32.mrf.mxu1 }
0x17b8   : > { %6043 = vpow2.f32 %v3788_v45  ;;  %v3794_v44 = vmul.f32 1.442695, %v5124_v23  ;;  %v5125_v8 = vmul.f32 -1.702, %v7910_v55  ;;  %v7918_v30 = vadd.f32 %v3662_v36, %v7848_v39 }
0x17b9   : > { %6045 = vpow2.f32 %v3792_v2  ;;  %v3798_v11 = vmul.f32 1.442695, %v5126_v5  ;;  %v5127_v16 = vmul.f32 -1.702, %v7914_v7  ;;  %v7922_v20 = vadd.f32 %v3723_v29, %v7852_v4  ;;  %v3664_v26 = vpop.f32.mrf.mxu0  ;;  %v3725_v28 = vpop.f32.mrf.mxu1 }
0x17ba   : > { %6047 = vpow2.f32 %v3794_v44  ;;  %v3796_v31 = vmul.f32 1.442695, %v5125_v8  ;;  %v5128_v33 = vmul.f32 -1.702, %v7918_v30  ;;  %v7926_v19 = vadd.f32 %v3664_v26, %v7856_v15 }
0x17bb   : > { %6049 = vpow2.f32 %v3798_v11  ;;  %v3800_v43 = vmul.f32 1.442695, %v5127_v16  ;;  %v5130_v39 = vmul.f32 -1.702, %v7922_v20  ;;  %v7930_v47 = vadd.f32 %v3725_v28, %v7860_v42  ;;  %v3666_v17 = vpop.f32.mrf.mxu0  ;;  %v3727_v50 = vpop.f32.mrf.mxu1 }
0x17bc   : > { %6051 = vpow2.f32 %v3796_v31  ;;  %v3802_v4 = vmul.f32 1.442695, %v5128_v33  ;;  %v5129_v51 = vmul.f32 -1.702, %v7926_v19 }
0x17bd   : > { %6053 = vpow2.f32 %v3800_v43  ;;  %v3806_v54 = vmul.f32 1.442695, %v5130_v39  ;;  %v5131_v56 = vmul.f32 -1.702, %v7930_v47  ;;  %v3667_v57 = vpop.f32.mrf.mxu0  ;;  %v3728_v15 = vpop.f32.mrf.mxu1 }
0x17be   : > { %6055 = vpow2.f32 %v3802_v4  ;;  %v3804_v59 = vmul.f32 1.442695, %v5129_v51 }
0x17bf   : > { %6057 = vpow2.f32 %v3806_v54  ;;  %v3808_v1 = vmul.f32 1.442695, %v5131_v56 }
0x17c0   : > { %6059 = vpow2.f32 %v3804_v59 }
0x17c1   : > { %6061 = vpow2.f32 %v3808_v1 }
0x17c3   : > { %v6040_v42 = vpop.eup %6039 }
0x17c4   : > { %v6042_v35 = vpop.eup %6041  ;;  %v3818_v49 = vadd.f32 1.0, %v6040_v42 }
0x17c5   : > { %v6044_v41 = vpop.eup %6043  ;;  %v3820_v58 = vadd.f32 1.0, %v6042_v35 }
0x17c6   : > { %v6046_v53 = vpop.eup %6045  ;;  %6063 = vrcp.f32 %v3818_v49  ;;  %v3819_v22 = vadd.f32 1.0, %v6044_v41 }
0x17c7   : > { %v6048_v60 = vpop.eup %6047  ;;  %6065 = vrcp.f32 %v3820_v58  ;;  %v3821_v24 = vadd.f32 1.0, %v6046_v53 }
0x17c8   : > { %v6050_v6 = vpop.eup %6049  ;;  %6067 = vrcp.f32 %v3819_v22  ;;  %v3822_v27 = vadd.f32 1.0, %v6048_v60 }
0x17c9   : > { %v6052_v40 = vpop.eup %6051  ;;  %6069 = vrcp.f32 %v3821_v24  ;;  %v3824_v21 = vadd.f32 1.0, %v6050_v6 }
0x17ca   : > { %v6054_v63 = vpop.eup %6053  ;;  %6071 = vrcp.f32 %v3822_v27  ;;  %v3823_v0 = vadd.f32 1.0, %v6052_v40 }
0x17cb   : > { %v6056_v13 = vpop.eup %6055  ;;  %6073 = vrcp.f32 %v3824_v21  ;;  %v3825_v45 = vadd.f32 1.0, %v6054_v63 }
0x17cc   : > { %v6058_v23 = vpop.eup %6057  ;;  %6075 = vrcp.f32 %v3823_v0  ;;  %v3826_v2 = vadd.f32 1.0, %v6056_v13 }
0x17cd   : > { %v6060_v5 = vpop.eup %6059  ;;  %6077 = vrcp.f32 %v3825_v45  ;;  %v3828_v29 = vadd.f32 1.0, %v6058_v23 }
0x17ce   : > { %v6062_v36 = vpop.eup %6061  ;;  %v3827_v44 = vadd.f32 1.0, %v6060_v5  ;;  %6079 = vrcp.f32 %v3826_v2 }
0x17cf   : > { %v3829_v8 = vadd.f32 1.0, %v6062_v36 }
0x17d0   : > { %6081 = vrcp.f32 %v3827_v44 }
0x17d1   : > { %6083 = vrcp.f32 %v3829_v8 }
0x17d2   : > { %6085 = vrcp.f32 %v3828_v29 }
0x17d3   : > { %v6064_v11 = vpop.eup %6063 }
0x17d4   : > { %v6066_v16 = vpop.eup %6065  ;;  %v3878_v54 = vmul.f32 %v6064_v11, %v7887_v34 }
0x17d5   : > { %v6068_v26 = vpop.eup %6067  ;;  %v3880_v59 = vmul.f32 %v6066_v16, %v7890_v14 }
0x17d6   : > { %v6070_v28 = vpop.eup %6069  ;;  %v3879_v50 = vmul.f32 %v6068_v26, %v7895_v37 }
0x17d7   : > { %v6072_v31 = vpop.eup %6071  ;;  %v3881_v56 = vmul.f32 %v6070_v28, %v7898_v38 }
0x17d8   : > { %v6074_v33 = vpop.eup %6073  ;;  %v3882_v39 = vmul.f32 %v6072_v31, %v7902_v62 }
0x17d9   : > { %v6076_v43 = vpop.eup %6075  ;;  %v3884_v4 = vmul.f32 %v6074_v33, %v7906_v52 }
0x17da   : > { %v6078_v17 = vpop.eup %6077  ;;  %v3883_v51 = vmul.f32 %v6076_v43, %v7910_v55  ;;  %v3894_v62 = vpack.c.bf16 %v3882_v39, %v3878_v54 }
0x17db   : > { %v3885_v57 = vmul.f32 %v6078_v17, %v7914_v7  ;;  %v6080_v15 = vpop.eup %6079  ;;  %v3896_v52 = vpack.c.bf16 %v3884_v4, %v3880_v59 }
0x17dc   : > { %v3895_v1 = vpack.c.bf16 %v3883_v51, %v3879_v50  ;;  %v3886_v38 = vmul.f32 %v6080_v15, %v7918_v30 }
0x17dd   : > { %v6082_v42 = vpop.eup %6081  ;;  %v3897_v35 = vpack.c.bf16 %v3885_v57, %v3881_v56 }
0x17de   : > { %v6084_v49 = vpop.eup %6083  ;;  %v3887_v37 = vmul.f32 %v6082_v42, %v7926_v19  ;;  %4205 = vmatprep.mubr.bf16.mxu0 %v3895_v1  ;;  %v3898_v58 = vpack.c.bf16 %v3886_v38, %v3886_v38 }
0x17df   : > { %v6086_v41 = vpop.eup %6085  ;;  %v3889_v55 = vmul.f32 %v6084_v49, %v7930_v47  ;;  %4261 = vmatprep.mubr.bf16.mxu1 %v3897_v35  ;;  %4206 = vmatmul.mubr.bf16.gmra.mxu0 %v3894_v62  ;;  %v5132_v47 = vld [vmem:[%s8190_s2] ss:$0 sm:$0xff] }
0x17e0   : > { %v3899_v34 = vpack.c.bf16 %v3887_v37, %v3887_v37  ;;  %4262 = vmatmul.mubr.bf16.gmra.mxu1 %v3896_v52  ;;  %v3888_v7 = vmul.f32 %v6086_v41, %v7922_v20 }
0x17e1   : > { %v3901_v14 = vpack.c.bf16 %v3889_v55, %v3889_v55 }
0x17e2   : > { %4213 = vmatprep.mubr.bf16.mxu0 %v3899_v34  ;;  %v3900_v53 = vpack.c.bf16 %v3888_v7, %v3888_v7 }
0x17e3   : > { %4269 = vmatprep.mubr.bf16.mxu1 %v3901_v14 }
0x17e7   : > { %4214 = vmatmul.mubr.bf16.gmra.mxu0 %v3898_v58 }
0x17e8   : > { %4270 = vmatmul.mubr.bf16.gmra.mxu1 %v3900_v53 }
0x1818   : > { %v5330_v19 = vpop.f32.mrf.mxu0 }
0x1819   : > { %v5364_v22 = vpop.f32.mrf.mxu1 }
0x181a   : > { %v5331_v60 = vpop.f32.mrf.mxu0 }
0x181b   : > { %v5332_v24 = vadd.f32 %v5331_v60, %v5330_v19  ;;  %v5365_v6 = vpop.f32.mrf.mxu1 }
0x181c   : > { %v5333_v27 = vpop.f32.mrf.mxu0  ;;  %v5366_v21 = vadd.f32 %v5365_v6, %v5364_v22 }
0x181d   : > { %v4200_v40 = vadd.f32 %v5332_v24, %v5132_v47  ;;  %v5367_v30 = vpop.f32.mrf.mxu1 }
0x181e   : > { %v5334_v63 = vpop.f32.mrf.mxu0 }
0x181f   : > { %v4256_v0 = vadd.f32 %v5366_v21, %v4200_v40  ;;  %v5335_v20 = vadd.f32 %v5334_v63, %v5333_v27  ;;  %v5368_v13 = vpop.f32.mrf.mxu1 }
0x1820   : > { %v5369_v2 = vadd.f32 %v5368_v13, %v5367_v30 }
0x1821   : > { %v7949_v45 = vadd.f32 %v4256_v0, %v7698_v46  ;;  %v4203_v23 = vadd.f32 %v5335_v20, %v5132_v47 }
0x1823   : > { %4282 = vst [vmem:[#allocation2 + $0x8] sm:$0xff] %v7949_v45  ;;  %v4259_v5 = vadd.f32 %v5369_v2, %v4203_v23 }
0x1825   : > { %v7953_v36 = vadd.f32 %v4259_v5, %v7701_v48 }
0x1827   : > { %4283 = vst [vmem:[#allocation2] sm:$0xff] %v7953_v36 }
0x189f   : > { %v5336_v29 = vpop.f32.mrf.mxu0 }
0x18a0   : > { %v5370_v44 = vpop.f32.mrf.mxu1 }
0x18a1   : > { %v5337_v8 = vpop.f32.mrf.mxu0 }
0x18a2   : > { %v5338_v11 = vadd.f32 %v5337_v8, %v5336_v29  ;;  %v5371_v16 = vpop.f32.mrf.mxu1 }
0x18a3   : > { %v5339_v26 = vpop.f32.mrf.mxu0  ;;  %v5372_v31 = vadd.f32 %v5371_v16, %v5370_v44 }
0x18a4   : > { %v4208_v28 = vadd.f32 %v5338_v11, %v5132_v47  ;;  %v5373_v46 = vpop.f32.mrf.mxu1 }
0x18a5   : > { %v5340_v33 = vpop.f32.mrf.mxu0 }
0x18a6   : > { %v4264_v43 = vadd.f32 %v5372_v31, %v4208_v28  ;;  %v5341_v39 = vadd.f32 %v5340_v33, %v5339_v26  ;;  %v5374_v17 = vpop.f32.mrf.mxu1 }
0x18a7   : > { %v5342_v50 = vpop.f32.mrf.mxu0  ;;  %v5375_v51 = vadd.f32 %v5374_v17, %v5373_v46 }
0x18a8   : > { %v7957_v4 = vadd.f32 %v4264_v43, %v7717_v25  ;;  %v4211_v48 = vadd.f32 %v5341_v39, %v5132_v47  ;;  %v5376_v54 = vpop.f32.mrf.mxu1 }
0x18a9   : > { %v5343_v56 = vpop.f32.mrf.mxu0 }
0x18aa   : > { %4284 = vst [vmem:[#allocation2 + $0x20] sm:$0xff] %v7957_v4  ;;  %v4267_v57 = vadd.f32 %v5375_v51, %v4211_v48  ;;  %v5344_v15 = vadd.f32 %v5343_v56, %v5342_v50  ;;  %v5377_v59 = vpop.f32.mrf.mxu1 }
0x18ab   : > { %v5345_v1 = vpop.f32.mrf.mxu0  ;;  %v5378_v62 = vadd.f32 %v5377_v59, %v5376_v54 }
0x18ac   : > { %v7961_v42 = vadd.f32 %v4267_v57, %v7720_v61  ;;  %v4216_v35 = vadd.f32 %v5344_v15, %v5132_v47  ;;  %v5379_v49 = vpop.f32.mrf.mxu1 }
0x18ad   : > { %v5346_v37 = vpop.f32.mrf.mxu0 }
0x18ae   : > { %4285 = vst [vmem:[#allocation2 + $0x10] sm:$0xff] %v7961_v42  ;;  %v4272_v25 = vadd.f32 %v5378_v62, %v4216_v35  ;;  %v5380_v52 = vpop.f32.mrf.mxu1  ;;  %4290 = sbr.rel (%p5165_p6) target bundleno = 6572 (0x19ac), region = 168 }
0x18b0   : > { %v7965_v41 = vadd.f32 %v4272_v25, %v7723_v3 }
0x18b2   : > { %4286 = vst [vmem:[#allocation2 + $0x18] sm:$0x3] %v7965_v41 }
0x18b3   : > { %v6092_v55 = vld [vmem:[#allocation23 + $0xe4] ss:$16 sps:$4 sm:$0xff]   ;;  %v6094_v34 = vld [vmem:[#allocation23 + $0xec] ss:$16 sps:$4 sm:$0xff]   ;;  %v6618_v61 = vmov 0   ;;  %v4291_v31 = vpack.c.bf16 %v7953_v36, %v7949_v45  ;;  %v4292_v46 = vpack.c.bf16 %v7961_v42, %v7957_v4  ;;  %v4293_v45 = vpack.c.bf16 %v7965_v41, %v7965_v41 }
0x18b4   : > { %4540 = vmatprep.mubr.bf16.mxu0 %v6618_v61  ;;  %4601 = vmatprep.mubr.bf16.mxu1 %v6618_v61  ;;  %v6096_v38 = vld [vmem:[#allocation23 + $0xe0] ss:$16 sps:$4 sm:$0xff]   ;;  %v6097_v14 = vld [vmem:[#allocation23 + $0xe8] ss:$16 sps:$4 sm:$0xff]   ;;  %v6098_v7 = vld [vmem:[#allocation23 + $0xc4] ss:$16 sps:$4 sm:$0xff]  }
0x18b5   : > { %4508 = vmatprep.subr.bf16.mxu0 %v6092_v55  ;;  %4569 = vmatprep.subr.bf16.mxu1 %v6094_v34  ;;  %v6100_v3 = vld [vmem:[#allocation23 + $0xcc] ss:$16 sps:$4 sm:$0xff]   ;;  %v6102_v58 = vld [vmem:[#allocation23 + $0xc0] ss:$16 sps:$4 sm:$0xff]   ;;  %v6103_v53 = vld [vmem:[#allocation23 + $0xc8] ss:$16 sps:$4 sm:$0xff]  }
0x18b6   : > { %4509 = vmatpush1.bf16.msra.mxu0 %v6096_v38  ;;  %4570 = vmatpush1.bf16.msra.mxu1 %v6097_v14  ;;  %v6104_v19 = vld [vmem:[#allocation23 + $0xa4] ss:$16 sps:$4 sm:$0xff]   ;;  %v6106_v22 = vld [vmem:[#allocation23 + $0xac] ss:$16 sps:$4 sm:$0xff]   ;;  %v6108_v47 = vld [vmem:[#allocation23 + $0xa0] ss:$16 sps:$4 sm:$0xff]  }
0x18b7   : > { %4510 = vmatprep.subr.bf16.mxu0 %v6098_v7  ;;  %4571 = vmatprep.subr.bf16.mxu1 %v6100_v3  ;;  %v6109_v60 = vld [vmem:[#allocation23 + $0xa8] ss:$16 sps:$4 sm:$0xff]   ;;  %v6110_v24 = vld [vmem:[#allocation23 + $0x84] ss:$16 sps:$4 sm:$0xff]   ;;  %v6112_v6 = vld [vmem:[#allocation23 + $0x8c] ss:$16 sps:$4 sm:$0xff]  }
0x18b8   : > { %v6114_v27 = vld [vmem:[#allocation23 + $0x80] ss:$16 sps:$4 sm:$0xff]   ;;  %v6115_v40 = vld [vmem:[#allocation23 + $0x88] ss:$16 sps:$4 sm:$0xff]   ;;  %v6116_v21 = vld [vmem:[#allocation23 + $0x64] ss:$16 sps:$4 sm:$0xff]  }
0x18b9   : > { %v6118_v30 = vld [vmem:[#allocation23 + $0x6c] ss:$16 sps:$4 sm:$0xff]   ;;  %v6120_v63 = vld [vmem:[#allocation23 + $0x60] ss:$16 sps:$4 sm:$0xff]   ;;  %v6121_v0 = vld [vmem:[#allocation23 + $0x68] ss:$16 sps:$4 sm:$0xff]  }
0x18ba   : > { %4511 = vmatpush1.bf16.msra.mxu0 %v6102_v58  ;;  %4572 = vmatpush1.bf16.msra.mxu1 %v6103_v53  ;;  %v6122_v20 = vld [vmem:[#allocation23 + $0x44] ss:$16 sps:$4 sm:$0xff]   ;;  %v6124_v13 = vld [vmem:[#allocation23 + $0x4c] ss:$16 sps:$4 sm:$0xff]   ;;  %v6126_v23 = vld [vmem:[#allocation23 + $0x40] ss:$16 sps:$4 sm:$0xff]  }
0x18bb   : > { %4512 = vmatprep.subr.bf16.mxu0 %v6104_v19  ;;  %4573 = vmatprep.subr.bf16.mxu1 %v6106_v22  ;;  %v6127_v2 = vld [vmem:[#allocation23 + $0x48] ss:$16 sps:$4 sm:$0xff]   ;;  %v6128_v5 = vld [vmem:[#allocation23 + $0x24] ss:$16 sps:$4 sm:$0xff]   ;;  %v6130_v29 = vld [vmem:[#allocation23 + $0x2c] ss:$16 sps:$4 sm:$0xff]  }
0x18bc   : > { %v6132_v44 = vld [vmem:[#allocation23 + $0x20] ss:$16 sps:$4 sm:$0xff]   ;;  %v6133_v8 = vld [vmem:[#allocation23 + $0x28] ss:$16 sps:$4 sm:$0xff]   ;;  %v6134_v11 = vld [vmem:[#allocation23 + $0x4] ss:$16 sps:$4 sm:$0xff]  }
0x18bd   : > { %v6136_v16 = vld [vmem:[#allocation23 + $0xc] ss:$16 sps:$4 sm:$0xff]   ;;  %v6138_v26 = vld [vmem:[#allocation23] ss:$16 sps:$4 sm:$0xff]   ;;  %v6139_v28 = vld [vmem:[#allocation23 + $0x8] ss:$16 sps:$4 sm:$0xff]  }
0x18be   : > { %4513 = vmatpush1.bf16.msra.mxu0 %v6108_v47  ;;  %4574 = vmatpush1.bf16.msra.mxu1 %v6109_v60  ;;  %v4326_v36 = vld [vmem:[#allocation24] sm:$0xf] }
0x18bf   : > { %4514 = vmatprep.subr.bf16.mxu0 %v6110_v24  ;;  %4575 = vmatprep.subr.bf16.mxu1 %v6112_v6  ;;  %v4331_v33 = vrot.slane %v4326_v36, %v3430_v10  ;;  %v4339_v43 = vrot.slane %v4326_v36, %v3438_v18  ;;  %v4335_v39 = vrot.slane %v4326_v36, %v3434_v12 }
0x18c0   : > { %v4343_v17 = vrot.slane %v4326_v36, %v3442_v32 }
0x18c2   : > { %4515 = vmatpush1.bf16.msra.mxu0 %v6114_v27  ;;  %4576 = vmatpush1.bf16.msra.mxu1 %v6115_v40 }
0x18c3   : > { %4516 = vmatprep.subr.bf16.mxu0 %v6116_v21  ;;  %4577 = vmatprep.subr.bf16.mxu1 %v6118_v30 }
0x18c6   : > { %4517 = vmatpush1.bf16.msra.mxu0 %v6120_v63  ;;  %4578 = vmatpush1.bf16.msra.mxu1 %v6121_v0 }
0x18c7   : > { %4518 = vmatprep.subr.bf16.mxu0 %v6122_v20  ;;  %4579 = vmatprep.subr.bf16.mxu1 %v6124_v13 }
0x18ca   : > { %4519 = vmatpush1.bf16.msra.mxu0 %v6126_v23  ;;  %4580 = vmatpush1.bf16.msra.mxu1 %v6127_v2 }
0x18cb   : > { %4520 = vmatprep.subr.bf16.mxu0 %v6128_v5  ;;  %4581 = vmatprep.subr.bf16.mxu1 %v6130_v29 }
0x18ce   : > { %4521 = vmatpush1.bf16.msra.mxu0 %v6132_v44  ;;  %4582 = vmatpush1.bf16.msra.mxu1 %v6133_v8 }
0x18cf   : > { %4522 = vmatprep.subr.bf16.mxu0 %v6134_v11  ;;  %4583 = vmatprep.subr.bf16.mxu1 %v6136_v16 }
0x18d2   : > { %4523 = vmatpush1.bf16.msra.mxu0 %v6138_v26  ;;  %4584 = vmatpush1.bf16.msra.mxu1 %v6139_v28 }
0x18d5   : > { %4541 = vmatmul.mubr.bf16.vlgmr.msra.gmra.mxu0 %v4291_v31  ;;  %4602 = vmatmul.mubr.bf16.vlgmr.msra.gmra.mxu1 %v4291_v31 }
0x18d6   : > { %4550 = vmatprep.mubr.bf16.mxu0 %v6618_v61  ;;  %4611 = vmatprep.mubr.bf16.mxu1 %v6618_v61 }
0x18dd   : > { %4551 = vmatmul.mubr.bf16.gmra.mxu0 %v4292_v46  ;;  %4612 = vmatmul.mubr.bf16.gmra.mxu1 %v4292_v46 }
0x18de   : > { %4560 = vmatprep.mubr.bf16.mxu0 %v6618_v61  ;;  %4621 = vmatprep.mubr.bf16.mxu1 %v6618_v61 }
0x18e5   : > { %4561 = vmatmul.mubr.bf16.gmra.mxu0 %v4293_v45  ;;  %4622 = vmatmul.mubr.bf16.gmra.mxu1 %v4293_v45 }
0x1995   : > { %v4542_v50 = vpop.f32.mrf.mxu0  ;;  %v4603_v4 = vpop.f32.mrf.mxu1 }
0x1996   : > { %v4543_v48 = vadd.f32 %v4542_v50, %v4331_v33  ;;  %v4604_v51 = vadd.f32 %v4603_v4, %v4339_v43 }
0x1997   : > { %v4544_v54 = vpop.f32.mrf.mxu0  ;;  %v4605_v56 = vpop.f32.mrf.mxu1 }
0x1998   : > { %4630 = vst [vmem:[%s8192_s12] sm:$0xff] %v4543_v48  ;;  %4632 = vst [vmem:[%s8192_s12 + $0x10] sm:$0xff] %v4604_v51  ;;  %v4545_v10 = vadd.f32 %v4544_v54, %v4335_v39  ;;  %v4606_v18 = vadd.f32 %v4605_v56, %v4343_v17 }
0x1999   : > { %v4546_v12 = vpop.f32.mrf.mxu0  ;;  %v4607_v57 = vpop.f32.mrf.mxu1 }
0x199a   : > { %4631 = vst [vmem:[%s8192_s12 + $0x8] sm:$0xff] %v4545_v10  ;;  %4633 = vst [vmem:[%s8192_s12 + $0x18] sm:$0xff] %v4606_v18  ;;  %v4547_v9 = vadd.f32 %v4546_v12, %v4331_v33  ;;  %v4608_v32 = vadd.f32 %v4607_v57, %v4339_v43 }
0x199b   : > { %v4548_v15 = vpop.f32.mrf.mxu0  ;;  %v4609_v59 = vpop.f32.mrf.mxu1 }
0x199c   : > { %4634 = vst [vmem:[%s8192_s12 + $0x20] sm:$0xff] %v4547_v9  ;;  %4636 = vst [vmem:[%s8192_s12 + $0x30] sm:$0xff] %v4608_v32  ;;  %v4549_v1 = vadd.f32 %v4548_v15, %v4335_v39  ;;  %v4610_v42 = vadd.f32 %v4609_v59, %v4343_v17 }
0x199d   : > { %v4552_v35 = vpop.f32.mrf.mxu0  ;;  %v4613_v62 = vpop.f32.mrf.mxu1 }
0x199e   : > { %4635 = vst [vmem:[%s8192_s12 + $0x28] sm:$0xff] %v4549_v1  ;;  %4637 = vst [vmem:[%s8192_s12 + $0x38] sm:$0xff] %v4610_v42  ;;  %v4553_v49 = vadd.f32 %v4552_v35, %v4331_v33  ;;  %v4614_v37 = vadd.f32 %v4613_v62, %v4339_v43 }
0x199f   : > { %v4554_v25 = vpop.f32.mrf.mxu0  ;;  %v4615_v52 = vpop.f32.mrf.mxu1 }
0x19a0   : > { %4638 = vst [vmem:[%s8192_s12 + $0x40] sm:$0xff] %v4553_v49  ;;  %4640 = vst [vmem:[%s8192_s12 + $0x50] sm:$0xff] %v4614_v37  ;;  %v4555_v41 = vadd.f32 %v4554_v25, %v4335_v39  ;;  %v4616_v55 = vadd.f32 %v4615_v52, %v4343_v17 }
0x19a1   : > { %v4556_v34 = vpop.f32.mrf.mxu0  ;;  %v4617_v61 = vpop.f32.mrf.mxu1 }
0x19a2   : > { %4639 = vst [vmem:[%s8192_s12 + $0x48] sm:$0xff] %v4555_v41  ;;  %4641 = vst [vmem:[%s8192_s12 + $0x58] sm:$0xff] %v4616_v55  ;;  %v4557_v38 = vadd.f32 %v4556_v34, %v4331_v33  ;;  %v4618_v14 = vadd.f32 %v4617_v61, %v4339_v43 }
0x19a3   : > { %v4558_v7 = vpop.f32.mrf.mxu0  ;;  %v4619_v3 = vpop.f32.mrf.mxu1 }
0x19a4   : > { %4642 = vst [vmem:[%s8192_s12 + $0x60] sm:$0xff] %v4557_v38  ;;  %4644 = vst [vmem:[%s8192_s12 + $0x70] sm:$0xff] %v4618_v14  ;;  %v4559_v58 = vadd.f32 %v4558_v7, %v4335_v39  ;;  %v4620_v53 = vadd.f32 %v4619_v3, %v4343_v17 }
0x19a5   : > { %v4562_v19 = vpop.f32.mrf.mxu0  ;;  %v4623_v22 = vpop.f32.mrf.mxu1 }
0x19a6   : > { %4643 = vst [vmem:[%s8192_s12 + $0x68] sm:$0xff] %v4559_v58  ;;  %4645 = vst [vmem:[%s8192_s12 + $0x78] sm:$0xff] %v4620_v53  ;;  %v4563_v47 = vadd.f32 %v4562_v19, %v4331_v33  ;;  %v4624_v60 = vadd.f32 %v4623_v22, %v4339_v43 }
0x19a7   : > { %v4564_v24 = vpop.f32.mrf.mxu0  ;;  %v4625_v6 = vpop.f32.mrf.mxu1 }
0x19a8   : > { %4646 = vst [vmem:[%s8192_s12 + $0x80] sm:$0x3] %v4563_v47  ;;  %4648 = vst [vmem:[%s8192_s12 + $0x90] sm:$0x3] %v4624_v60  ;;  %v4565_v27 = vadd.f32 %v4564_v24, %v4335_v39  ;;  %v4626_v40 = vadd.f32 %v4625_v6, %v4343_v17 }
0x19a9   : > { %v4566_v21 = vpop.f32.mrf.mxu0  ;;  %v4627_v30 = vpop.f32.mrf.mxu1 }
0x19aa   : > { %4647 = vst [vmem:[%s8192_s12 + $0x88] sm:$0x3] %v4565_v27  ;;  %4649 = vst [vmem:[%s8192_s12 + $0x98] sm:$0x3] %v4626_v40 }
0x19ab   : > { %v4567_v63 = vpop.f32.mrf.mxu0  ;;  %v4628_v0 = vpop.f32.mrf.mxu1 }
0x19ac PF: > { %s8193_s27 = sld [smem:[#allocation38_spill]] }
0x19ad   : > { %s8194_s2 = sld [smem:[#allocation35_spill]] }
0x19ae   : > { %s8195_s25 = sld [smem:[#allocation36_spill]] }
0x19af   : > { %s8196_s26 = sld [smem:[#allocation39_spill]] }
0x19b2   : > { %p48_p7 = scmp.ge.s32.totalorder %s8193_s27, 8  }
0x19b4   :  { %50 = sbr.rel (!%p48_p7) target bundleno = 33 (0x21), region = 296 }
0x19b9   :  { %4661 = vsyncpa [#allocation5], 1 }
0x19ba   :  { %4663 = vsyncpa [#allocation5 + $0x1], 1 }
0x19bb   :  { %4664 = vsyncpa [#allocation7], 1 }
0x19bc   :  { %4666 = vsyncpa [#allocation7 + $0x1], 1 }
0x19bd   :  { %4667 = vsyncpa [#allocation10], 1 }
0x19be   :  { %4669 = vsyncpa [#allocation10 + $0x1], 1 }
0x19bf   :  { %4670 = vsyncpa [#allocation13], 1 }
0x19c0   :  { %4672 = vsyncpa [#allocation13 + $0x1], 1 }
0x19c1   :  { %4673 = vsyncpa [#allocation16], 1 }
0x19c2   :  { %4675 = vsyncpa [#allocation16 + $0x1], 1 }
0x19c3   :  { %4676 = vsyncpa [#allocation19], 1 }
0x19c4   :  { %4678 = vsyncpa [#allocation19 + $0x1], 1 }
0x19c5   :  { %4679 = vsyncpa [#allocation22], 1 }
0x19c6   :  { %4681 = vsyncpa [#allocation22 + $0x1], 1 }
0x19c7   :  { %4682 = vsyncpa [#allocation25], 1 }

</bundles_post_ra>
